<compile_context>
chip_gen: v5e
topology: v5e:2x2
jax: 0.10.0
libtpu: 0.0.40
codegen_flags: <defaults>
</compile_context>

<pallas_src>
import functools
import math

import jax
import jax.numpy as jnp
from jax.experimental import pallas as pl
from jax.experimental.pallas import tpu as pltpu


def _bf16(x):
    return x.astype(jnp.bfloat16)


# ----------------------------------------------------------------------------
# small pallas_call helper: grid=(1,), whole-array VMEM blocks (shapes are tiny)
# ----------------------------------------------------------------------------
def _fullspec(shape):
    n = len(shape)
    return pl.BlockSpec(shape, lambda i, n=n: (0,) * n)


def _call(kernel, out_shape, *arrays):
    if isinstance(out_shape, (tuple, list)):
        out_specs = tuple(_fullspec(s.shape) for s in out_shape)
    else:
        out_specs = _fullspec(out_shape.shape)
    return pl.pallas_call(
        kernel,
        out_shape=out_shape,
        grid=(1,),
        in_specs=[_fullspec(a.shape) for a in arrays],
        out_specs=out_specs,
        compiler_params=pltpu.CompilerParams(dimension_semantics=("arbitrary",)),
    )(*arrays)


# ----------------------------------------------------------------------------
# Kernel 1: fused GuidanceVAE + guidance projections (one pallas_call)
#   encoder LSTM -> fused mu/logvar head -> reparameterize ->
#   guidance_to_dmodel & feature_proj -> decoder LSTM -> recon head
# ----------------------------------------------------------------------------
def _vae_kernel(x_ref, eps_ref,
                ewih_ref, ewhh_ref, eb_ref, mlw_ref, mlb_ref,
                dwih_ref, dwhh_ref, db_ref, rw_ref, rb_ref,
                gw_ref, gb_ref, fw_ref, fb_ref,
                ml_ref, z_ref, zd_ref, zp_ref, rec_ref, *, H, L, T_dec):
    T_enc, B, _ = x_ref.shape

    def lstm_step(gates, c):
        # fused-gate layout: columns are [i | f | g | o] blocks of width H
        i = jax.nn.sigmoid(gates[:, 0 * H:1 * H])
        f = jax.nn.sigmoid(gates[:, 1 * H:2 * H])
        g = jnp.tanh(gates[:, 2 * H:3 * H])
        o = jax.nn.sigmoid(gates[:, 3 * H:4 * H])
        c_new = f * c + i * g
        return o * jnp.tanh(c_new), c_new

    # ---- encoder LSTM (one 4H-wide fused-gate matmul per step) ----
    ewih = ewih_ref[...]          # (E, 4H) bf16
    ewhh = ewhh_ref[...]          # (H, 4H) bf16
    eb = eb_ref[...]              # (1, 4H) f32
    h = jnp.zeros((B, H), jnp.float32)
    c = jnp.zeros((B, H), jnp.float32)
    for t in range(T_enc):        # serial recurrence
        # x_ref[t] is an aligned leading-axis load — no relayout in the loop
        gates = (jnp.dot(_bf16(x_ref[t]), ewih, preferred_element_type=jnp.float32) + eb
                 + jnp.dot(_bf16(h), ewhh, preferred_element_type=jnp.float32))
        h, c = lstm_step(gates, c)

    # ---- fused mu/logvar head, reparameterize, guidance & feature proj ----
    ml = (jnp.dot(_bf16(h), mlw_ref[...], preferred_element_type=jnp.float32)
          + mlb_ref[...])                                      # (B, 2L) = [mu | logvar]
    ml_ref[...] = ml.astype(ml_ref.dtype)
    mu = ml[:, :L]
    logvar = ml[:, L:]
    z = mu + eps_ref[...] * jnp.exp(0.5 * logvar)
    z_ref[...] = z.astype(z_ref.dtype)
    zd_ref[...] = (jnp.dot(_bf16(z), gw_ref[...], preferred_element_type=jnp.float32)
                   + gb_ref[...]).astype(zd_ref.dtype)
    zp_ref[...] = (jnp.dot(_bf16(z), fw_ref[...], preferred_element_type=jnp.float32)
                   + fb_ref[...]).astype(zp_ref.dtype)

    # ---- decoder LSTM: input is z repeated over time -> z@Wih hoisted once ----
    xwd = (jnp.dot(_bf16(z), dwih_ref[...], preferred_element_type=jnp.float32)
           + db_ref[...])                                      # (B, 4H), same for every t
    dwhh = dwhh_ref[...]
    h = jnp.zeros((B, H), jnp.float32)
    c = jnp.zeros((B, H), jnp.float32)
    hs = []
    for t in range(T_dec):
        gates = xwd + jnp.dot(_bf16(h), dwhh, preferred_element_type=jnp.float32)
        h, c = lstm_step(gates, c)
        hs.append(h)
    # ONE recon matmul + ONE dense store (was T tiny matmuls / masked stores)
    hcat = jnp.concatenate(hs, axis=0)                         # (T_dec*B, H), time-major
    rec = (jnp.dot(_bf16(hcat), rw_ref[...], preferred_element_type=jnp.float32)
           + rb_ref[...])                                      # (T_dec*B, V)
    rec_ref[...] = rec.astype(rec_ref.dtype)


def pallas_vae_guidance(x_tbe, eps, vp, gw, gb, *, T_dec):
    T_enc, B, _ = x_tbe.shape
    H = vp["enc_whh"].shape[0]
    L = eps.shape[1]
    D = gw.shape[1]
    F = vp["feat_w"].shape[1]
    V = vp["recon_w"].shape[1]
    out_shape = (jax.ShapeDtypeStruct((B, 2 * L), jnp.float32),      # [mu | logvar]
                 jax.ShapeDtypeStruct((B, L), jnp.float32),          # z
                 jax.ShapeDtypeStruct((B, D), jnp.float32),          # guidance_to_dmodel(z)
                 jax.ShapeDtypeStruct((B, F), jnp.float32),          # feature_proj(z)
                 jax.ShapeDtypeStruct((T_dec * B, V), jnp.float32))  # recon, time-major
    kern = functools.partial(_vae_kernel, H=H, L=L, T_dec=T_dec)
    return _call(kern, out_shape,
                 x_tbe, eps,
                 vp["enc_wih"], vp["enc_whh"], vp["enc_b"],
                 vp["mulogvar_w"], vp["mulogvar_b"],
                 vp["dec_wih"], vp["dec_whh"], vp["dec_b"],
                 vp["recon_w"], vp["recon_b"],
                 gw, gb, vp["feat_w"], vp["feat_b"])


# ----------------------------------------------------------------------------
# Kernel 2: whole FiLM-transformer stack in one pallas_call, grid=(num_layers,)
#   per layer: qkv proj + MHA (per-head out-proj accumulation) + add&LN +
#              FiLM(gamma/beta from z) + FFN(GELU) + add&LN
#   `src` (flattened to a (B*S, D) slab) stays resident across the layer axis.
# ----------------------------------------------------------------------------
_STACK_ORDER = ("wqkv", "bqkv", "wo", "bo", "g1", "b1",
                "w1", "bf1", "w2", "bf2",
                "wg", "bg", "wb", "bb", "g2", "b2")


def _film_stack_kernel(src_ref, z_ref,
                       wqkv_ref, bqkv_ref, wo_ref, bo_ref, g1_ref, b1_ref,
                       w1_ref, bf1_ref, w2_ref, bf2_ref,
                       wg_ref, bg_ref, wb_ref, bb_ref, g2_ref, b2_ref,
                       o_ref, *, nhead, batch, seqlen):
    layer = pl.program_id(0)
    B, S = batch, seqlen
    D = src_ref.shape[1]
    hd = D // nhead
    scale = 1.0 / math.sqrt(hd)

    @pl.when(layer == 0)
    def _():
        o_ref[...] = src_ref[...]          # initialize the resident carry

    x = o_ref[...].astype(jnp.float32)     # carried src slab (B*S, D)

    # ---- self-attention: ONE fused qkv matmul on the whole slab ----
    qkv = (jnp.dot(_bf16(x), wqkv_ref[0], preferred_element_type=jnp.float32)
           + bqkv_ref[0])                  # (B*S, 3D)
    wo = wo_ref[0]                         # (D, D) bf16
    attn_parts = []
    for bi in range(B):                    # the (S,S) score/softmax/PV path is per batch
        r0 = bi * S
        acc = jnp.zeros((S, D), jnp.float32)
        for h in range(nhead):             # per-head accumulation into out-proj (no lane concat)
            q = qkv[r0:r0 + S, h * hd:(h + 1) * hd] * scale
            k = qkv[r0:r0 + S, D + h * hd:D + (h + 1) * hd]
            v = qkv[r0:r0 + S, 2 * D + h * hd:2 * D + (h + 1) * hd]
            s = jax.lax.dot_general(_bf16(q), _bf16(k), (((1,), (1,)), ((), ())),
                                    preferred_element_type=jnp.float32)   # (S, S)
            s = s - jnp.max(s, axis=-1, keepdims=True)
            p = jnp.exp(s)
            p = p / jnp.sum(p, axis=-1, keepdims=True)                    # exact softmax
            ctx = jnp.dot(_bf16(p), _bf16(v), preferred_element_type=jnp.float32)
            acc = acc + jnp.dot(_bf16(ctx), wo[h * hd:(h + 1) * hd, :],
                                preferred_element_type=jnp.float32)
        attn_parts.append(acc)
    attn = jnp.concatenate(attn_parts, axis=0) + bo_ref[0]                # (B*S, D)

    # ---- add & LayerNorm 1 (dropout = identity, eval mode) ----
    y = x + attn
    mu = jnp.mean(y, axis=-1, keepdims=True)
    var = jnp.mean(jnp.square(y - mu), axis=-1, keepdims=True)
    src1 = (y - mu) * jax.lax.rsqrt(var + 1e-5) * g1_ref[0] + b1_ref[0]

    # ---- FiLM gamma/beta from z; FFN(GELU) on the whole slab ----
    zz = z_ref[...].astype(jnp.float32)                                   # (B, D)
    gam = jnp.dot(_bf16(zz), wg_ref[0], preferred_element_type=jnp.float32) + bg_ref[0]
    bet = jnp.dot(_bf16(zz), wb_ref[0], preferred_element_type=jnp.float32) + bb_ref[0]
    hft = (jnp.dot(_bf16(src1), w1_ref[0], preferred_element_type=jnp.float32)
           + bf1_ref[0])                                                  # (B*S, 4D)
    # TODO(synk): tanh-approx GELU; PyTorch nn.GELU() default is exact erf.
    cg = math.sqrt(2.0 / math.pi)
    hft = 0.5 * hft * (1.0 + jnp.tanh(cg * (hft + 0.044715 * hft * hft * hft)))
    ffn = (jnp.dot(_bf16(hft), w2_ref[0], preferred_element_type=jnp.float32)
           + bf2_ref[0])                                                  # (B*S, D)

    # per-row gamma/beta (batch bi owns rows [bi*S, (bi+1)*S)) — broadcast+concat,
    # no in-kernel reshape
    gam_rows = jnp.concatenate(
        [jnp.broadcast_to(gam[bi:bi + 1, :], (S, D)) for bi in range(B)], axis=0)
    bet_rows = jnp.concatenate(
        [jnp.broadcast_to(bet[bi:bi + 1, :], (S, D)) for bi in range(B)], axis=0)

    # ---- FiLM scale/shift, add & LayerNorm 2, single dense slab store ----
    y2 = src1 + gam_rows * ffn + bet_rows
    mu2 = jnp.mean(y2, axis=-1, keepdims=True)
    var2 = jnp.mean(jnp.square(y2 - mu2), axis=-1, keepdims=True)
    o_ref[...] = ((y2 - mu2) * jax.lax.rsqrt(var2 + 1e-5) * g2_ref[0]
                  + b2_ref[0]).astype(o_ref.dtype)


def pallas_film_stack(src, z, stk, nhead):
    B, S, D = src.shape
    num_layers = stk["wqkv"].shape[0]
    src2 = src.reshape(B * S, D)                       # XLA-side flatten (free)
    arrays = [src2, z]
    in_specs = [pl.BlockSpec((B * S, D), lambda l: (0, 0)),
                pl.BlockSpec(z.shape, lambda l: (0, 0))]
    for name in _STACK_ORDER:
        a = stk[name]
        in_specs.append(pl.BlockSpec((1,) + a.shape[1:], lambda l: (l, 0, 0)))
        arrays.append(a)
    out = pl.pallas_call(
        functools.partial(_film_stack_kernel, nhead=nhead, batch=B, seqlen=S),
        out_shape=jax.ShapeDtypeStruct((B * S, D), jnp.float32),
        grid=(num_layers,),
        in_specs=in_specs,
        out_specs=pl.BlockSpec((B * S, D), lambda l: (0, 0)),   # resident carry
        compiler_params=pltpu.CompilerParams(dimension_semantics=("arbitrary",)),
    )(*arrays)
    return out.reshape(B, S, D)


# ----------------------------------------------------------------------------
# Parameter initialization (deterministic, synthetic)
# ----------------------------------------------------------------------------
def dense_init(key, din, dout):
    kw, kb = jax.random.split(key)
    bound = 1.0 / math.sqrt(din)
    w = jax.random.uniform(kw, (din, dout), jnp.float32, -bound, bound)
    b = jax.random.uniform(kb, (dout,), jnp.float32, -bound, bound)
    return w, b


def lstm_init(key, din, hidden):
    k1, k2, k3 = jax.random.split(key, 3)
    bound = 1.0 / math.sqrt(hidden)
    # Fused-gate layout: columns are [i | f | g | o] blocks of width `hidden`.
    wih = jax.random.uniform(k1, (din, 4 * hidden), jnp.float32, -bound, bound)
    whh = jax.random.uniform(k2, (hidden, 4 * hidden), jnp.float32, -bound, bound)
    # TODO(synk): PyTorch nn.LSTM has separate b_ih and b_hh per gate; a weight
    #             converter must sum them into this single fused bias.
    b = jax.random.uniform(k3, (4 * hidden,), jnp.float32, -bound, bound)
    return wih, whh, b


def init_params(key, cfg):
    ks = iter(jax.random.split(key, 64))
    d = cfg["d_model"]
    V = cfg["chord_vocab_size"]
    seq_len = 1 + 2 * cfg["grid_length"]
    p = {}
    # plain-jnp prologue projections stay f32
    p["condition_proj_w"], p["condition_proj_b"] = dense_init(next(ks), cfg["conditioning_dim"], d)
    p["melody_proj_w"], p["melody_proj_b"] = dense_init(next(ks), cfg["pianoroll_dim"], d)
    p["harmony_embedding"] = jax.random.normal(next(ks), (V, d), jnp.float32)
    gw, gb = dense_init(next(ks), cfg["guidance_dim"], d)
    p["guidance_w"] = _bf16(gw)                    # consumed inside the VAE kernel
    p["guidance_b"] = gb.reshape(1, d)
    p["pos_embedding"] = jax.random.normal(next(ks), (1, seq_len, d), jnp.float32)

    vc = cfg["vae"]
    H, L = vc["hidden_dim"], vc["latent_dim"]
    vae = {}
    vae["embedding"] = jax.random.normal(next(ks), (V, vc["embedding_dim"]), jnp.float32)
    ewih, ewhh, eb = lstm_init(next(ks), vc["embedding_dim"], H)
    vae["enc_wih"], vae["enc_whh"], vae["enc_b"] = _bf16(ewih), _bf16(ewhh), eb.reshape(1, -1)
    mw, mb = dense_init(next(ks), H, L)
    lw, lb = dense_init(next(ks), H, L)
    # TODO(synk): mu_proj / logvar_proj are fused into one (H, 2L) head here; a
    #             weight converter must concatenate them along the output axis.
    vae["mulogvar_w"] = _bf16(jnp.concatenate([mw, lw], axis=1))
    vae["mulogvar_b"] = jnp.concatenate([mb, lb], axis=0).reshape(1, -1)
    dwih, dwhh, db = lstm_init(next(ks), L, H)
    vae["dec_wih"], vae["dec_whh"], vae["dec_b"] = _bf16(dwih), _bf16(dwhh), db.reshape(1, -1)
    rw, rb = dense_init(next(ks), H, V)
    vae["recon_w"], vae["recon_b"] = _bf16(rw), rb.reshape(1, -1)
    fw, fb = dense_init(next(ks), L, vc["feature_dim"])
    vae["feat_w"], vae["feat_b"] = _bf16(fw), fb.reshape(1, -1)
    p["vae"] = vae

    ec = cfg["encoder"]
    enc = {}
    enc["stage_embedding"] = jax.random.normal(
        next(ks), (ec["max_stages"], ec["stage_embedding_dim"]), jnp.float32)
    enc["stage_proj_w"], enc["stage_proj_b"] = dense_init(next(ks), d + ec["stage_embedding_dim"], d)
    enc["input_norm_g"], enc["input_norm_b"] = jnp.ones((d,)), jnp.zeros((d,))
    enc["output_norm_g"], enc["output_norm_b"] = jnp.ones((d,)), jnp.zeros((d,))
    enc["head_w"], enc["head_b"] = dense_init(next(ks), d, V)

    # Per-layer params stacked on a leading `layer` axis so the whole stack is
    # one gridded pallas_call; MXU weights pre-cast to bf16 (halves weight DMA).
    def stack(mats, bf16=False, row=False):
        a = jnp.stack(mats, axis=0)
        if row:
            a = a.reshape(a.shape[0], 1, -1)
        return _bf16(a) if bf16 else a

    wqkv, bqkv, wo, bo = [], [], [], []
    w1, bff1, w2, bff2 = [], [], [], []
    wg, bg, wb, bb = [], [], [], []
    g1, b1, g2, b2 = [], [], [], []
    for _ in range(ec["num_layers"]):
        # TODO(synk): PyTorch MultiheadAttention stores in_proj_weight as (3D, D)
        #             applied as x @ W^T; a converter must transpose to (D, 3D).
        w_, b_ = dense_init(next(ks), d, 3 * d); wqkv.append(w_); bqkv.append(b_)
        w_, b_ = dense_init(next(ks), d, d);     wo.append(w_);   bo.append(b_)
        w_, b_ = dense_init(next(ks), d, 4 * d); w1.append(w_);   bff1.append(b_)
        w_, b_ = dense_init(next(ks), 4 * d, d); w2.append(w_);   bff2.append(b_)
        w_, b_ = dense_init(next(ks), d, d);     wg.append(w_);   bg.append(b_)
        w_, b_ = dense_init(next(ks), d, d);     wb.append(w_);   bb.append(b_)
        g1.append(jnp.ones((d,))); b1.append(jnp.zeros((d,)))
        g2.append(jnp.ones((d,))); b2.append(jnp.zeros((d,)))
    enc["stack"] = dict(
        wqkv=stack(wqkv, bf16=True), bqkv=stack(bqkv, row=True),
        wo=stack(wo, bf16=True), bo=stack(bo, row=True),
        g1=stack(g1, row=True), b1=stack(b1, row=True),
        w1=stack(w1, bf16=True), bf1=stack(bff1, row=True),
        w2=stack(w2, bf16=True), bf2=stack(bff2, row=True),
        wg=stack(wg, bf16=True), bg=stack(bg, row=True),
        wb=stack(wb, bf16=True), bb=stack(bb, row=True),
        g2=stack(g2, row=True), b2=stack(b2, row=True),
    )
    p["encoder"] = enc
    return p


# ----------------------------------------------------------------------------
# Model forward (dropout layers are identity — eval-mode semantics)
# ----------------------------------------------------------------------------
def _layernorm(x, g, b, eps=1e-5):
    mu = jnp.mean(x, axis=-1, keepdims=True)
    var = jnp.mean(jnp.square(x - mu), axis=-1, keepdims=True)
    return (x - mu) * jax.lax.rsqrt(var + eps) * g + b


def vae_and_guidance_forward(params, vcfg, tokens, eps_key):
    vp = params["vae"]
    emb = vp["embedding"][tokens]                              # (B, T, E) gather — plain jnp
    B, T, _ = emb.shape
    L = vcfg["latent_dim"]
    x_tbe = jnp.transpose(emb, (1, 0, 2))                      # time-major (T, B, E)
    eps = jax.random.normal(eps_key, (B, L), jnp.float32)      # reparameterization noise
    ml, z, z_dmodel, z_proj, rec_tm = pallas_vae_guidance(
        x_tbe, eps, vp, params["guidance_w"], params["guidance_b"],
        T_dec=vcfg["seq_len"])
    mu, logvar = ml[:, :L], ml[:, L:]
    recon = rec_tm.reshape(vcfg["seq_len"], B, -1).transpose(1, 0, 2)   # (B, T, V), XLA-side
    return z, mu, logvar, recon, z_proj, z_dmodel


def encoder_forward(p, full_seq, stage_indices, z, nhead):
    B, S, _ = full_seq.shape
    # Prologue (stage embedding + stage_proj + input LayerNorm) in plain jnp —
    # sub-µs matmuls, XLA fuses them; pallas_call here was pure launch overhead.
    stage_emb = p["stage_embedding"][stage_indices]            # (B, SD)
    stage_rep = jnp.broadcast_to(stage_emb[:, None, :], (B, S, stage_emb.shape[-1]))
    x = jnp.concatenate([full_seq, stage_rep], axis=-1)
    src = _layernorm(x @ p["stage_proj_w"] + p["stage_proj_b"],
                     p["input_norm_g"], p["input_norm_b"])
    # Whole transformer stack: ONE pallas_call, grid=(num_layers,).
    src = pallas_film_stack(src, z, p["stack"], nhead)
    # Epilogue (output LayerNorm + head) in plain jnp.
    src = _layernorm(src, p["output_norm_g"], p["output_norm_b"])
    return src[:, -256:, :] @ p["head_w"] + p["head_b"]


def guided_mlmh_forward(params, cfg, conditioning_vec, melody_grid,
                        harmony_tokens, guiding_harmony, stage_indices, eps_key):
    # Prologue projections / gathers / pos-emb add in plain jnp (dispatch-bound
    # at these sizes).
    cond_emb = (conditioning_vec @ params["condition_proj_w"]
                + params["condition_proj_b"])[:, None, :]
    melody_emb = melody_grid @ params["melody_proj_w"] + params["melody_proj_b"]
    harmony_emb = params["harmony_embedding"][harmony_tokens]
    input_seq = jnp.concatenate([cond_emb, melody_emb, harmony_emb], axis=1)
    input_seq = input_seq + params["pos_embedding"][:, :input_seq.shape[1], :]

    z, mu, logvar, recon, z_proj, z_dmodel = vae_and_guidance_forward(
        params, cfg["vae"], guiding_harmony, eps_key)
    return encoder_forward(params["encoder"], input_seq, stage_indices,
                           z_dmodel, cfg["encoder"]["nhead"])


# ----------------------------------------------------------------------------
if __name__ == "__main__":
    cfg = dict(
        d_model=32, nhead=4, chord_vocab_size=24, conditioning_dim=16,
        pianoroll_dim=12, grid_length=8, guidance_dim=16,
        vae=dict(input_dim=24, hidden_dim=32, latent_dim=16,
                 embedding_dim=16, seq_len=8, feature_dim=16),
        encoder=dict(nhead=4, num_layers=2, stage_embedding_dim=8, max_stages=4),
    )

    key = jax.random.PRNGKey(0)
    pkey, dkey, ekey = jax.random.split(key, 3)
    params = init_params(pkey, cfg)

    B = 2
    k1, k2, k3, k4, k5 = jax.random.split(dkey, 5)
    conditioning_vec = jax.random.normal(k1, (B, cfg["conditioning_dim"]), jnp.float32)
    melody_grid = jax.random.normal(k2, (B, cfg["grid_length"], cfg["pianoroll_dim"]), jnp.float32)
    harmony_tokens = jax.random.randint(k3, (B, cfg["grid_length"]), 0, cfg["chord_vocab_size"])
    guiding_harmony = jax.random.randint(k4, (B, cfg["vae"]["seq_len"]), 0, cfg["chord_vocab_size"])
    stage_indices = jax.random.randint(k5, (B,), 0, cfg["encoder"]["max_stages"])

    fwd = jax.jit(functools.partial(guided_mlmh_forward, params, cfg))
    out = fwd(conditioning_vec, melody_grid, harmony_tokens,
              guiding_harmony, stage_indices, ekey)

    # also exercise the full fused VAE path (recon head) explicitly
    vae_fwd = jax.jit(functools.partial(vae_and_guidance_forward, params, cfg["vae"]))
    z, mu, logvar, recon, z_proj, z_dmodel = vae_fwd(guiding_harmony, ekey)
    jax.block_until_ready((out, recon))

    S = 1 + 2 * cfg["grid_length"]
    assert out.shape == (B, min(S, 256), cfg["chord_vocab_size"]), out.shape
    assert recon.shape == (B, cfg["vae"]["seq_len"], cfg["chord_vocab_size"]), recon.shape
    assert bool(jnp.all(jnp.isfinite(out)))
    assert bool(jnp.all(jnp.isfinite(recon)))
    print("KERNEL_OK")
</pallas_src>

<mosaic_0001>
module attributes {stable_mosaic.version = 11 : i64} {
  func.func @_vae_kernel(%arg0: i32, %arg1: memref<8x2x16xf32, #tpu.memory_space<vmem>>, %arg2: memref<2x16xf32, #tpu.memory_space<vmem>>, %arg3: memref<16x128xbf16, #tpu.memory_space<vmem>>, %arg4: memref<32x128xbf16, #tpu.memory_space<vmem>>, %arg5: memref<1x128xf32, #tpu.memory_space<vmem>>, %arg6: memref<32x32xbf16, #tpu.memory_space<vmem>>, %arg7: memref<1x32xf32, #tpu.memory_space<vmem>>, %arg8: memref<16x128xbf16, #tpu.memory_space<vmem>>, %arg9: memref<32x128xbf16, #tpu.memory_space<vmem>>, %arg10: memref<1x128xf32, #tpu.memory_space<vmem>>, %arg11: memref<32x24xbf16, #tpu.memory_space<vmem>>, %arg12: memref<1x24xf32, #tpu.memory_space<vmem>>, %arg13: memref<16x32xbf16, #tpu.memory_space<vmem>>, %arg14: memref<1x32xf32, #tpu.memory_space<vmem>>, %arg15: memref<16x16xbf16, #tpu.memory_space<vmem>>, %arg16: memref<1x16xf32, #tpu.memory_space<vmem>>, %arg17: memref<2x32xf32, #tpu.memory_space<vmem>>, %arg18: memref<2x16xf32, #tpu.memory_space<vmem>>, %arg19: memref<2x32xf32, #tpu.memory_space<vmem>>, %arg20: memref<2x16xf32, #tpu.memory_space<vmem>>, %arg21: memref<16x24xf32, #tpu.memory_space<vmem>>) attributes {dimension_semantics = [#tpu.dimension_semantics<arbitrary>], iteration_bounds = array<i64: 1>, scalar_prefetch = 0 : i64, scratch_operands = 0 : i64, tpu.core_type = #tpu.core_type<tc>, window_params = [{pipeline_mode = #tpu.pipeline_mode<synchronous>, transform_indices = @transform_0, window_bounds = array<i64: 8, 2, 16>}, {pipeline_mode = #tpu.pipeline_mode<synchronous>, transform_indices = @transform_1, window_bounds = array<i64: 2, 16>}, {pipeline_mode = #tpu.pipeline_mode<synchronous>, transform_indices = @transform_2, window_bounds = array<i64: 16, 128>}, {pipeline_mode = #tpu.pipeline_mode<synchronous>, transform_indices = @transform_3, window_bounds = array<i64: 32, 128>}, {pipeline_mode = #tpu.pipeline_mode<synchronous>, transform_indices = @transform_4, window_bounds = array<i64: 1, 128>}, {pipeline_mode = #tpu.pipeline_mode<synchronous>, transform_indices = @transform_5, window_bounds = array<i64: 32, 32>}, {pipeline_mode = #tpu.pipeline_mode<synchronous>, transform_indices = @transform_6, window_bounds = array<i64: 1, 32>}, {pipeline_mode = #tpu.pipeline_mode<synchronous>, transform_indices = @transform_7, window_bounds = array<i64: 16, 128>}, {pipeline_mode = #tpu.pipeline_mode<synchronous>, transform_indices = @transform_8, window_bounds = array<i64: 32, 128>}, {pipeline_mode = #tpu.pipeline_mode<synchronous>, transform_indices = @transform_9, window_bounds = array<i64: 1, 128>}, {pipeline_mode = #tpu.pipeline_mode<synchronous>, transform_indices = @transform_10, window_bounds = array<i64: 32, 24>}, {pipeline_mode = #tpu.pipeline_mode<synchronous>, transform_indices = @transform_11, window_bounds = array<i64: 1, 24>}, {pipeline_mode = #tpu.pipeline_mode<synchronous>, transform_indices = @transform_12, window_bounds = array<i64: 16, 32>}, {pipeline_mode = #tpu.pipeline_mode<synchronous>, transform_indices = @transform_13, window_bounds = array<i64: 1, 32>}, {pipeline_mode = #tpu.pipeline_mode<synchronous>, transform_indices = @transform_14, window_bounds = array<i64: 16, 16>}, {pipeline_mode = #tpu.pipeline_mode<synchronous>, transform_indices = @transform_15, window_bounds = array<i64: 1, 16>}, {pipeline_mode = #tpu.pipeline_mode<synchronous>, transform_indices = @transform_16, window_bounds = array<i64: 2, 32>}, {pipeline_mode = #tpu.pipeline_mode<synchronous>, transform_indices = @transform_17, window_bounds = array<i64: 2, 16>}, {pipeline_mode = #tpu.pipeline_mode<synchronous>, transform_indices = @transform_18, window_bounds = array<i64: 2, 32>}, {pipeline_mode = #tpu.pipeline_mode<synchronous>, transform_indices = @transform_19, window_bounds = array<i64: 2, 16>}, {pipeline_mode = #tpu.pipeline_mode<synchronous>, transform_indices = @transform_20, window_bounds = array<i64: 16, 24>}]} {
    %c0 = arith.constant 0 : index
    %c0_0 = arith.constant 0 : index
    %0 = vector.load %arg3[%c0, %c0_0] : memref<16x128xbf16, #tpu.memory_space<vmem>>, vector<16x128xbf16>
    %c0_1 = arith.constant 0 : index
    %c0_2 = arith.constant 0 : index
    %1 = vector.load %arg4[%c0_1, %c0_2] : memref<32x128xbf16, #tpu.memory_space<vmem>>, vector<32x128xbf16>
    %c0_3 = arith.constant 0 : index
    %c0_4 = arith.constant 0 : index
    %2 = vector.load %arg5[%c0_3, %c0_4] : memref<1x128xf32, #tpu.memory_space<vmem>>, vector<1x128xf32>
    %cst = arith.constant 0.000000e+00 : f32
    %3 = vector.broadcast %cst : f32 to vector<2x32xf32>
    %cst_5 = arith.constant 0.000000e+00 : f32
    %4 = vector.broadcast %cst_5 : f32 to vector<2x32xf32>
    %c0_6 = arith.constant 0 : index
    %c0_7 = arith.constant 0 : index
    %c0_8 = arith.constant 0 : index
    %5 = vector.load %arg1[%c0_6, %c0_7, %c0_8] : memref<8x2x16xf32, #tpu.memory_space<vmem>>, vector<1x2x16xf32>
    %6 = vector.shape_cast %5 : vector<1x2x16xf32> to vector<2x16xf32>
    %7 = arith.truncf %6 : vector<2x16xf32> to vector<2x16xbf16>
    %cst_9 = arith.constant dense<0.000000e+00> : vector<2x128xf32>
    %8 = tpu.matmul %7, %0, %cst_9 {dimension_numbers = #tpu.dot_dimension_numbers<[1], [0], [0], [1], [0, 0, 1, 1], [], []>} : vector<2x16xbf16>, vector<16x128xbf16>, vector<2x128xf32> -> vector<2x128xf32>
    %9 = vector.broadcast %2 : vector<1x128xf32> to vector<2x128xf32>
    %10 = arith.addf %8, %9 : vector<2x128xf32>
    %11 = arith.truncf %3 : vector<2x32xf32> to vector<2x32xbf16>
    %cst_10 = arith.constant dense<0.000000e+00> : vector<2x128xf32>
    %12 = tpu.matmul %11, %1, %cst_10 {dimension_numbers = #tpu.dot_dimension_numbers<[1], [0], [0], [1], [0, 0, 1, 1], [], []>} : vector<2x32xbf16>, vector<32x128xbf16>, vector<2x128xf32> -> vector<2x128xf32>
    %13 = arith.addf %10, %12 : vector<2x128xf32>
    %14 = vector.extract_strided_slice %13 {offsets = [0, 0], sizes = [2, 32], strides = [1, 1]} : vector<2x128xf32> to vector<2x32xf32>
    %15 = arith.negf %14 : vector<2x32xf32>
    %16 = math.exp %15 : vector<2x32xf32>
    %cst_11 = arith.constant 1.000000e+00 : f32
    %17 = vector.broadcast %cst_11 : f32 to vector<2x32xf32>
    %18 = arith.addf %17, %16 : vector<2x32xf32>
    %19 = arith.divf %17, %18 : vector<2x32xf32>
    %20 = vector.extract_strided_slice %13 {offsets = [0, 32], sizes = [2, 32], strides = [1, 1]} : vector<2x128xf32> to vector<2x32xf32>
    %21 = arith.negf %20 : vector<2x32xf32>
    %22 = math.exp %21 : vector<2x32xf32>
    %cst_12 = arith.constant 1.000000e+00 : f32
    %23 = vector.broadcast %cst_12 : f32 to vector<2x32xf32>
    %24 = arith.addf %23, %22 : vector<2x32xf32>
    %25 = arith.divf %23, %24 : vector<2x32xf32>
    %26 = vector.extract_strided_slice %13 {offsets = [0, 64], sizes = [2, 32], strides = [1, 1]} : vector<2x128xf32> to vector<2x32xf32>
    %27 = math.tanh %26 : vector<2x32xf32>
    %28 = vector.extract_strided_slice %13 {offsets = [0, 96], sizes = [2, 32], strides = [1, 1]} : vector<2x128xf32> to vector<2x32xf32>
    %29 = arith.negf %28 : vector<2x32xf32>
    %30 = math.exp %29 : vector<2x32xf32>
    %cst_13 = arith.constant 1.000000e+00 : f32
    %31 = vector.broadcast %cst_13 : f32 to vector<2x32xf32>
    %32 = arith.addf %31, %30 : vector<2x32xf32>
    %33 = arith.divf %31, %32 : vector<2x32xf32>
    %34 = arith.mulf %25, %4 : vector<2x32xf32>
    %35 = arith.mulf %19, %27 : vector<2x32xf32>
    %36 = arith.addf %34, %35 : vector<2x32xf32>
    %37 = math.tanh %36 : vector<2x32xf32>
    %38 = arith.mulf %33, %37 : vector<2x32xf32>
    %c1 = arith.constant 1 : index
    %c0_14 = arith.constant 0 : index
    %c0_15 = arith.constant 0 : index
    %39 = vector.load %arg1[%c1, %c0_14, %c0_15] : memref<8x2x16xf32, #tpu.memory_space<vmem>>, vector<1x2x16xf32>
    %40 = vector.shape_cast %39 : vector<1x2x16xf32> to vector<2x16xf32>
    %41 = arith.truncf %40 : vector<2x16xf32> to vector<2x16xbf16>
    %cst_16 = arith.constant dense<0.000000e+00> : vector<2x128xf32>
    %42 = tpu.matmul %41, %0, %cst_16 {dimension_numbers = #tpu.dot_dimension_numbers<[1], [0], [0], [1], [0, 0, 1, 1], [], []>} : vector<2x16xbf16>, vector<16x128xbf16>, vector<2x128xf32> -> vector<2x128xf32>
    %43 = vector.broadcast %2 : vector<1x128xf32> to vector<2x128xf32>
    %44 = arith.addf %42, %43 : vector<2x128xf32>
    %45 = arith.truncf %38 : vector<2x32xf32> to vector<2x32xbf16>
    %cst_17 = arith.constant dense<0.000000e+00> : vector<2x128xf32>
    %46 = tpu.matmul %45, %1, %cst_17 {dimension_numbers = #tpu.dot_dimension_numbers<[1], [0], [0], [1], [0, 0, 1, 1], [], []>} : vector<2x32xbf16>, vector<32x128xbf16>, vector<2x128xf32> -> vector<2x128xf32>
    %47 = arith.addf %44, %46 : vector<2x128xf32>
    %48 = vector.extract_strided_slice %47 {offsets = [0, 0], sizes = [2, 32], strides = [1, 1]} : vector<2x128xf32> to vector<2x32xf32>
    %49 = arith.negf %48 : vector<2x32xf32>
    %50 = math.exp %49 : vector<2x32xf32>
    %cst_18 = arith.constant 1.000000e+00 : f32
    %51 = vector.broadcast %cst_18 : f32 to vector<2x32xf32>
    %52 = arith.addf %51, %50 : vector<2x32xf32>
    %53 = arith.divf %51, %52 : vector<2x32xf32>
    %54 = vector.extract_strided_slice %47 {offsets = [0, 32], sizes = [2, 32], strides = [1, 1]} : vector<2x128xf32> to vector<2x32xf32>
    %55 = arith.negf %54 : vector<2x32xf32>
    %56 = math.exp %55 : vector<2x32xf32>
    %cst_19 = arith.constant 1.000000e+00 : f32
    %57 = vector.broadcast %cst_19 : f32 to vector<2x32xf32>
    %58 = arith.addf %57, %56 : vector<2x32xf32>
    %59 = arith.divf %57, %58 : vector<2x32xf32>
    %60 = vector.extract_strided_slice %47 {offsets = [0, 64], sizes = [2, 32], strides = [1, 1]} : vector<2x128xf32> to vector<2x32xf32>
    %61 = math.tanh %60 : vector<2x32xf32>
    %62 = vector.extract_strided_slice %47 {offsets = [0, 96], sizes = [2, 32], strides = [1, 1]} : vector<2x128xf32> to vector<2x32xf32>
    %63 = arith.negf %62 : vector<2x32xf32>
    %64 = math.exp %63 : vector<2x32xf32>
    %cst_20 = arith.constant 1.000000e+00 : f32
    %65 = vector.broadcast %cst_20 : f32 to vector<2x32xf32>
    %66 = arith.addf %65, %64 : vector<2x32xf32>
    %67 = arith.divf %65, %66 : vector<2x32xf32>
    %68 = arith.mulf %59, %36 : vector<2x32xf32>
    %69 = arith.mulf %53, %61 : vector<2x32xf32>
    %70 = arith.addf %68, %69 : vector<2x32xf32>
    %71 = math.tanh %70 : vector<2x32xf32>
    %72 = arith.mulf %67, %71 : vector<2x32xf32>
    %c2 = arith.constant 2 : index
    %c0_21 = arith.constant 0 : index
    %c0_22 = arith.constant 0 : index
    %73 = vector.load %arg1[%c2, %c0_21, %c0_22] : memref<8x2x16xf32, #tpu.memory_space<vmem>>, vector<1x2x16xf32>
    %74 = vector.shape_cast %73 : vector<1x2x16xf32> to vector<2x16xf32>
    %75 = arith.truncf %74 : vector<2x16xf32> to vector<2x16xbf16>
    %cst_23 = arith.constant dense<0.000000e+00> : vector<2x128xf32>
    %76 = tpu.matmul %75, %0, %cst_23 {dimension_numbers = #tpu.dot_dimension_numbers<[1], [0], [0], [1], [0, 0, 1, 1], [], []>} : vector<2x16xbf16>, vector<16x128xbf16>, vector<2x128xf32> -> vector<2x128xf32>
    %77 = vector.broadcast %2 : vector<1x128xf32> to vector<2x128xf32>
    %78 = arith.addf %76, %77 : vector<2x128xf32>
    %79 = arith.truncf %72 : vector<2x32xf32> to vector<2x32xbf16>
    %cst_24 = arith.constant dense<0.000000e+00> : vector<2x128xf32>
    %80 = tpu.matmul %79, %1, %cst_24 {dimension_numbers = #tpu.dot_dimension_numbers<[1], [0], [0], [1], [0, 0, 1, 1], [], []>} : vector<2x32xbf16>, vector<32x128xbf16>, vector<2x128xf32> -> vector<2x128xf32>
    %81 = arith.addf %78, %80 : vector<2x128xf32>
    %82 = vector.extract_strided_slice %81 {offsets = [0, 0], sizes = [2, 32], strides = [1, 1]} : vector<2x128xf32> to vector<2x32xf32>
    %83 = arith.negf %82 : vector<2x32xf32>
    %84 = math.exp %83 : vector<2x32xf32>
    %cst_25 = arith.constant 1.000000e+00 : f32
    %85 = vector.broadcast %cst_25 : f32 to vector<2x32xf32>
    %86 = arith.addf %85, %84 : vector<2x32xf32>
    %87 = arith.divf %85, %86 : vector<2x32xf32>
    %88 = vector.extract_strided_slice %81 {offsets = [0, 32], sizes = [2, 32], strides = [1, 1]} : vector<2x128xf32> to vector<2x32xf32>
    %89 = arith.negf %88 : vector<2x32xf32>
    %90 = math.exp %89 : vector<2x32xf32>
    %cst_26 = arith.constant 1.000000e+00 : f32
    %91 = vector.broadcast %cst_26 : f32 to vector<2x32xf32>
    %92 = arith.addf %91, %90 : vector<2x32xf32>
    %93 = arith.divf %91, %92 : vector<2x32xf32>
    %94 = vector.extract_strided_slice %81 {offsets = [0, 64], sizes = [2, 32], strides = [1, 1]} : vector<2x128xf32> to vector<2x32xf32>
    %95 = math.tanh %94 : vector<2x32xf32>
    %96 = vector.extract_strided_slice %81 {offsets = [0, 96], sizes = [2, 32], strides = [1, 1]} : vector<2x128xf32> to vector<2x32xf32>
    %97 = arith.negf %96 : vector<2x32xf32>
    %98 = math.exp %97 : vector<2x32xf32>
    %cst_27 = arith.constant 1.000000e+00 : f32
    %99 = vector.broadcast %cst_27 : f32 to vector<2x32xf32>
    %100 = arith.addf %99, %98 : vector<2x32xf32>
    %101 = arith.divf %99, %100 : vector<2x32xf32>
    %102 = arith.mulf %93, %70 : vector<2x32xf32>
    %103 = arith.mulf %87, %95 : vector<2x32xf32>
    %104 = arith.addf %102, %103 : vector<2x32xf32>
    %105 = math.tanh %104 : vector<2x32xf32>
    %106 = arith.mulf %101, %105 : vector<2x32xf32>
    %c3 = arith.constant 3 : index
    %c0_28 = arith.constant 0 : index
    %c0_29 = arith.constant 0 : index
    %107 = vector.load %arg1[%c3, %c0_28, %c0_29] : memref<8x2x16xf32, #tpu.memory_space<vmem>>, vector<1x2x16xf32>
    %108 = vector.shape_cast %107 : vector<1x2x16xf32> to vector<2x16xf32>
    %109 = arith.truncf %108 : vector<2x16xf32> to vector<2x16xbf16>
    %cst_30 = arith.constant dense<0.000000e+00> : vector<2x128xf32>
    %110 = tpu.matmul %109, %0, %cst_30 {dimension_numbers = #tpu.dot_dimension_numbers<[1], [0], [0], [1], [0, 0, 1, 1], [], []>} : vector<2x16xbf16>, vector<16x128xbf16>, vector<2x128xf32> -> vector<2x128xf32>
    %111 = vector.broadcast %2 : vector<1x128xf32> to vector<2x128xf32>
    %112 = arith.addf %110, %111 : vector<2x128xf32>
    %113 = arith.truncf %106 : vector<2x32xf32> to vector<2x32xbf16>
    %cst_31 = arith.constant dense<0.000000e+00> : vector<2x128xf32>
    %114 = tpu.matmul %113, %1, %cst_31 {dimension_numbers = #tpu.dot_dimension_numbers<[1], [0], [0], [1], [0, 0, 1, 1], [], []>} : vector<2x32xbf16>, vector<32x128xbf16>, vector<2x128xf32> -> vector<2x128xf32>
    %115 = arith.addf %112, %114 : vector<2x128xf32>
    %116 = vector.extract_strided_slice %115 {offsets = [0, 0], sizes = [2, 32], strides = [1, 1]} : vector<2x128xf32> to vector<2x32xf32>
    %117 = arith.negf %116 : vector<2x32xf32>
    %118 = math.exp %117 : vector<2x32xf32>
    %cst_32 = arith.constant 1.000000e+00 : f32
    %119 = vector.broadcast %cst_32 : f32 to vector<2x32xf32>
    %120 = arith.addf %119, %118 : vector<2x32xf32>
    %121 = arith.divf %119, %120 : vector<2x32xf32>
    %122 = vector.extract_strided_slice %115 {offsets = [0, 32], sizes = [2, 32], strides = [1, 1]} : vector<2x128xf32> to vector<2x32xf32>
    %123 = arith.negf %122 : vector<2x32xf32>
    %124 = math.exp %123 : vector<2x32xf32>
    %cst_33 = arith.constant 1.000000e+00 : f32
    %125 = vector.broadcast %cst_33 : f32 to vector<2x32xf32>
    %126 = arith.addf %125, %124 : vector<2x32xf32>
    %127 = arith.divf %125, %126 : vector<2x32xf32>
    %128 = vector.extract_strided_slice %115 {offsets = [0, 64], sizes = [2, 32], strides = [1, 1]} : vector<2x128xf32> to vector<2x32xf32>
    %129 = math.tanh %128 : vector<2x32xf32>
    %130 = vector.extract_strided_slice %115 {offsets = [0, 96], sizes = [2, 32], strides = [1, 1]} : vector<2x128xf32> to vector<2x32xf32>
    %131 = arith.negf %130 : vector<2x32xf32>
    %132 = math.exp %131 : vector<2x32xf32>
    %cst_34 = arith.constant 1.000000e+00 : f32
    %133 = vector.broadcast %cst_34 : f32 to vector<2x32xf32>
    %134 = arith.addf %133, %132 : vector<2x32xf32>
    %135 = arith.divf %133, %134 : vector<2x32xf32>
    %136 = arith.mulf %127, %104 : vector<2x32xf32>
    %137 = arith.mulf %121, %129 : vector<2x32xf32>
    %138 = arith.addf %136, %137 : vector<2x32xf32>
    %139 = math.tanh %138 : vector<2x32xf32>
    %140 = arith.mulf %135, %139 : vector<2x32xf32>
    %c4 = arith.constant 4 : index
    %c0_35 = arith.constant 0 : index
    %c0_36 = arith.constant 0 : index
    %141 = vector.load %arg1[%c4, %c0_35, %c0_36] : memref<8x2x16xf32, #tpu.memory_space<vmem>>, vector<1x2x16xf32>
    %142 = vector.shape_cast %141 : vector<1x2x16xf32> to vector<2x16xf32>
    %143 = arith.truncf %142 : vector<2x16xf32> to vector<2x16xbf16>
    %cst_37 = arith.constant dense<0.000000e+00> : vector<2x128xf32>
    %144 = tpu.matmul %143, %0, %cst_37 {dimension_numbers = #tpu.dot_dimension_numbers<[1], [0], [0], [1], [0, 0, 1, 1], [], []>} : vector<2x16xbf16>, vector<16x128xbf16>, vector<2x128xf32> -> vector<2x128xf32>
    %145 = vector.broadcast %2 : vector<1x128xf32> to vector<2x128xf32>
    %146 = arith.addf %144, %145 : vector<2x128xf32>
    %147 = arith.truncf %140 : vector<2x32xf32> to vector<2x32xbf16>
    %cst_38 = arith.constant dense<0.000000e+00> : vector<2x128xf32>
    %148 = tpu.matmul %147, %1, %cst_38 {dimension_numbers = #tpu.dot_dimension_numbers<[1], [0], [0], [1], [0, 0, 1, 1], [], []>} : vector<2x32xbf16>, vector<32x128xbf16>, vector<2x128xf32> -> vector<2x128xf32>
    %149 = arith.addf %146, %148 : vector<2x128xf32>
    %150 = vector.extract_strided_slice %149 {offsets = [0, 0], sizes = [2, 32], strides = [1, 1]} : vector<2x128xf32> to vector<2x32xf32>
    %151 = arith.negf %150 : vector<2x32xf32>
    %152 = math.exp %151 : vector<2x32xf32>
    %cst_39 = arith.constant 1.000000e+00 : f32
    %153 = vector.broadcast %cst_39 : f32 to vector<2x32xf32>
    %154 = arith.addf %153, %152 : vector<2x32xf32>
    %155 = arith.divf %153, %154 : vector<2x32xf32>
    %156 = vector.extract_strided_slice %149 {offsets = [0, 32], sizes = [2, 32], strides = [1, 1]} : vector<2x128xf32> to vector<2x32xf32>
    %157 = arith.negf %156 : vector<2x32xf32>
    %158 = math.exp %157 : vector<2x32xf32>
    %cst_40 = arith.constant 1.000000e+00 : f32
    %159 = vector.broadcast %cst_40 : f32 to vector<2x32xf32>
    %160 = arith.addf %159, %158 : vector<2x32xf32>
    %161 = arith.divf %159, %160 : vector<2x32xf32>
    %162 = vector.extract_strided_slice %149 {offsets = [0, 64], sizes = [2, 32], strides = [1, 1]} : vector<2x128xf32> to vector<2x32xf32>
    %163 = math.tanh %162 : vector<2x32xf32>
    %164 = vector.extract_strided_slice %149 {offsets = [0, 96], sizes = [2, 32], strides = [1, 1]} : vector<2x128xf32> to vector<2x32xf32>
    %165 = arith.negf %164 : vector<2x32xf32>
    %166 = math.exp %165 : vector<2x32xf32>
    %cst_41 = arith.constant 1.000000e+00 : f32
    %167 = vector.broadcast %cst_41 : f32 to vector<2x32xf32>
    %168 = arith.addf %167, %166 : vector<2x32xf32>
    %169 = arith.divf %167, %168 : vector<2x32xf32>
    %170 = arith.mulf %161, %138 : vector<2x32xf32>
    %171 = arith.mulf %155, %163 : vector<2x32xf32>
    %172 = arith.addf %170, %171 : vector<2x32xf32>
    %173 = math.tanh %172 : vector<2x32xf32>
    %174 = arith.mulf %169, %173 : vector<2x32xf32>
    %c5 = arith.constant 5 : index
    %c0_42 = arith.constant 0 : index
    %c0_43 = arith.constant 0 : index
    %175 = vector.load %arg1[%c5, %c0_42, %c0_43] : memref<8x2x16xf32, #tpu.memory_space<vmem>>, vector<1x2x16xf32>
    %176 = vector.shape_cast %175 : vector<1x2x16xf32> to vector<2x16xf32>
    %177 = arith.truncf %176 : vector<2x16xf32> to vector<2x16xbf16>
    %cst_44 = arith.constant dense<0.000000e+00> : vector<2x128xf32>
    %178 = tpu.matmul %177, %0, %cst_44 {dimension_numbers = #tpu.dot_dimension_numbers<[1], [0], [0], [1], [0, 0, 1, 1], [], []>} : vector<2x16xbf16>, vector<16x128xbf16>, vector<2x128xf32> -> vector<2x128xf32>
    %179 = vector.broadcast %2 : vector<1x128xf32> to vector<2x128xf32>
    %180 = arith.addf %178, %179 : vector<2x128xf32>
    %181 = arith.truncf %174 : vector<2x32xf32> to vector<2x32xbf16>
    %cst_45 = arith.constant dense<0.000000e+00> : vector<2x128xf32>
    %182 = tpu.matmul %181, %1, %cst_45 {dimension_numbers = #tpu.dot_dimension_numbers<[1], [0], [0], [1], [0, 0, 1, 1], [], []>} : vector<2x32xbf16>, vector<32x128xbf16>, vector<2x128xf32> -> vector<2x128xf32>
    %183 = arith.addf %180, %182 : vector<2x128xf32>
    %184 = vector.extract_strided_slice %183 {offsets = [0, 0], sizes = [2, 32], strides = [1, 1]} : vector<2x128xf32> to vector<2x32xf32>
    %185 = arith.negf %184 : vector<2x32xf32>
    %186 = math.exp %185 : vector<2x32xf32>
    %cst_46 = arith.constant 1.000000e+00 : f32
    %187 = vector.broadcast %cst_46 : f32 to vector<2x32xf32>
    %188 = arith.addf %187, %186 : vector<2x32xf32>
    %189 = arith.divf %187, %188 : vector<2x32xf32>
    %190 = vector.extract_strided_slice %183 {offsets = [0, 32], sizes = [2, 32], strides = [1, 1]} : vector<2x128xf32> to vector<2x32xf32>
    %191 = arith.negf %190 : vector<2x32xf32>
    %192 = math.exp %191 : vector<2x32xf32>
    %cst_47 = arith.constant 1.000000e+00 : f32
    %193 = vector.broadcast %cst_47 : f32 to vector<2x32xf32>
    %194 = arith.addf %193, %192 : vector<2x32xf32>
    %195 = arith.divf %193, %194 : vector<2x32xf32>
    %196 = vector.extract_strided_slice %183 {offsets = [0, 64], sizes = [2, 32], strides = [1, 1]} : vector<2x128xf32> to vector<2x32xf32>
    %197 = math.tanh %196 : vector<2x32xf32>
    %198 = vector.extract_strided_slice %183 {offsets = [0, 96], sizes = [2, 32], strides = [1, 1]} : vector<2x128xf32> to vector<2x32xf32>
    %199 = arith.negf %198 : vector<2x32xf32>
    %200 = math.exp %199 : vector<2x32xf32>
    %cst_48 = arith.constant 1.000000e+00 : f32
    %201 = vector.broadcast %cst_48 : f32 to vector<2x32xf32>
    %202 = arith.addf %201, %200 : vector<2x32xf32>
    %203 = arith.divf %201, %202 : vector<2x32xf32>
    %204 = arith.mulf %195, %172 : vector<2x32xf32>
    %205 = arith.mulf %189, %197 : vector<2x32xf32>
    %206 = arith.addf %204, %205 : vector<2x32xf32>
    %207 = math.tanh %206 : vector<2x32xf32>
    %208 = arith.mulf %203, %207 : vector<2x32xf32>
    %c6 = arith.constant 6 : index
    %c0_49 = arith.constant 0 : index
    %c0_50 = arith.constant 0 : index
    %209 = vector.load %arg1[%c6, %c0_49, %c0_50] : memref<8x2x16xf32, #tpu.memory_space<vmem>>, vector<1x2x16xf32>
    %210 = vector.shape_cast %209 : vector<1x2x16xf32> to vector<2x16xf32>
    %211 = arith.truncf %210 : vector<2x16xf32> to vector<2x16xbf16>
    %cst_51 = arith.constant dense<0.000000e+00> : vector<2x128xf32>
    %212 = tpu.matmul %211, %0, %cst_51 {dimension_numbers = #tpu.dot_dimension_numbers<[1], [0], [0], [1], [0, 0, 1, 1], [], []>} : vector<2x16xbf16>, vector<16x128xbf16>, vector<2x128xf32> -> vector<2x128xf32>
    %213 = vector.broadcast %2 : vector<1x128xf32> to vector<2x128xf32>
    %214 = arith.addf %212, %213 : vector<2x128xf32>
    %215 = arith.truncf %208 : vector<2x32xf32> to vector<2x32xbf16>
    %cst_52 = arith.constant dense<0.000000e+00> : vector<2x128xf32>
    %216 = tpu.matmul %215, %1, %cst_52 {dimension_numbers = #tpu.dot_dimension_numbers<[1], [0], [0], [1], [0, 0, 1, 1], [], []>} : vector<2x32xbf16>, vector<32x128xbf16>, vector<2x128xf32> -> vector<2x128xf32>
    %217 = arith.addf %214, %216 : vector<2x128xf32>
    %218 = vector.extract_strided_slice %217 {offsets = [0, 0], sizes = [2, 32], strides = [1, 1]} : vector<2x128xf32> to vector<2x32xf32>
    %219 = arith.negf %218 : vector<2x32xf32>
    %220 = math.exp %219 : vector<2x32xf32>
    %cst_53 = arith.constant 1.000000e+00 : f32
    %221 = vector.broadcast %cst_53 : f32 to vector<2x32xf32>
    %222 = arith.addf %221, %220 : vector<2x32xf32>
    %223 = arith.divf %221, %222 : vector<2x32xf32>
    %224 = vector.extract_strided_slice %217 {offsets = [0, 32], sizes = [2, 32], strides = [1, 1]} : vector<2x128xf32> to vector<2x32xf32>
    %225 = arith.negf %224 : vector<2x32xf32>
    %226 = math.exp %225 : vector<2x32xf32>
    %cst_54 = arith.constant 1.000000e+00 : f32
    %227 = vector.broadcast %cst_54 : f32 to vector<2x32xf32>
    %228 = arith.addf %227, %226 : vector<2x32xf32>
    %229 = arith.divf %227, %228 : vector<2x32xf32>
    %230 = vector.extract_strided_slice %217 {offsets = [0, 64], sizes = [2, 32], strides = [1, 1]} : vector<2x128xf32> to vector<2x32xf32>
    %231 = math.tanh %230 : vector<2x32xf32>
    %232 = vector.extract_strided_slice %217 {offsets = [0, 96], sizes = [2, 32], strides = [1, 1]} : vector<2x128xf32> to vector<2x32xf32>
    %233 = arith.negf %232 : vector<2x32xf32>
    %234 = math.exp %233 : vector<2x32xf32>
    %cst_55 = arith.constant 1.000000e+00 : f32
    %235 = vector.broadcast %cst_55 : f32 to vector<2x32xf32>
    %236 = arith.addf %235, %234 : vector<2x32xf32>
    %237 = arith.divf %235, %236 : vector<2x32xf32>
    %238 = arith.mulf %229, %206 : vector<2x32xf32>
    %239 = arith.mulf %223, %231 : vector<2x32xf32>
    %240 = arith.addf %238, %239 : vector<2x32xf32>
    %241 = math.tanh %240 : vector<2x32xf32>
    %242 = arith.mulf %237, %241 : vector<2x32xf32>
    %c7 = arith.constant 7 : index
    %c0_56 = arith.constant 0 : index
    %c0_57 = arith.constant 0 : index
    %243 = vector.load %arg1[%c7, %c0_56, %c0_57] : memref<8x2x16xf32, #tpu.memory_space<vmem>>, vector<1x2x16xf32>
    %244 = vector.shape_cast %243 : vector<1x2x16xf32> to vector<2x16xf32>
    %245 = arith.truncf %244 : vector<2x16xf32> to vector<2x16xbf16>
    %cst_58 = arith.constant dense<0.000000e+00> : vector<2x128xf32>
    %246 = tpu.matmul %245, %0, %cst_58 {dimension_numbers = #tpu.dot_dimension_numbers<[1], [0], [0], [1], [0, 0, 1, 1], [], []>} : vector<2x16xbf16>, vector<16x128xbf16>, vector<2x128xf32> -> vector<2x128xf32>
    %247 = vector.broadcast %2 : vector<1x128xf32> to vector<2x128xf32>
    %248 = arith.addf %246, %247 : vector<2x128xf32>
    %249 = arith.truncf %242 : vector<2x32xf32> to vector<2x32xbf16>
    %cst_59 = arith.constant dense<0.000000e+00> : vector<2x128xf32>
    %250 = tpu.matmul %249, %1, %cst_59 {dimension_numbers = #tpu.dot_dimension_numbers<[1], [0], [0], [1], [0, 0, 1, 1], [], []>} : vector<2x32xbf16>, vector<32x128xbf16>, vector<2x128xf32> -> vector<2x128xf32>
    %251 = arith.addf %248, %250 : vector<2x128xf32>
    %252 = vector.extract_strided_slice %251 {offsets = [0, 0], sizes = [2, 32], strides = [1, 1]} : vector<2x128xf32> to vector<2x32xf32>
    %253 = arith.negf %252 : vector<2x32xf32>
    %254 = math.exp %253 : vector<2x32xf32>
    %cst_60 = arith.constant 1.000000e+00 : f32
    %255 = vector.broadcast %cst_60 : f32 to vector<2x32xf32>
    %256 = arith.addf %255, %254 : vector<2x32xf32>
    %257 = arith.divf %255, %256 : vector<2x32xf32>
    %258 = vector.extract_strided_slice %251 {offsets = [0, 32], sizes = [2, 32], strides = [1, 1]} : vector<2x128xf32> to vector<2x32xf32>
    %259 = arith.negf %258 : vector<2x32xf32>
    %260 = math.exp %259 : vector<2x32xf32>
    %cst_61 = arith.constant 1.000000e+00 : f32
    %261 = vector.broadcast %cst_61 : f32 to vector<2x32xf32>
    %262 = arith.addf %261, %260 : vector<2x32xf32>
    %263 = arith.divf %261, %262 : vector<2x32xf32>
    %264 = vector.extract_strided_slice %251 {offsets = [0, 64], sizes = [2, 32], strides = [1, 1]} : vector<2x128xf32> to vector<2x32xf32>
    %265 = math.tanh %264 : vector<2x32xf32>
    %266 = vector.extract_strided_slice %251 {offsets = [0, 96], sizes = [2, 32], strides = [1, 1]} : vector<2x128xf32> to vector<2x32xf32>
    %267 = arith.negf %266 : vector<2x32xf32>
    %268 = math.exp %267 : vector<2x32xf32>
    %cst_62 = arith.constant 1.000000e+00 : f32
    %269 = vector.broadcast %cst_62 : f32 to vector<2x32xf32>
    %270 = arith.addf %269, %268 : vector<2x32xf32>
    %271 = arith.divf %269, %270 : vector<2x32xf32>
    %272 = arith.mulf %263, %240 : vector<2x32xf32>
    %273 = arith.mulf %257, %265 : vector<2x32xf32>
    %274 = arith.addf %272, %273 : vector<2x32xf32>
    %275 = math.tanh %274 : vector<2x32xf32>
    %276 = arith.mulf %271, %275 : vector<2x32xf32>
    %277 = arith.truncf %276 : vector<2x32xf32> to vector<2x32xbf16>
    %c0_63 = arith.constant 0 : index
    %c0_64 = arith.constant 0 : index
    %278 = vector.load %arg6[%c0_63, %c0_64] : memref<32x32xbf16, #tpu.memory_space<vmem>>, vector<32x32xbf16>
    %cst_65 = arith.constant dense<0.000000e+00> : vector<2x32xf32>
    %279 = tpu.matmul %277, %278, %cst_65 {dimension_numbers = #tpu.dot_dimension_numbers<[1], [0], [0], [1], [0, 0, 1, 1], [], []>} : vector<2x32xbf16>, vector<32x32xbf16>, vector<2x32xf32> -> vector<2x32xf32>
    %c0_66 = arith.constant 0 : index
    %c0_67 = arith.constant 0 : index
    %280 = vector.load %arg7[%c0_66, %c0_67] : memref<1x32xf32, #tpu.memory_space<vmem>>, vector<1x32xf32>
    %281 = vector.broadcast %280 : vector<1x32xf32> to vector<2x32xf32>
    %282 = arith.addf %279, %281 : vector<2x32xf32>
    %c0_68 = arith.constant 0 : index
    %c0_69 = arith.constant 0 : index
    %283 = vector.load %arg17[%c0_68, %c0_69] : memref<2x32xf32, #tpu.memory_space<vmem>>, vector<2x32xf32>
    tpu.vector_store %arg17[%c0_68, %c0_69], %282 {strides = array<i32>} : memref<2x32xf32, #tpu.memory_space<vmem>>, vector<2x32xf32>,
    %284 = vector.extract_strided_slice %282 {offsets = [0, 0], sizes = [2, 16], strides = [1, 1]} : vector<2x32xf32> to vector<2x16xf32>
    %285 = vector.extract_strided_slice %282 {offsets = [0, 16], sizes = [2, 16], strides = [1, 1]} : vector<2x32xf32> to vector<2x16xf32>
    %c0_70 = arith.constant 0 : index
    %c0_71 = arith.constant 0 : index
    %286 = vector.load %arg2[%c0_70, %c0_71] : memref<2x16xf32, #tpu.memory_space<vmem>>, vector<2x16xf32>
    %cst_72 = arith.constant 5.000000e-01 : f32
    %287 = vector.broadcast %cst_72 : f32 to vector<2x16xf32>
    %288 = arith.mulf %287, %285 : vector<2x16xf32>
    %289 = math.exp %288 : vector<2x16xf32>
    %290 = arith.mulf %286, %289 : vector<2x16xf32>
    %291 = arith.addf %284, %290 : vector<2x16xf32>
    %c0_73 = arith.constant 0 : index
    %c0_74 = arith.constant 0 : index
    %292 = vector.load %arg18[%c0_73, %c0_74] : memref<2x16xf32, #tpu.memory_space<vmem>>, vector<2x16xf32>
    tpu.vector_store %arg18[%c0_73, %c0_74], %291 {strides = array<i32>} : memref<2x16xf32, #tpu.memory_space<vmem>>, vector<2x16xf32>,
    %293 = arith.truncf %291 : vector<2x16xf32> to vector<2x16xbf16>
    %c0_75 = arith.constant 0 : index
    %c0_76 = arith.constant 0 : index
    %294 = vector.load %arg13[%c0_75, %c0_76] : memref<16x32xbf16, #tpu.memory_space<vmem>>, vector<16x32xbf16>
    %cst_77 = arith.constant dense<0.000000e+00> : vector<2x32xf32>
    %295 = tpu.matmul %293, %294, %cst_77 {dimension_numbers = #tpu.dot_dimension_numbers<[1], [0], [0], [1], [0, 0, 1, 1], [], []>} : vector<2x16xbf16>, vector<16x32xbf16>, vector<2x32xf32> -> vector<2x32xf32>
    %c0_78 = arith.constant 0 : index
    %c0_79 = arith.constant 0 : index
    %296 = vector.load %arg14[%c0_78, %c0_79] : memref<1x32xf32, #tpu.memory_space<vmem>>, vector<1x32xf32>
    %297 = vector.broadcast %296 : vector<1x32xf32> to vector<2x32xf32>
    %298 = arith.addf %295, %297 : vector<2x32xf32>
    %c0_80 = arith.constant 0 : index
    %c0_81 = arith.constant 0 : index
    %299 = vector.load %arg19[%c0_80, %c0_81] : memref<2x32xf32, #tpu.memory_space<vmem>>, vector<2x32xf32>
    tpu.vector_store %arg19[%c0_80, %c0_81], %298 {strides = array<i32>} : memref<2x32xf32, #tpu.memory_space<vmem>>, vector<2x32xf32>,
    %300 = arith.truncf %291 : vector<2x16xf32> to vector<2x16xbf16>
    %c0_82 = arith.constant 0 : index
    %c0_83 = arith.constant 0 : index
    %301 = vector.load %arg15[%c0_82, %c0_83] : memref<16x16xbf16, #tpu.memory_space<vmem>>, vector<16x16xbf16>
    %cst_84 = arith.constant dense<0.000000e+00> : vector<2x16xf32>
    %302 = tpu.matmul %300, %301, %cst_84 {dimension_numbers = #tpu.dot_dimension_numbers<[1], [0], [0], [1], [0, 0, 1, 1], [], []>} : vector<2x16xbf16>, vector<16x16xbf16>, vector<2x16xf32> -> vector<2x16xf32>
    %c0_85 = arith.constant 0 : index
    %c0_86 = arith.constant 0 : index
    %303 = vector.load %arg16[%c0_85, %c0_86] : memref<1x16xf32, #tpu.memory_space<vmem>>, vector<1x16xf32>
    %304 = vector.broadcast %303 : vector<1x16xf32> to vector<2x16xf32>
    %305 = arith.addf %302, %304 : vector<2x16xf32>
    %c0_87 = arith.constant 0 : index
    %c0_88 = arith.constant 0 : index
    %306 = vector.load %arg20[%c0_87, %c0_88] : memref<2x16xf32, #tpu.memory_space<vmem>>, vector<2x16xf32>
    tpu.vector_store %arg20[%c0_87, %c0_88], %305 {strides = array<i32>} : memref<2x16xf32, #tpu.memory_space<vmem>>, vector<2x16xf32>,
    %307 = arith.truncf %291 : vector<2x16xf32> to vector<2x16xbf16>
    %c0_89 = arith.constant 0 : index
    %c0_90 = arith.constant 0 : index
    %308 = vector.load %arg8[%c0_89, %c0_90] : memref<16x128xbf16, #tpu.memory_space<vmem>>, vector<16x128xbf16>
    %cst_91 = arith.constant dense<0.000000e+00> : vector<2x128xf32>
    %309 = tpu.matmul %307, %308, %cst_91 {dimension_numbers = #tpu.dot_dimension_numbers<[1], [0], [0], [1], [0, 0, 1, 1], [], []>} : vector<2x16xbf16>, vector<16x128xbf16>, vector<2x128xf32> -> vector<2x128xf32>
    %c0_92 = arith.constant 0 : index
    %c0_93 = arith.constant 0 : index
    %310 = vector.load %arg10[%c0_92, %c0_93] : memref<1x128xf32, #tpu.memory_space<vmem>>, vector<1x128xf32>
    %311 = vector.broadcast %310 : vector<1x128xf32> to vector<2x128xf32>
    %312 = arith.addf %309, %311 : vector<2x128xf32>
    %c0_94 = arith.constant 0 : index
    %c0_95 = arith.constant 0 : index
    %313 = vector.load %arg9[%c0_94, %c0_95] : memref<32x128xbf16, #tpu.memory_space<vmem>>, vector<32x128xbf16>
    %cst_96 = arith.constant 0.000000e+00 : f32
    %314 = vector.broadcast %cst_96 : f32 to vector<2x32xf32>
    %cst_97 = arith.constant 0.000000e+00 : f32
    %315 = vector.broadcast %cst_97 : f32 to vector<2x32xf32>
    %316 = arith.truncf %314 : vector<2x32xf32> to vector<2x32xbf16>
    %cst_98 = arith.constant dense<0.000000e+00> : vector<2x128xf32>
    %317 = tpu.matmul %316, %313, %cst_98 {dimension_numbers = #tpu.dot_dimension_numbers<[1], [0], [0], [1], [0, 0, 1, 1], [], []>} : vector<2x32xbf16>, vector<32x128xbf16>, vector<2x128xf32> -> vector<2x128xf32>
    %318 = arith.addf %312, %317 : vector<2x128xf32>
    %319 = vector.extract_strided_slice %318 {offsets = [0, 0], sizes = [2, 32], strides = [1, 1]} : vector<2x128xf32> to vector<2x32xf32>
    %320 = arith.negf %319 : vector<2x32xf32>
    %321 = math.exp %320 : vector<2x32xf32>
    %cst_99 = arith.constant 1.000000e+00 : f32
    %322 = vector.broadcast %cst_99 : f32 to vector<2x32xf32>
    %323 = arith.addf %322, %321 : vector<2x32xf32>
    %324 = arith.divf %322, %323 : vector<2x32xf32>
    %325 = vector.extract_strided_slice %318 {offsets = [0, 32], sizes = [2, 32], strides = [1, 1]} : vector<2x128xf32> to vector<2x32xf32>
    %326 = arith.negf %325 : vector<2x32xf32>
    %327 = math.exp %326 : vector<2x32xf32>
    %cst_100 = arith.constant 1.000000e+00 : f32
    %328 = vector.broadcast %cst_100 : f32 to vector<2x32xf32>
    %329 = arith.addf %328, %327 : vector<2x32xf32>
    %330 = arith.divf %328, %329 : vector<2x32xf32>
    %331 = vector.extract_strided_slice %318 {offsets = [0, 64], sizes = [2, 32], strides = [1, 1]} : vector<2x128xf32> to vector<2x32xf32>
    %332 = math.tanh %331 : vector<2x32xf32>
    %333 = vector.extract_strided_slice %318 {offsets = [0, 96], sizes = [2, 32], strides = [1, 1]} : vector<2x128xf32> to vector<2x32xf32>
    %334 = arith.negf %333 : vector<2x32xf32>
    %335 = math.exp %334 : vector<2x32xf32>
    %cst_101 = arith.constant 1.000000e+00 : f32
    %336 = vector.broadcast %cst_101 : f32 to vector<2x32xf32>
    %337 = arith.addf %336, %335 : vector<2x32xf32>
    %338 = arith.divf %336, %337 : vector<2x32xf32>
    %339 = arith.mulf %330, %315 : vector<2x32xf32>
    %340 = arith.mulf %324, %332 : vector<2x32xf32>
    %341 = arith.addf %339, %340 : vector<2x32xf32>
    %342 = math.tanh %341 : vector<2x32xf32>
    %343 = arith.mulf %338, %342 : vector<2x32xf32>
    %344 = arith.truncf %343 : vector<2x32xf32> to vector<2x32xbf16>
    %cst_102 = arith.constant dense<0.000000e+00> : vector<2x128xf32>
    %345 = tpu.matmul %344, %313, %cst_102 {dimension_numbers = #tpu.dot_dimension_numbers<[1], [0], [0], [1], [0, 0, 1, 1], [], []>} : vector<2x32xbf16>, vector<32x128xbf16>, vector<2x128xf32> -> vector<2x128xf32>
    %346 = arith.addf %312, %345 : vector<2x128xf32>
    %347 = vector.extract_strided_slice %346 {offsets = [0, 0], sizes = [2, 32], strides = [1, 1]} : vector<2x128xf32> to vector<2x32xf32>
    %348 = arith.negf %347 : vector<2x32xf32>
    %349 = math.exp %348 : vector<2x32xf32>
    %cst_103 = arith.constant 1.000000e+00 : f32
    %350 = vector.broadcast %cst_103 : f32 to vector<2x32xf32>
    %351 = arith.addf %350, %349 : vector<2x32xf32>
    %352 = arith.divf %350, %351 : vector<2x32xf32>
    %353 = vector.extract_strided_slice %346 {offsets = [0, 32], sizes = [2, 32], strides = [1, 1]} : vector<2x128xf32> to vector<2x32xf32>
    %354 = arith.negf %353 : vector<2x32xf32>
    %355 = math.exp %354 : vector<2x32xf32>
    %cst_104 = arith.constant 1.000000e+00 : f32
    %356 = vector.broadcast %cst_104 : f32 to vector<2x32xf32>
    %357 = arith.addf %356, %355 : vector<2x32xf32>
    %358 = arith.divf %356, %357 : vector<2x32xf32>
    %359 = vector.extract_strided_slice %346 {offsets = [0, 64], sizes = [2, 32], strides = [1, 1]} : vector<2x128xf32> to vector<2x32xf32>
    %360 = math.tanh %359 : vector<2x32xf32>
    %361 = vector.extract_strided_slice %346 {offsets = [0, 96], sizes = [2, 32], strides = [1, 1]} : vector<2x128xf32> to vector<2x32xf32>
    %362 = arith.negf %361 : vector<2x32xf32>
    %363 = math.exp %362 : vector<2x32xf32>
    %cst_105 = arith.constant 1.000000e+00 : f32
    %364 = vector.broadcast %cst_105 : f32 to vector<2x32xf32>
    %365 = arith.addf %364, %363 : vector<2x32xf32>
    %366 = arith.divf %364, %365 : vector<2x32xf32>
    %367 = arith.mulf %358, %341 : vector<2x32xf32>
    %368 = arith.mulf %352, %360 : vector<2x32xf32>
    %369 = arith.addf %367, %368 : vector<2x32xf32>
    %370 = math.tanh %369 : vector<2x32xf32>
    %371 = arith.mulf %366, %370 : vector<2x32xf32>
    %372 = arith.truncf %371 : vector<2x32xf32> to vector<2x32xbf16>
    %cst_106 = arith.constant dense<0.000000e+00> : vector<2x128xf32>
    %373 = tpu.matmul %372, %313, %cst_106 {dimension_numbers = #tpu.dot_dimension_numbers<[1], [0], [0], [1], [0, 0, 1, 1], [], []>} : vector<2x32xbf16>, vector<32x128xbf16>, vector<2x128xf32> -> vector<2x128xf32>
    %374 = arith.addf %312, %373 : vector<2x128xf32>
    %375 = vector.extract_strided_slice %374 {offsets = [0, 0], sizes = [2, 32], strides = [1, 1]} : vector<2x128xf32> to vector<2x32xf32>
    %376 = arith.negf %375 : vector<2x32xf32>
    %377 = math.exp %376 : vector<2x32xf32>
    %cst_107 = arith.constant 1.000000e+00 : f32
    %378 = vector.broadcast %cst_107 : f32 to vector<2x32xf32>
    %379 = arith.addf %378, %377 : vector<2x32xf32>
    %380 = arith.divf %378, %379 : vector<2x32xf32>
    %381 = vector.extract_strided_slice %374 {offsets = [0, 32], sizes = [2, 32], strides = [1, 1]} : vector<2x128xf32> to vector<2x32xf32>
    %382 = arith.negf %381 : vector<2x32xf32>
    %383 = math.exp %382 : vector<2x32xf32>
    %cst_108 = arith.constant 1.000000e+00 : f32
    %384 = vector.broadcast %cst_108 : f32 to vector<2x32xf32>
    %385 = arith.addf %384, %383 : vector<2x32xf32>
    %386 = arith.divf %384, %385 : vector<2x32xf32>
    %387 = vector.extract_strided_slice %374 {offsets = [0, 64], sizes = [2, 32], strides = [1, 1]} : vector<2x128xf32> to vector<2x32xf32>
    %388 = math.tanh %387 : vector<2x32xf32>
    %389 = vector.extract_strided_slice %374 {offsets = [0, 96], sizes = [2, 32], strides = [1, 1]} : vector<2x128xf32> to vector<2x32xf32>
    %390 = arith.negf %389 : vector<2x32xf32>
    %391 = math.exp %390 : vector<2x32xf32>
    %cst_109 = arith.constant 1.000000e+00 : f32
    %392 = vector.broadcast %cst_109 : f32 to vector<2x32xf32>
    %393 = arith.addf %392, %391 : vector<2x32xf32>
    %394 = arith.divf %392, %393 : vector<2x32xf32>
    %395 = arith.mulf %386, %369 : vector<2x32xf32>
    %396 = arith.mulf %380, %388 : vector<2x32xf32>
    %397 = arith.addf %395, %396 : vector<2x32xf32>
    %398 = math.tanh %397 : vector<2x32xf32>
    %399 = arith.mulf %394, %398 : vector<2x32xf32>
    %400 = arith.truncf %399 : vector<2x32xf32> to vector<2x32xbf16>
    %cst_110 = arith.constant dense<0.000000e+00> : vector<2x128xf32>
    %401 = tpu.matmul %400, %313, %cst_110 {dimension_numbers = #tpu.dot_dimension_numbers<[1], [0], [0], [1], [0, 0, 1, 1], [], []>} : vector<2x32xbf16>, vector<32x128xbf16>, vector<2x128xf32> -> vector<2x128xf32>
    %402 = arith.addf %312, %401 : vector<2x128xf32>
    %403 = vector.extract_strided_slice %402 {offsets = [0, 0], sizes = [2, 32], strides = [1, 1]} : vector<2x128xf32> to vector<2x32xf32>
    %404 = arith.negf %403 : vector<2x32xf32>
    %405 = math.exp %404 : vector<2x32xf32>
    %cst_111 = arith.constant 1.000000e+00 : f32
    %406 = vector.broadcast %cst_111 : f32 to vector<2x32xf32>
    %407 = arith.addf %406, %405 : vector<2x32xf32>
    %408 = arith.divf %406, %407 : vector<2x32xf32>
    %409 = vector.extract_strided_slice %402 {offsets = [0, 32], sizes = [2, 32], strides = [1, 1]} : vector<2x128xf32> to vector<2x32xf32>
    %410 = arith.negf %409 : vector<2x32xf32>
    %411 = math.exp %410 : vector<2x32xf32>
    %cst_112 = arith.constant 1.000000e+00 : f32
    %412 = vector.broadcast %cst_112 : f32 to vector<2x32xf32>
    %413 = arith.addf %412, %411 : vector<2x32xf32>
    %414 = arith.divf %412, %413 : vector<2x32xf32>
    %415 = vector.extract_strided_slice %402 {offsets = [0, 64], sizes = [2, 32], strides = [1, 1]} : vector<2x128xf32> to vector<2x32xf32>
    %416 = math.tanh %415 : vector<2x32xf32>
    %417 = vector.extract_strided_slice %402 {offsets = [0, 96], sizes = [2, 32], strides = [1, 1]} : vector<2x128xf32> to vector<2x32xf32>
    %418 = arith.negf %417 : vector<2x32xf32>
    %419 = math.exp %418 : vector<2x32xf32>
    %cst_113 = arith.constant 1.000000e+00 : f32
    %420 = vector.broadcast %cst_113 : f32 to vector<2x32xf32>
    %421 = arith.addf %420, %419 : vector<2x32xf32>
    %422 = arith.divf %420, %421 : vector<2x32xf32>
    %423 = arith.mulf %414, %397 : vector<2x32xf32>
    %424 = arith.mulf %408, %416 : vector<2x32xf32>
    %425 = arith.addf %423, %424 : vector<2x32xf32>
    %426 = math.tanh %425 : vector<2x32xf32>
    %427 = arith.mulf %422, %426 : vector<2x32xf32>
    %428 = arith.truncf %427 : vector<2x32xf32> to vector<2x32xbf16>
    %cst_114 = arith.constant dense<0.000000e+00> : vector<2x128xf32>
    %429 = tpu.matmul %428, %313, %cst_114 {dimension_numbers = #tpu.dot_dimension_numbers<[1], [0], [0], [1], [0, 0, 1, 1], [], []>} : vector<2x32xbf16>, vector<32x128xbf16>, vector<2x128xf32> -> vector<2x128xf32>
    %430 = arith.addf %312, %429 : vector<2x128xf32>
    %431 = vector.extract_strided_slice %430 {offsets = [0, 0], sizes = [2, 32], strides = [1, 1]} : vector<2x128xf32> to vector<2x32xf32>
    %432 = arith.negf %431 : vector<2x32xf32>
    %433 = math.exp %432 : vector<2x32xf32>
    %cst_115 = arith.constant 1.000000e+00 : f32
    %434 = vector.broadcast %cst_115 : f32 to vector<2x32xf32>
    %435 = arith.addf %434, %433 : vector<2x32xf32>
    %436 = arith.divf %434, %435 : vector<2x32xf32>
    %437 = vector.extract_strided_slice %430 {offsets = [0, 32], sizes = [2, 32], strides = [1, 1]} : vector<2x128xf32> to vector<2x32xf32>
    %438 = arith.negf %437 : vector<2x32xf32>
    %439 = math.exp %438 : vector<2x32xf32>
    %cst_116 = arith.constant 1.000000e+00 : f32
    %440 = vector.broadcast %cst_116 : f32 to vector<2x32xf32>
    %441 = arith.addf %440, %439 : vector<2x32xf32>
    %442 = arith.divf %440, %441 : vector<2x32xf32>
    %443 = vector.extract_strided_slice %430 {offsets = [0, 64], sizes = [2, 32], strides = [1, 1]} : vector<2x128xf32> to vector<2x32xf32>
    %444 = math.tanh %443 : vector<2x32xf32>
    %445 = vector.extract_strided_slice %430 {offsets = [0, 96], sizes = [2, 32], strides = [1, 1]} : vector<2x128xf32> to vector<2x32xf32>
    %446 = arith.negf %445 : vector<2x32xf32>
    %447 = math.exp %446 : vector<2x32xf32>
    %cst_117 = arith.constant 1.000000e+00 : f32
    %448 = vector.broadcast %cst_117 : f32 to vector<2x32xf32>
    %449 = arith.addf %448, %447 : vector<2x32xf32>
    %450 = arith.divf %448, %449 : vector<2x32xf32>
    %451 = arith.mulf %442, %425 : vector<2x32xf32>
    %452 = arith.mulf %436, %444 : vector<2x32xf32>
    %453 = arith.addf %451, %452 : vector<2x32xf32>
    %454 = math.tanh %453 : vector<2x32xf32>
    %455 = arith.mulf %450, %454 : vector<2x32xf32>
    %456 = arith.truncf %455 : vector<2x32xf32> to vector<2x32xbf16>
    %cst_118 = arith.constant dense<0.000000e+00> : vector<2x128xf32>
    %457 = tpu.matmul %456, %313, %cst_118 {dimension_numbers = #tpu.dot_dimension_numbers<[1], [0], [0], [1], [0, 0, 1, 1], [], []>} : vector<2x32xbf16>, vector<32x128xbf16>, vector<2x128xf32> -> vector<2x128xf32>
    %458 = arith.addf %312, %457 : vector<2x128xf32>
    %459 = vector.extract_strided_slice %458 {offsets = [0, 0], sizes = [2, 32], strides = [1, 1]} : vector<2x128xf32> to vector<2x32xf32>
    %460 = arith.negf %459 : vector<2x32xf32>
    %461 = math.exp %460 : vector<2x32xf32>
    %cst_119 = arith.constant 1.000000e+00 : f32
    %462 = vector.broadcast %cst_119 : f32 to vector<2x32xf32>
    %463 = arith.addf %462, %461 : vector<2x32xf32>
    %464 = arith.divf %462, %463 : vector<2x32xf32>
    %465 = vector.extract_strided_slice %458 {offsets = [0, 32], sizes = [2, 32], strides = [1, 1]} : vector<2x128xf32> to vector<2x32xf32>
    %466 = arith.negf %465 : vector<2x32xf32>
    %467 = math.exp %466 : vector<2x32xf32>
    %cst_120 = arith.constant 1.000000e+00 : f32
    %468 = vector.broadcast %cst_120 : f32 to vector<2x32xf32>
    %469 = arith.addf %468, %467 : vector<2x32xf32>
    %470 = arith.divf %468, %469 : vector<2x32xf32>
    %471 = vector.extract_strided_slice %458 {offsets = [0, 64], sizes = [2, 32], strides = [1, 1]} : vector<2x128xf32> to vector<2x32xf32>
    %472 = math.tanh %471 : vector<2x32xf32>
    %473 = vector.extract_strided_slice %458 {offsets = [0, 96], sizes = [2, 32], strides = [1, 1]} : vector<2x128xf32> to vector<2x32xf32>
    %474 = arith.negf %473 : vector<2x32xf32>
    %475 = math.exp %474 : vector<2x32xf32>
    %cst_121 = arith.constant 1.000000e+00 : f32
    %476 = vector.broadcast %cst_121 : f32 to vector<2x32xf32>
    %477 = arith.addf %476, %475 : vector<2x32xf32>
    %478 = arith.divf %476, %477 : vector<2x32xf32>
    %479 = arith.mulf %470, %453 : vector<2x32xf32>
    %480 = arith.mulf %464, %472 : vector<2x32xf32>
    %481 = arith.addf %479, %480 : vector<2x32xf32>
    %482 = math.tanh %481 : vector<2x32xf32>
    %483 = arith.mulf %478, %482 : vector<2x32xf32>
    %484 = arith.truncf %483 : vector<2x32xf32> to vector<2x32xbf16>
    %cst_122 = arith.constant dense<0.000000e+00> : vector<2x128xf32>
    %485 = tpu.matmul %484, %313, %cst_122 {dimension_numbers = #tpu.dot_dimension_numbers<[1], [0], [0], [1], [0, 0, 1, 1], [], []>} : vector<2x32xbf16>, vector<32x128xbf16>, vector<2x128xf32> -> vector<2x128xf32>
    %486 = arith.addf %312, %485 : vector<2x128xf32>
    %487 = vector.extract_strided_slice %486 {offsets = [0, 0], sizes = [2, 32], strides = [1, 1]} : vector<2x128xf32> to vector<2x32xf32>
    %488 = arith.negf %487 : vector<2x32xf32>
    %489 = math.exp %488 : vector<2x32xf32>
    %cst_123 = arith.constant 1.000000e+00 : f32
    %490 = vector.broadcast %cst_123 : f32 to vector<2x32xf32>
    %491 = arith.addf %490, %489 : vector<2x32xf32>
    %492 = arith.divf %490, %491 : vector<2x32xf32>
    %493 = vector.extract_strided_slice %486 {offsets = [0, 32], sizes = [2, 32], strides = [1, 1]} : vector<2x128xf32> to vector<2x32xf32>
    %494 = arith.negf %493 : vector<2x32xf32>
    %495 = math.exp %494 : vector<2x32xf32>
    %cst_124 = arith.constant 1.000000e+00 : f32
    %496 = vector.broadcast %cst_124 : f32 to vector<2x32xf32>
    %497 = arith.addf %496, %495 : vector<2x32xf32>
    %498 = arith.divf %496, %497 : vector<2x32xf32>
    %499 = vector.extract_strided_slice %486 {offsets = [0, 64], sizes = [2, 32], strides = [1, 1]} : vector<2x128xf32> to vector<2x32xf32>
    %500 = math.tanh %499 : vector<2x32xf32>
    %501 = vector.extract_strided_slice %486 {offsets = [0, 96], sizes = [2, 32], strides = [1, 1]} : vector<2x128xf32> to vector<2x32xf32>
    %502 = arith.negf %501 : vector<2x32xf32>
    %503 = math.exp %502 : vector<2x32xf32>
    %cst_125 = arith.constant 1.000000e+00 : f32
    %504 = vector.broadcast %cst_125 : f32 to vector<2x32xf32>
    %505 = arith.addf %504, %503 : vector<2x32xf32>
    %506 = arith.divf %504, %505 : vector<2x32xf32>
    %507 = arith.mulf %498, %481 : vector<2x32xf32>
    %508 = arith.mulf %492, %500 : vector<2x32xf32>
    %509 = arith.addf %507, %508 : vector<2x32xf32>
    %510 = math.tanh %509 : vector<2x32xf32>
    %511 = arith.mulf %506, %510 : vector<2x32xf32>
    %512 = arith.truncf %511 : vector<2x32xf32> to vector<2x32xbf16>
    %cst_126 = arith.constant dense<0.000000e+00> : vector<2x128xf32>
    %513 = tpu.matmul %512, %313, %cst_126 {dimension_numbers = #tpu.dot_dimension_numbers<[1], [0], [0], [1], [0, 0, 1, 1], [], []>} : vector<2x32xbf16>, vector<32x128xbf16>, vector<2x128xf32> -> vector<2x128xf32>
    %514 = arith.addf %312, %513 : vector<2x128xf32>
    %515 = vector.extract_strided_slice %514 {offsets = [0, 0], sizes = [2, 32], strides = [1, 1]} : vector<2x128xf32> to vector<2x32xf32>
    %516 = arith.negf %515 : vector<2x32xf32>
    %517 = math.exp %516 : vector<2x32xf32>
    %cst_127 = arith.constant 1.000000e+00 : f32
    %518 = vector.broadcast %cst_127 : f32 to vector<2x32xf32>
    %519 = arith.addf %518, %517 : vector<2x32xf32>
    %520 = arith.divf %518, %519 : vector<2x32xf32>
    %521 = vector.extract_strided_slice %514 {offsets = [0, 32], sizes = [2, 32], strides = [1, 1]} : vector<2x128xf32> to vector<2x32xf32>
    %522 = arith.negf %521 : vector<2x32xf32>
    %523 = math.exp %522 : vector<2x32xf32>
    %cst_128 = arith.constant 1.000000e+00 : f32
    %524 = vector.broadcast %cst_128 : f32 to vector<2x32xf32>
    %525 = arith.addf %524, %523 : vector<2x32xf32>
    %526 = arith.divf %524, %525 : vector<2x32xf32>
    %527 = vector.extract_strided_slice %514 {offsets = [0, 64], sizes = [2, 32], strides = [1, 1]} : vector<2x128xf32> to vector<2x32xf32>
    %528 = math.tanh %527 : vector<2x32xf32>
    %529 = vector.extract_strided_slice %514 {offsets = [0, 96], sizes = [2, 32], strides = [1, 1]} : vector<2x128xf32> to vector<2x32xf32>
    %530 = arith.negf %529 : vector<2x32xf32>
    %531 = math.exp %530 : vector<2x32xf32>
    %cst_129 = arith.constant 1.000000e+00 : f32
    %532 = vector.broadcast %cst_129 : f32 to vector<2x32xf32>
    %533 = arith.addf %532, %531 : vector<2x32xf32>
    %534 = arith.divf %532, %533 : vector<2x32xf32>
    %535 = arith.mulf %526, %509 : vector<2x32xf32>
    %536 = arith.mulf %520, %528 : vector<2x32xf32>
    %537 = arith.addf %535, %536 : vector<2x32xf32>
    %538 = math.tanh %537 : vector<2x32xf32>
    %539 = arith.mulf %534, %538 : vector<2x32xf32>
    %540 = tpu.concatenate %343, %371, %399, %427, %455, %483, %511, %539 in 0 : vector<2x32xf32>, vector<2x32xf32>, vector<2x32xf32>, vector<2x32xf32>, vector<2x32xf32>, vector<2x32xf32>, vector<2x32xf32>, vector<2x32xf32> -> vector<16x32xf32>
    %541 = arith.truncf %540 : vector<16x32xf32> to vector<16x32xbf16>
    %c0_130 = arith.constant 0 : index
    %c0_131 = arith.constant 0 : index
    %542 = vector.load %arg11[%c0_130, %c0_131] : memref<32x24xbf16, #tpu.memory_space<vmem>>, vector<32x24xbf16>
    %cst_132 = arith.constant dense<0.000000e+00> : vector<16x24xf32>
    %543 = tpu.matmul %541, %542, %cst_132 {dimension_numbers = #tpu.dot_dimension_numbers<[1], [0], [0], [1], [0, 0, 1, 1], [], []>} : vector<16x32xbf16>, vector<32x24xbf16>, vector<16x24xf32> -> vector<16x24xf32>
    %c0_133 = arith.constant 0 : index
    %c0_134 = arith.constant 0 : index
    %544 = vector.load %arg12[%c0_133, %c0_134] : memref<1x24xf32, #tpu.memory_space<vmem>>, vector<1x24xf32>
    %545 = vector.broadcast %544 : vector<1x24xf32> to vector<16x24xf32>
    %546 = arith.addf %543, %545 : vector<16x24xf32>
    %c0_135 = arith.constant 0 : index
    %c0_136 = arith.constant 0 : index
    %547 = vector.load %arg21[%c0_135, %c0_136] : memref<16x24xf32, #tpu.memory_space<vmem>>, vector<16x24xf32>
    tpu.vector_store %arg21[%c0_135, %c0_136], %546 {strides = array<i32>} : memref<16x24xf32, #tpu.memory_space<vmem>>, vector<16x24xf32>,
    return
  }
  func.func @transform_0(%arg0: i32) -> (i32, i32, i32) {
    %c0_i32 = arith.constant 0 : i32
    %c0_i32_0 = arith.constant 0 : i32
    %c0_i32_1 = arith.constant 0 : i32
    %c0_i32_2 = arith.constant 0 : i32
    return %c0_i32, %c0_i32_0, %c0_i32_1 : i32, i32, i32
  }
  func.func @transform_1(%arg0: i32) -> (i32, i32) {
    %c0_i32 = arith.constant 0 : i32
    %c0_i32_0 = arith.constant 0 : i32
    %c0_i32_1 = arith.constant 0 : i32
    return %c0_i32, %c0_i32_0 : i32, i32
  }
  func.func @transform_2(%arg0: i32) -> (i32, i32) {
    %c0_i32 = arith.constant 0 : i32
    %c0_i32_0 = arith.constant 0 : i32
    %c0_i32_1 = arith.constant 0 : i32
    return %c0_i32, %c0_i32_0 : i32, i32
  }
  func.func @transform_3(%arg0: i32) -> (i32, i32) {
    %c0_i32 = arith.constant 0 : i32
    %c0_i32_0 = arith.constant 0 : i32
    %c0_i32_1 = arith.constant 0 : i32
    return %c0_i32, %c0_i32_0 : i32, i32
  }
  func.func @transform_4(%arg0: i32) -> (i32, i32) {
    %c0_i32 = arith.constant 0 : i32
    %c0_i32_0 = arith.constant 0 : i32
    %c0_i32_1 = arith.constant 0 : i32
    return %c0_i32, %c0_i32_0 : i32, i32
  }
  func.func @transform_5(%arg0: i32) -> (i32, i32) {
    %c0_i32 = arith.constant 0 : i32
    %c0_i32_0 = arith.constant 0 : i32
    %c0_i32_1 = arith.constant 0 : i32
    return %c0_i32, %c0_i32_0 : i32, i32
  }
  func.func @transform_6(%arg0: i32) -> (i32, i32) {
    %c0_i32 = arith.constant 0 : i32
    %c0_i32_0 = arith.constant 0 : i32
    %c0_i32_1 = arith.constant 0 : i32
    return %c0_i32, %c0_i32_0 : i32, i32
  }
  func.func @transform_7(%arg0: i32) -> (i32, i32) {
    %c0_i32 = arith.constant 0 : i32
    %c0_i32_0 = arith.constant 0 : i32
    %c0_i32_1 = arith.constant 0 : i32
    return %c0_i32, %c0_i32_0 : i32, i32
  }
  func.func @transform_8(%arg0: i32) -> (i32, i32) {
    %c0_i32 = arith.constant 0 : i32
    %c0_i32_0 = arith.constant 0 : i32
    %c0_i32_1 = arith.constant 0 : i32
    return %c0_i32, %c0_i32_0 : i32, i32
  }
  func.func @transform_9(%arg0: i32) -> (i32, i32) {
    %c0_i32 = arith.constant 0 : i32
    %c0_i32_0 = arith.constant 0 : i32
    %c0_i32_1 = arith.constant 0 : i32
    return %c0_i32, %c0_i32_0 : i32, i32
  }
  func.func @transform_10(%arg0: i32) -> (i32, i32) {
    %c0_i32 = arith.constant 0 : i32
    %c0_i32_0 = arith.constant 0 : i32
    %c0_i32_1 = arith.constant 0 : i32
    return %c0_i32, %c0_i32_0 : i32, i32
  }
  func.func @transform_11(%arg0: i32) -> (i32, i32) {
    %c0_i32 = arith.constant 0 : i32
    %c0_i32_0 = arith.constant 0 : i32
    %c0_i32_1 = arith.constant 0 : i32
    return %c0_i32, %c0_i32_0 : i32, i32
  }
  func.func @transform_12(%arg0: i32) -> (i32, i32) {
    %c0_i32 = arith.constant 0 : i32
    %c0_i32_0 = arith.constant 0 : i32
    %c0_i32_1 = arith.constant 0 : i32
    return %c0_i32, %c0_i32_0 : i32, i32
  }
  func.func @transform_13(%arg0: i32) -> (i32, i32) {
    %c0_i32 = arith.constant 0 : i32
    %c0_i32_0 = arith.constant 0 : i32
    %c0_i32_1 = arith.constant 0 : i32
    return %c0_i32, %c0_i32_0 : i32, i32
  }
  func.func @transform_14(%arg0: i32) -> (i32, i32) {
    %c0_i32 = arith.constant 0 : i32
    %c0_i32_0 = arith.constant 0 : i32
    %c0_i32_1 = arith.constant 0 : i32
    return %c0_i32, %c0_i32_0 : i32, i32
  }
  func.func @transform_15(%arg0: i32) -> (i32, i32) {
    %c0_i32 = arith.constant 0 : i32
    %c0_i32_0 = arith.constant 0 : i32
    %c0_i32_1 = arith.constant 0 : i32
    return %c0_i32, %c0_i32_0 : i32, i32
  }
  func.func @transform_16(%arg0: i32) -> (i32, i32) {
    %c0_i32 = arith.constant 0 : i32
    %c0_i32_0 = arith.constant 0 : i32
    %c0_i32_1 = arith.constant 0 : i32
    return %c0_i32, %c0_i32_0 : i32, i32
  }
  func.func @transform_17(%arg0: i32) -> (i32, i32) {
    %c0_i32 = arith.constant 0 : i32
    %c0_i32_0 = arith.constant 0 : i32
    %c0_i32_1 = arith.constant 0 : i32
    return %c0_i32, %c0_i32_0 : i32, i32
  }
  func.func @transform_18(%arg0: i32) -> (i32, i32) {
    %c0_i32 = arith.constant 0 : i32
    %c0_i32_0 = arith.constant 0 : i32
    %c0_i32_1 = arith.constant 0 : i32
    return %c0_i32, %c0_i32_0 : i32, i32
  }
  func.func @transform_19(%arg0: i32) -> (i32, i32) {
    %c0_i32 = arith.constant 0 : i32
    %c0_i32_0 = arith.constant 0 : i32
    %c0_i32_1 = arith.constant 0 : i32
    return %c0_i32, %c0_i32_0 : i32, i32
  }
  func.func @transform_20(%arg0: i32) -> (i32, i32) {
    %c0_i32 = arith.constant 0 : i32
    %c0_i32_0 = arith.constant 0 : i32
    %c0_i32_1 = arith.constant 0 : i32
    return %c0_i32, %c0_i32_0 : i32, i32
  }
}

module attributes {stable_mosaic.version = 11 : i64} {
  func.func @_film_stack_kernel(%arg0: i32, %arg1: memref<34x32xf32, #tpu.memory_space<vmem>>, %arg2: memref<2x32xf32, #tpu.memory_space<vmem>>, %arg3: memref<1x32x96xbf16, #tpu.memory_space<vmem>>, %arg4: memref<1x1x96xf32, #tpu.memory_space<vmem>>, %arg5: memref<1x32x32xbf16, #tpu.memory_space<vmem>>, %arg6: memref<1x1x32xf32, #tpu.memory_space<vmem>>, %arg7: memref<1x1x32xf32, #tpu.memory_space<vmem>>, %arg8: memref<1x1x32xf32, #tpu.memory_space<vmem>>, %arg9: memref<1x32x128xbf16, #tpu.memory_space<vmem>>, %arg10: memref<1x1x128xf32, #tpu.memory_space<vmem>>, %arg11: memref<1x128x32xbf16, #tpu.memory_space<vmem>>, %arg12: memref<1x1x32xf32, #tpu.memory_space<vmem>>, %arg13: memref<1x32x32xbf16, #tpu.memory_space<vmem>>, %arg14: memref<1x1x32xf32, #tpu.memory_space<vmem>>, %arg15: memref<1x32x32xbf16, #tpu.memory_space<vmem>>, %arg16: memref<1x1x32xf32, #tpu.memory_space<vmem>>, %arg17: memref<1x1x32xf32, #tpu.memory_space<vmem>>, %arg18: memref<1x1x32xf32, #tpu.memory_space<vmem>>, %arg19: memref<34x32xf32, #tpu.memory_space<vmem>>) attributes {dimension_semantics = [#tpu.dimension_semantics<arbitrary>], iteration_bounds = array<i64: 2>, scalar_prefetch = 0 : i64, scratch_operands = 0 : i64, tpu.core_type = #tpu.core_type<tc>, window_params = [{pipeline_mode = #tpu.pipeline_mode<synchronous>, transform_indices = @transform_0, window_bounds = array<i64: 34, 32>}, {pipeline_mode = #tpu.pipeline_mode<synchronous>, transform_indices = @transform_1, window_bounds = array<i64: 2, 32>}, {transform_indices = @transform_2, window_bounds = array<i64: 1, 32, 96>}, {transform_indices = @transform_3, window_bounds = array<i64: 1, 1, 96>}, {transform_indices = @transform_4, window_bounds = array<i64: 1, 32, 32>}, {transform_indices = @transform_5, window_bounds = array<i64: 1, 1, 32>}, {transform_indices = @transform_6, window_bounds = array<i64: 1, 1, 32>}, {transform_indices = @transform_7, window_bounds = array<i64: 1, 1, 32>}, {transform_indices = @transform_8, window_bounds = array<i64: 1, 32, 128>}, {transform_indices = @transform_9, window_bounds = array<i64: 1, 1, 128>}, {transform_indices = @transform_10, window_bounds = array<i64: 1, 128, 32>}, {transform_indices = @transform_11, window_bounds = array<i64: 1, 1, 32>}, {transform_indices = @transform_12, window_bounds = array<i64: 1, 32, 32>}, {transform_indices = @transform_13, window_bounds = array<i64: 1, 1, 32>}, {transform_indices = @transform_14, window_bounds = array<i64: 1, 32, 32>}, {transform_indices = @transform_15, window_bounds = array<i64: 1, 1, 32>}, {transform_indices = @transform_16, window_bounds = array<i64: 1, 1, 32>}, {transform_indices = @transform_17, window_bounds = array<i64: 1, 1, 32>}, {pipeline_mode = #tpu.pipeline_mode<synchronous>, transform_indices = @transform_18, window_bounds = array<i64: 34, 32>}]} {
    %c0_i32 = arith.constant 0 : i32
    %0 = arith.cmpi eq, %arg0, %c0_i32 : i32
    %1 = arith.extui %0 : i1 to i32
    %c0_i32_0 = arith.constant 0 : i32
    %2 = arith.cmpi ne, %1, %c0_i32_0 : i32
    scf.if %2 {
      %c0_122 = arith.constant 0 : index
      %c0_123 = arith.constant 0 : index
      %330 = vector.load %arg1[%c0_122, %c0_123] : memref<34x32xf32, #tpu.memory_space<vmem>>, vector<34x32xf32>
      %c0_124 = arith.constant 0 : index
      %c0_125 = arith.constant 0 : index
      %331 = vector.load %arg19[%c0_124, %c0_125] : memref<34x32xf32, #tpu.memory_space<vmem>>, vector<34x32xf32>
      tpu.vector_store %arg19[%c0_124, %c0_125], %330 {strides = array<i32>} : memref<34x32xf32, #tpu.memory_space<vmem>>, vector<34x32xf32>,
    } else {
    }
    %c0 = arith.constant 0 : index
    %c0_1 = arith.constant 0 : index
    %3 = vector.load %arg19[%c0, %c0_1] : memref<34x32xf32, #tpu.memory_space<vmem>>, vector<34x32xf32>
    %4 = arith.truncf %3 : vector<34x32xf32> to vector<34x32xbf16>
    %c0_2 = arith.constant 0 : index
    %c0_3 = arith.constant 0 : index
    %c0_4 = arith.constant 0 : index
    %5 = vector.load %arg3[%c0_2, %c0_3, %c0_4] : memref<1x32x96xbf16, #tpu.memory_space<vmem>>, vector<1x32x96xbf16>
    %6 = vector.shape_cast %5 : vector<1x32x96xbf16> to vector<32x96xbf16>
    %cst = arith.constant dense<0.000000e+00> : vector<34x96xf32>
    %7 = tpu.matmul %4, %6, %cst {dimension_numbers = #tpu.dot_dimension_numbers<[1], [0], [0], [1], [0, 0, 1, 1], [], []>} : vector<34x32xbf16>, vector<32x96xbf16>, vector<34x96xf32> -> vector<34x96xf32>
    %c0_5 = arith.constant 0 : index
    %c0_6 = arith.constant 0 : index
    %c0_7 = arith.constant 0 : index
    %8 = vector.load %arg4[%c0_5, %c0_6, %c0_7] : memref<1x1x96xf32, #tpu.memory_space<vmem>>, vector<1x1x96xf32>
    %9 = vector.shape_cast %8 : vector<1x1x96xf32> to vector<1x96xf32>
    %10 = vector.broadcast %9 : vector<1x96xf32> to vector<34x96xf32>
    %11 = arith.addf %7, %10 : vector<34x96xf32>
    %c0_8 = arith.constant 0 : index
    %c0_9 = arith.constant 0 : index
    %c0_10 = arith.constant 0 : index
    %12 = vector.load %arg5[%c0_8, %c0_9, %c0_10] : memref<1x32x32xbf16, #tpu.memory_space<vmem>>, vector<1x32x32xbf16>
    %13 = vector.shape_cast %12 : vector<1x32x32xbf16> to vector<32x32xbf16>
    %cst_11 = arith.constant 0.000000e+00 : f32
    %14 = vector.broadcast %cst_11 : f32 to vector<17x32xf32>
    %15 = vector.extract_strided_slice %11 {offsets = [0, 0], sizes = [17, 8], strides = [1, 1]} : vector<34x96xf32> to vector<17x8xf32>
    %cst_12 = arith.constant 0.353553385 : f32
    %16 = vector.broadcast %cst_12 : f32 to vector<17x8xf32>
    %17 = arith.mulf %15, %16 : vector<17x8xf32>
    %18 = vector.extract_strided_slice %11 {offsets = [0, 32], sizes = [17, 8], strides = [1, 1]} : vector<34x96xf32> to vector<17x8xf32>
    %19 = vector.extract_strided_slice %11 {offsets = [0, 64], sizes = [17, 8], strides = [1, 1]} : vector<34x96xf32> to vector<17x8xf32>
    %20 = arith.truncf %17 : vector<17x8xf32> to vector<17x8xbf16>
    %21 = arith.truncf %18 : vector<17x8xf32> to vector<17x8xbf16>
    %cst_13 = arith.constant dense<0.000000e+00> : vector<17x17xf32>
    %22 = tpu.matmul %20, %21, %cst_13 {dimension_numbers = #tpu.dot_dimension_numbers<[1], [1], [0], [0], [0, 0, 1, 0], [], []>} : vector<17x8xbf16>, vector<17x8xbf16>, vector<17x17xf32> -> vector<17x17xf32>
    %cst_14 = arith.constant dense<0xFF800000> : vector<17xf32>
    %23 = vector.multi_reduction <maximumf>, %22, %cst_14 [1] : vector<17x17xf32> to vector<17xf32>
    %24 = vector.shape_cast %23 : vector<17xf32> to vector<17x1xf32>
    %25 = vector.broadcast %24 : vector<17x1xf32> to vector<17x17xf32>
    %26 = arith.subf %22, %25 : vector<17x17xf32>
    %27 = math.exp %26 : vector<17x17xf32>
    %cst_15 = arith.constant dense<0.000000e+00> : vector<17xf32>
    %28 = vector.multi_reduction <add>, %27, %cst_15 [1] : vector<17x17xf32> to vector<17xf32>
    %29 = vector.shape_cast %28 : vector<17xf32> to vector<17x1xf32>
    %30 = vector.broadcast %29 : vector<17x1xf32> to vector<17x17xf32>
    %31 = arith.divf %27, %30 : vector<17x17xf32>
    %32 = arith.truncf %31 : vector<17x17xf32> to vector<17x17xbf16>
    %33 = arith.truncf %19 : vector<17x8xf32> to vector<17x8xbf16>
    %cst_16 = arith.constant dense<0.000000e+00> : vector<17x8xf32>
    %34 = tpu.matmul %32, %33, %cst_16 {dimension_numbers = #tpu.dot_dimension_numbers<[1], [0], [0], [1], [0, 0, 1, 1], [], []>} : vector<17x17xbf16>, vector<17x8xbf16>, vector<17x8xf32> -> vector<17x8xf32>
    %35 = arith.truncf %34 : vector<17x8xf32> to vector<17x8xbf16>
    %36 = vector.extract_strided_slice %13 {offsets = [0, 0], sizes = [8, 32], strides = [1, 1]} : vector<32x32xbf16> to vector<8x32xbf16>
    %cst_17 = arith.constant dense<0.000000e+00> : vector<17x32xf32>
    %37 = tpu.matmul %35, %36, %cst_17 {dimension_numbers = #tpu.dot_dimension_numbers<[1], [0], [0], [1], [0, 0, 1, 1], [], []>} : vector<17x8xbf16>, vector<8x32xbf16>, vector<17x32xf32> -> vector<17x32xf32>
    %38 = arith.addf %14, %37 : vector<17x32xf32>
    %39 = vector.extract_strided_slice %11 {offsets = [0, 8], sizes = [17, 8], strides = [1, 1]} : vector<34x96xf32> to vector<17x8xf32>
    %cst_18 = arith.constant 0.353553385 : f32
    %40 = vector.broadcast %cst_18 : f32 to vector<17x8xf32>
    %41 = arith.mulf %39, %40 : vector<17x8xf32>
    %42 = vector.extract_strided_slice %11 {offsets = [0, 40], sizes = [17, 8], strides = [1, 1]} : vector<34x96xf32> to vector<17x8xf32>
    %43 = vector.extract_strided_slice %11 {offsets = [0, 72], sizes = [17, 8], strides = [1, 1]} : vector<34x96xf32> to vector<17x8xf32>
    %44 = arith.truncf %41 : vector<17x8xf32> to vector<17x8xbf16>
    %45 = arith.truncf %42 : vector<17x8xf32> to vector<17x8xbf16>
    %cst_19 = arith.constant dense<0.000000e+00> : vector<17x17xf32>
    %46 = tpu.matmul %44, %45, %cst_19 {dimension_numbers = #tpu.dot_dimension_numbers<[1], [1], [0], [0], [0, 0, 1, 0], [], []>} : vector<17x8xbf16>, vector<17x8xbf16>, vector<17x17xf32> -> vector<17x17xf32>
    %cst_20 = arith.constant dense<0xFF800000> : vector<17xf32>
    %47 = vector.multi_reduction <maximumf>, %46, %cst_20 [1] : vector<17x17xf32> to vector<17xf32>
    %48 = vector.shape_cast %47 : vector<17xf32> to vector<17x1xf32>
    %49 = vector.broadcast %48 : vector<17x1xf32> to vector<17x17xf32>
    %50 = arith.subf %46, %49 : vector<17x17xf32>
    %51 = math.exp %50 : vector<17x17xf32>
    %cst_21 = arith.constant dense<0.000000e+00> : vector<17xf32>
    %52 = vector.multi_reduction <add>, %51, %cst_21 [1] : vector<17x17xf32> to vector<17xf32>
    %53 = vector.shape_cast %52 : vector<17xf32> to vector<17x1xf32>
    %54 = vector.broadcast %53 : vector<17x1xf32> to vector<17x17xf32>
    %55 = arith.divf %51, %54 : vector<17x17xf32>
    %56 = arith.truncf %55 : vector<17x17xf32> to vector<17x17xbf16>
    %57 = arith.truncf %43 : vector<17x8xf32> to vector<17x8xbf16>
    %cst_22 = arith.constant dense<0.000000e+00> : vector<17x8xf32>
    %58 = tpu.matmul %56, %57, %cst_22 {dimension_numbers = #tpu.dot_dimension_numbers<[1], [0], [0], [1], [0, 0, 1, 1], [], []>} : vector<17x17xbf16>, vector<17x8xbf16>, vector<17x8xf32> -> vector<17x8xf32>
    %59 = arith.truncf %58 : vector<17x8xf32> to vector<17x8xbf16>
    %60 = vector.extract_strided_slice %13 {offsets = [8, 0], sizes = [8, 32], strides = [1, 1]} : vector<32x32xbf16> to vector<8x32xbf16>
    %cst_23 = arith.constant dense<0.000000e+00> : vector<17x32xf32>
    %61 = tpu.matmul %59, %60, %cst_23 {dimension_numbers = #tpu.dot_dimension_numbers<[1], [0], [0], [1], [0, 0, 1, 1], [], []>} : vector<17x8xbf16>, vector<8x32xbf16>, vector<17x32xf32> -> vector<17x32xf32>
    %62 = arith.addf %38, %61 : vector<17x32xf32>
    %63 = vector.extract_strided_slice %11 {offsets = [0, 16], sizes = [17, 8], strides = [1, 1]} : vector<34x96xf32> to vector<17x8xf32>
    %cst_24 = arith.constant 0.353553385 : f32
    %64 = vector.broadcast %cst_24 : f32 to vector<17x8xf32>
    %65 = arith.mulf %63, %64 : vector<17x8xf32>
    %66 = vector.extract_strided_slice %11 {offsets = [0, 48], sizes = [17, 8], strides = [1, 1]} : vector<34x96xf32> to vector<17x8xf32>
    %67 = vector.extract_strided_slice %11 {offsets = [0, 80], sizes = [17, 8], strides = [1, 1]} : vector<34x96xf32> to vector<17x8xf32>
    %68 = arith.truncf %65 : vector<17x8xf32> to vector<17x8xbf16>
    %69 = arith.truncf %66 : vector<17x8xf32> to vector<17x8xbf16>
    %cst_25 = arith.constant dense<0.000000e+00> : vector<17x17xf32>
    %70 = tpu.matmul %68, %69, %cst_25 {dimension_numbers = #tpu.dot_dimension_numbers<[1], [1], [0], [0], [0, 0, 1, 0], [], []>} : vector<17x8xbf16>, vector<17x8xbf16>, vector<17x17xf32> -> vector<17x17xf32>
    %cst_26 = arith.constant dense<0xFF800000> : vector<17xf32>
    %71 = vector.multi_reduction <maximumf>, %70, %cst_26 [1] : vector<17x17xf32> to vector<17xf32>
    %72 = vector.shape_cast %71 : vector<17xf32> to vector<17x1xf32>
    %73 = vector.broadcast %72 : vector<17x1xf32> to vector<17x17xf32>
    %74 = arith.subf %70, %73 : vector<17x17xf32>
    %75 = math.exp %74 : vector<17x17xf32>
    %cst_27 = arith.constant dense<0.000000e+00> : vector<17xf32>
    %76 = vector.multi_reduction <add>, %75, %cst_27 [1] : vector<17x17xf32> to vector<17xf32>
    %77 = vector.shape_cast %76 : vector<17xf32> to vector<17x1xf32>
    %78 = vector.broadcast %77 : vector<17x1xf32> to vector<17x17xf32>
    %79 = arith.divf %75, %78 : vector<17x17xf32>
    %80 = arith.truncf %79 : vector<17x17xf32> to vector<17x17xbf16>
    %81 = arith.truncf %67 : vector<17x8xf32> to vector<17x8xbf16>
    %cst_28 = arith.constant dense<0.000000e+00> : vector<17x8xf32>
    %82 = tpu.matmul %80, %81, %cst_28 {dimension_numbers = #tpu.dot_dimension_numbers<[1], [0], [0], [1], [0, 0, 1, 1], [], []>} : vector<17x17xbf16>, vector<17x8xbf16>, vector<17x8xf32> -> vector<17x8xf32>
    %83 = arith.truncf %82 : vector<17x8xf32> to vector<17x8xbf16>
    %84 = vector.extract_strided_slice %13 {offsets = [16, 0], sizes = [8, 32], strides = [1, 1]} : vector<32x32xbf16> to vector<8x32xbf16>
    %cst_29 = arith.constant dense<0.000000e+00> : vector<17x32xf32>
    %85 = tpu.matmul %83, %84, %cst_29 {dimension_numbers = #tpu.dot_dimension_numbers<[1], [0], [0], [1], [0, 0, 1, 1], [], []>} : vector<17x8xbf16>, vector<8x32xbf16>, vector<17x32xf32> -> vector<17x32xf32>
    %86 = arith.addf %62, %85 : vector<17x32xf32>
    %87 = vector.extract_strided_slice %11 {offsets = [0, 24], sizes = [17, 8], strides = [1, 1]} : vector<34x96xf32> to vector<17x8xf32>
    %cst_30 = arith.constant 0.353553385 : f32
    %88 = vector.broadcast %cst_30 : f32 to vector<17x8xf32>
    %89 = arith.mulf %87, %88 : vector<17x8xf32>
    %90 = vector.extract_strided_slice %11 {offsets = [0, 56], sizes = [17, 8], strides = [1, 1]} : vector<34x96xf32> to vector<17x8xf32>
    %91 = vector.extract_strided_slice %11 {offsets = [0, 88], sizes = [17, 8], strides = [1, 1]} : vector<34x96xf32> to vector<17x8xf32>
    %92 = arith.truncf %89 : vector<17x8xf32> to vector<17x8xbf16>
    %93 = arith.truncf %90 : vector<17x8xf32> to vector<17x8xbf16>
    %cst_31 = arith.constant dense<0.000000e+00> : vector<17x17xf32>
    %94 = tpu.matmul %92, %93, %cst_31 {dimension_numbers = #tpu.dot_dimension_numbers<[1], [1], [0], [0], [0, 0, 1, 0], [], []>} : vector<17x8xbf16>, vector<17x8xbf16>, vector<17x17xf32> -> vector<17x17xf32>
    %cst_32 = arith.constant dense<0xFF800000> : vector<17xf32>
    %95 = vector.multi_reduction <maximumf>, %94, %cst_32 [1] : vector<17x17xf32> to vector<17xf32>
    %96 = vector.shape_cast %95 : vector<17xf32> to vector<17x1xf32>
    %97 = vector.broadcast %96 : vector<17x1xf32> to vector<17x17xf32>
    %98 = arith.subf %94, %97 : vector<17x17xf32>
    %99 = math.exp %98 : vector<17x17xf32>
    %cst_33 = arith.constant dense<0.000000e+00> : vector<17xf32>
    %100 = vector.multi_reduction <add>, %99, %cst_33 [1] : vector<17x17xf32> to vector<17xf32>
    %101 = vector.shape_cast %100 : vector<17xf32> to vector<17x1xf32>
    %102 = vector.broadcast %101 : vector<17x1xf32> to vector<17x17xf32>
    %103 = arith.divf %99, %102 : vector<17x17xf32>
    %104 = arith.truncf %103 : vector<17x17xf32> to vector<17x17xbf16>
    %105 = arith.truncf %91 : vector<17x8xf32> to vector<17x8xbf16>
    %cst_34 = arith.constant dense<0.000000e+00> : vector<17x8xf32>
    %106 = tpu.matmul %104, %105, %cst_34 {dimension_numbers = #tpu.dot_dimension_numbers<[1], [0], [0], [1], [0, 0, 1, 1], [], []>} : vector<17x17xbf16>, vector<17x8xbf16>, vector<17x8xf32> -> vector<17x8xf32>
    %107 = arith.truncf %106 : vector<17x8xf32> to vector<17x8xbf16>
    %108 = vector.extract_strided_slice %13 {offsets = [24, 0], sizes = [8, 32], strides = [1, 1]} : vector<32x32xbf16> to vector<8x32xbf16>
    %cst_35 = arith.constant dense<0.000000e+00> : vector<17x32xf32>
    %109 = tpu.matmul %107, %108, %cst_35 {dimension_numbers = #tpu.dot_dimension_numbers<[1], [0], [0], [1], [0, 0, 1, 1], [], []>} : vector<17x8xbf16>, vector<8x32xbf16>, vector<17x32xf32> -> vector<17x32xf32>
    %110 = arith.addf %86, %109 : vector<17x32xf32>
    %cst_36 = arith.constant 0.000000e+00 : f32
    %111 = vector.broadcast %cst_36 : f32 to vector<17x32xf32>
    %112 = vector.extract_strided_slice %11 {offsets = [17, 0], sizes = [17, 8], strides = [1, 1]} : vector<34x96xf32> to vector<17x8xf32>
    %cst_37 = arith.constant 0.353553385 : f32
    %113 = vector.broadcast %cst_37 : f32 to vector<17x8xf32>
    %114 = arith.mulf %112, %113 : vector<17x8xf32>
    %115 = vector.extract_strided_slice %11 {offsets = [17, 32], sizes = [17, 8], strides = [1, 1]} : vector<34x96xf32> to vector<17x8xf32>
    %116 = vector.extract_strided_slice %11 {offsets = [17, 64], sizes = [17, 8], strides = [1, 1]} : vector<34x96xf32> to vector<17x8xf32>
    %117 = arith.truncf %114 : vector<17x8xf32> to vector<17x8xbf16>
    %118 = arith.truncf %115 : vector<17x8xf32> to vector<17x8xbf16>
    %cst_38 = arith.constant dense<0.000000e+00> : vector<17x17xf32>
    %119 = tpu.matmul %117, %118, %cst_38 {dimension_numbers = #tpu.dot_dimension_numbers<[1], [1], [0], [0], [0, 0, 1, 0], [], []>} : vector<17x8xbf16>, vector<17x8xbf16>, vector<17x17xf32> -> vector<17x17xf32>
    %cst_39 = arith.constant dense<0xFF800000> : vector<17xf32>
    %120 = vector.multi_reduction <maximumf>, %119, %cst_39 [1] : vector<17x17xf32> to vector<17xf32>
    %121 = vector.shape_cast %120 : vector<17xf32> to vector<17x1xf32>
    %122 = vector.broadcast %121 : vector<17x1xf32> to vector<17x17xf32>
    %123 = arith.subf %119, %122 : vector<17x17xf32>
    %124 = math.exp %123 : vector<17x17xf32>
    %cst_40 = arith.constant dense<0.000000e+00> : vector<17xf32>
    %125 = vector.multi_reduction <add>, %124, %cst_40 [1] : vector<17x17xf32> to vector<17xf32>
    %126 = vector.shape_cast %125 : vector<17xf32> to vector<17x1xf32>
    %127 = vector.broadcast %126 : vector<17x1xf32> to vector<17x17xf32>
    %128 = arith.divf %124, %127 : vector<17x17xf32>
    %129 = arith.truncf %128 : vector<17x17xf32> to vector<17x17xbf16>
    %130 = arith.truncf %116 : vector<17x8xf32> to vector<17x8xbf16>
    %cst_41 = arith.constant dense<0.000000e+00> : vector<17x8xf32>
    %131 = tpu.matmul %129, %130, %cst_41 {dimension_numbers = #tpu.dot_dimension_numbers<[1], [0], [0], [1], [0, 0, 1, 1], [], []>} : vector<17x17xbf16>, vector<17x8xbf16>, vector<17x8xf32> -> vector<17x8xf32>
    %132 = arith.truncf %131 : vector<17x8xf32> to vector<17x8xbf16>
    %133 = vector.extract_strided_slice %13 {offsets = [0, 0], sizes = [8, 32], strides = [1, 1]} : vector<32x32xbf16> to vector<8x32xbf16>
    %cst_42 = arith.constant dense<0.000000e+00> : vector<17x32xf32>
    %134 = tpu.matmul %132, %133, %cst_42 {dimension_numbers = #tpu.dot_dimension_numbers<[1], [0], [0], [1], [0, 0, 1, 1], [], []>} : vector<17x8xbf16>, vector<8x32xbf16>, vector<17x32xf32> -> vector<17x32xf32>
    %135 = arith.addf %111, %134 : vector<17x32xf32>
    %136 = vector.extract_strided_slice %11 {offsets = [17, 8], sizes = [17, 8], strides = [1, 1]} : vector<34x96xf32> to vector<17x8xf32>
    %cst_43 = arith.constant 0.353553385 : f32
    %137 = vector.broadcast %cst_43 : f32 to vector<17x8xf32>
    %138 = arith.mulf %136, %137 : vector<17x8xf32>
    %139 = vector.extract_strided_slice %11 {offsets = [17, 40], sizes = [17, 8], strides = [1, 1]} : vector<34x96xf32> to vector<17x8xf32>
    %140 = vector.extract_strided_slice %11 {offsets = [17, 72], sizes = [17, 8], strides = [1, 1]} : vector<34x96xf32> to vector<17x8xf32>
    %141 = arith.truncf %138 : vector<17x8xf32> to vector<17x8xbf16>
    %142 = arith.truncf %139 : vector<17x8xf32> to vector<17x8xbf16>
    %cst_44 = arith.constant dense<0.000000e+00> : vector<17x17xf32>
    %143 = tpu.matmul %141, %142, %cst_44 {dimension_numbers = #tpu.dot_dimension_numbers<[1], [1], [0], [0], [0, 0, 1, 0], [], []>} : vector<17x8xbf16>, vector<17x8xbf16>, vector<17x17xf32> -> vector<17x17xf32>
    %cst_45 = arith.constant dense<0xFF800000> : vector<17xf32>
    %144 = vector.multi_reduction <maximumf>, %143, %cst_45 [1] : vector<17x17xf32> to vector<17xf32>
    %145 = vector.shape_cast %144 : vector<17xf32> to vector<17x1xf32>
    %146 = vector.broadcast %145 : vector<17x1xf32> to vector<17x17xf32>
    %147 = arith.subf %143, %146 : vector<17x17xf32>
    %148 = math.exp %147 : vector<17x17xf32>
    %cst_46 = arith.constant dense<0.000000e+00> : vector<17xf32>
    %149 = vector.multi_reduction <add>, %148, %cst_46 [1] : vector<17x17xf32> to vector<17xf32>
    %150 = vector.shape_cast %149 : vector<17xf32> to vector<17x1xf32>
    %151 = vector.broadcast %150 : vector<17x1xf32> to vector<17x17xf32>
    %152 = arith.divf %148, %151 : vector<17x17xf32>
    %153 = arith.truncf %152 : vector<17x17xf32> to vector<17x17xbf16>
    %154 = arith.truncf %140 : vector<17x8xf32> to vector<17x8xbf16>
    %cst_47 = arith.constant dense<0.000000e+00> : vector<17x8xf32>
    %155 = tpu.matmul %153, %154, %cst_47 {dimension_numbers = #tpu.dot_dimension_numbers<[1], [0], [0], [1], [0, 0, 1, 1], [], []>} : vector<17x17xbf16>, vector<17x8xbf16>, vector<17x8xf32> -> vector<17x8xf32>
    %156 = arith.truncf %155 : vector<17x8xf32> to vector<17x8xbf16>
    %157 = vector.extract_strided_slice %13 {offsets = [8, 0], sizes = [8, 32], strides = [1, 1]} : vector<32x32xbf16> to vector<8x32xbf16>
    %cst_48 = arith.constant dense<0.000000e+00> : vector<17x32xf32>
    %158 = tpu.matmul %156, %157, %cst_48 {dimension_numbers = #tpu.dot_dimension_numbers<[1], [0], [0], [1], [0, 0, 1, 1], [], []>} : vector<17x8xbf16>, vector<8x32xbf16>, vector<17x32xf32> -> vector<17x32xf32>
    %159 = arith.addf %135, %158 : vector<17x32xf32>
    %160 = vector.extract_strided_slice %11 {offsets = [17, 16], sizes = [17, 8], strides = [1, 1]} : vector<34x96xf32> to vector<17x8xf32>
    %cst_49 = arith.constant 0.353553385 : f32
    %161 = vector.broadcast %cst_49 : f32 to vector<17x8xf32>
    %162 = arith.mulf %160, %161 : vector<17x8xf32>
    %163 = vector.extract_strided_slice %11 {offsets = [17, 48], sizes = [17, 8], strides = [1, 1]} : vector<34x96xf32> to vector<17x8xf32>
    %164 = vector.extract_strided_slice %11 {offsets = [17, 80], sizes = [17, 8], strides = [1, 1]} : vector<34x96xf32> to vector<17x8xf32>
    %165 = arith.truncf %162 : vector<17x8xf32> to vector<17x8xbf16>
    %166 = arith.truncf %163 : vector<17x8xf32> to vector<17x8xbf16>
    %cst_50 = arith.constant dense<0.000000e+00> : vector<17x17xf32>
    %167 = tpu.matmul %165, %166, %cst_50 {dimension_numbers = #tpu.dot_dimension_numbers<[1], [1], [0], [0], [0, 0, 1, 0], [], []>} : vector<17x8xbf16>, vector<17x8xbf16>, vector<17x17xf32> -> vector<17x17xf32>
    %cst_51 = arith.constant dense<0xFF800000> : vector<17xf32>
    %168 = vector.multi_reduction <maximumf>, %167, %cst_51 [1] : vector<17x17xf32> to vector<17xf32>
    %169 = vector.shape_cast %168 : vector<17xf32> to vector<17x1xf32>
    %170 = vector.broadcast %169 : vector<17x1xf32> to vector<17x17xf32>
    %171 = arith.subf %167, %170 : vector<17x17xf32>
    %172 = math.exp %171 : vector<17x17xf32>
    %cst_52 = arith.constant dense<0.000000e+00> : vector<17xf32>
    %173 = vector.multi_reduction <add>, %172, %cst_52 [1] : vector<17x17xf32> to vector<17xf32>
    %174 = vector.shape_cast %173 : vector<17xf32> to vector<17x1xf32>
    %175 = vector.broadcast %174 : vector<17x1xf32> to vector<17x17xf32>
    %176 = arith.divf %172, %175 : vector<17x17xf32>
    %177 = arith.truncf %176 : vector<17x17xf32> to vector<17x17xbf16>
    %178 = arith.truncf %164 : vector<17x8xf32> to vector<17x8xbf16>
    %cst_53 = arith.constant dense<0.000000e+00> : vector<17x8xf32>
    %179 = tpu.matmul %177, %178, %cst_53 {dimension_numbers = #tpu.dot_dimension_numbers<[1], [0], [0], [1], [0, 0, 1, 1], [], []>} : vector<17x17xbf16>, vector<17x8xbf16>, vector<17x8xf32> -> vector<17x8xf32>
    %180 = arith.truncf %179 : vector<17x8xf32> to vector<17x8xbf16>
    %181 = vector.extract_strided_slice %13 {offsets = [16, 0], sizes = [8, 32], strides = [1, 1]} : vector<32x32xbf16> to vector<8x32xbf16>
    %cst_54 = arith.constant dense<0.000000e+00> : vector<17x32xf32>
    %182 = tpu.matmul %180, %181, %cst_54 {dimension_numbers = #tpu.dot_dimension_numbers<[1], [0], [0], [1], [0, 0, 1, 1], [], []>} : vector<17x8xbf16>, vector<8x32xbf16>, vector<17x32xf32> -> vector<17x32xf32>
    %183 = arith.addf %159, %182 : vector<17x32xf32>
    %184 = vector.extract_strided_slice %11 {offsets = [17, 24], sizes = [17, 8], strides = [1, 1]} : vector<34x96xf32> to vector<17x8xf32>
    %cst_55 = arith.constant 0.353553385 : f32
    %185 = vector.broadcast %cst_55 : f32 to vector<17x8xf32>
    %186 = arith.mulf %184, %185 : vector<17x8xf32>
    %187 = vector.extract_strided_slice %11 {offsets = [17, 56], sizes = [17, 8], strides = [1, 1]} : vector<34x96xf32> to vector<17x8xf32>
    %188 = vector.extract_strided_slice %11 {offsets = [17, 88], sizes = [17, 8], strides = [1, 1]} : vector<34x96xf32> to vector<17x8xf32>
    %189 = arith.truncf %186 : vector<17x8xf32> to vector<17x8xbf16>
    %190 = arith.truncf %187 : vector<17x8xf32> to vector<17x8xbf16>
    %cst_56 = arith.constant dense<0.000000e+00> : vector<17x17xf32>
    %191 = tpu.matmul %189, %190, %cst_56 {dimension_numbers = #tpu.dot_dimension_numbers<[1], [1], [0], [0], [0, 0, 1, 0], [], []>} : vector<17x8xbf16>, vector<17x8xbf16>, vector<17x17xf32> -> vector<17x17xf32>
    %cst_57 = arith.constant dense<0xFF800000> : vector<17xf32>
    %192 = vector.multi_reduction <maximumf>, %191, %cst_57 [1] : vector<17x17xf32> to vector<17xf32>
    %193 = vector.shape_cast %192 : vector<17xf32> to vector<17x1xf32>
    %194 = vector.broadcast %193 : vector<17x1xf32> to vector<17x17xf32>
    %195 = arith.subf %191, %194 : vector<17x17xf32>
    %196 = math.exp %195 : vector<17x17xf32>
    %cst_58 = arith.constant dense<0.000000e+00> : vector<17xf32>
    %197 = vector.multi_reduction <add>, %196, %cst_58 [1] : vector<17x17xf32> to vector<17xf32>
    %198 = vector.shape_cast %197 : vector<17xf32> to vector<17x1xf32>
    %199 = vector.broadcast %198 : vector<17x1xf32> to vector<17x17xf32>
    %200 = arith.divf %196, %199 : vector<17x17xf32>
    %201 = arith.truncf %200 : vector<17x17xf32> to vector<17x17xbf16>
    %202 = arith.truncf %188 : vector<17x8xf32> to vector<17x8xbf16>
    %cst_59 = arith.constant dense<0.000000e+00> : vector<17x8xf32>
    %203 = tpu.matmul %201, %202, %cst_59 {dimension_numbers = #tpu.dot_dimension_numbers<[1], [0], [0], [1], [0, 0, 1, 1], [], []>} : vector<17x17xbf16>, vector<17x8xbf16>, vector<17x8xf32> -> vector<17x8xf32>
    %204 = arith.truncf %203 : vector<17x8xf32> to vector<17x8xbf16>
    %205 = vector.extract_strided_slice %13 {offsets = [24, 0], sizes = [8, 32], strides = [1, 1]} : vector<32x32xbf16> to vector<8x32xbf16>
    %cst_60 = arith.constant dense<0.000000e+00> : vector<17x32xf32>
    %206 = tpu.matmul %204, %205, %cst_60 {dimension_numbers = #tpu.dot_dimension_numbers<[1], [0], [0], [1], [0, 0, 1, 1], [], []>} : vector<17x8xbf16>, vector<8x32xbf16>, vector<17x32xf32> -> vector<17x32xf32>
    %207 = arith.addf %183, %206 : vector<17x32xf32>
    %208 = tpu.concatenate %110, %207 in 0 : vector<17x32xf32>, vector<17x32xf32> -> vector<34x32xf32>
    %c0_61 = arith.constant 0 : index
    %c0_62 = arith.constant 0 : index
    %c0_63 = arith.constant 0 : index
    %209 = vector.load %arg6[%c0_61, %c0_62, %c0_63] : memref<1x1x32xf32, #tpu.memory_space<vmem>>, vector<1x1x32xf32>
    %210 = vector.shape_cast %209 : vector<1x1x32xf32> to vector<1x32xf32>
    %211 = vector.broadcast %210 : vector<1x32xf32> to vector<34x32xf32>
    %212 = arith.addf %208, %211 : vector<34x32xf32>
    %213 = arith.addf %3, %212 : vector<34x32xf32>
    %cst_64 = arith.constant dense<0.000000e+00> : vector<34xf32>
    %214 = vector.multi_reduction <add>, %213, %cst_64 [1] : vector<34x32xf32> to vector<34xf32>
    %215 = vector.shape_cast %214 : vector<34xf32> to vector<34x1xf32>
    %cst_65 = arith.constant 3.200000e+01 : f32
    %216 = vector.broadcast %cst_65 : f32 to vector<34x1xf32>
    %217 = arith.divf %215, %216 : vector<34x1xf32>
    %218 = vector.broadcast %217 : vector<34x1xf32> to vector<34x32xf32>
    %219 = arith.subf %213, %218 : vector<34x32xf32>
    %220 = arith.mulf %219, %219 : vector<34x32xf32>
    %cst_66 = arith.constant dense<0.000000e+00> : vector<34xf32>
    %221 = vector.multi_reduction <add>, %220, %cst_66 [1] : vector<34x32xf32> to vector<34xf32>
    %222 = vector.shape_cast %221 : vector<34xf32> to vector<34x1xf32>
    %cst_67 = arith.constant 3.200000e+01 : f32
    %223 = vector.broadcast %cst_67 : f32 to vector<34x1xf32>
    %224 = arith.divf %222, %223 : vector<34x1xf32>
    %225 = vector.broadcast %217 : vector<34x1xf32> to vector<34x32xf32>
    %226 = arith.subf %213, %225 : vector<34x32xf32>
    %cst_68 = arith.constant 9.99999974E-6 : f32
    %227 = vector.broadcast %cst_68 : f32 to vector<34x1xf32>
    %228 = arith.addf %224, %227 : vector<34x1xf32>
    %229 = math.rsqrt %228 : vector<34x1xf32>
    %230 = vector.broadcast %229 : vector<34x1xf32> to vector<34x32xf32>
    %231 = arith.mulf %226, %230 : vector<34x32xf32>
    %c0_69 = arith.constant 0 : index
    %c0_70 = arith.constant 0 : index
    %c0_71 = arith.constant 0 : index
    %232 = vector.load %arg7[%c0_69, %c0_70, %c0_71] : memref<1x1x32xf32, #tpu.memory_space<vmem>>, vector<1x1x32xf32>
    %233 = vector.shape_cast %232 : vector<1x1x32xf32> to vector<1x32xf32>
    %234 = vector.broadcast %233 : vector<1x32xf32> to vector<34x32xf32>
    %235 = arith.mulf %231, %234 : vector<34x32xf32>
    %c0_72 = arith.constant 0 : index
    %c0_73 = arith.constant 0 : index
    %c0_74 = arith.constant 0 : index
    %236 = vector.load %arg8[%c0_72, %c0_73, %c0_74] : memref<1x1x32xf32, #tpu.memory_space<vmem>>, vector<1x1x32xf32>
    %237 = vector.shape_cast %236 : vector<1x1x32xf32> to vector<1x32xf32>
    %238 = vector.broadcast %237 : vector<1x32xf32> to vector<34x32xf32>
    %239 = arith.addf %235, %238 : vector<34x32xf32>
    %c0_75 = arith.constant 0 : index
    %c0_76 = arith.constant 0 : index
    %240 = vector.load %arg2[%c0_75, %c0_76] : memref<2x32xf32, #tpu.memory_space<vmem>>, vector<2x32xf32>
    %241 = arith.truncf %240 : vector<2x32xf32> to vector<2x32xbf16>
    %c0_77 = arith.constant 0 : index
    %c0_78 = arith.constant 0 : index
    %c0_79 = arith.constant 0 : index
    %242 = vector.load %arg13[%c0_77, %c0_78, %c0_79] : memref<1x32x32xbf16, #tpu.memory_space<vmem>>, vector<1x32x32xbf16>
    %243 = vector.shape_cast %242 : vector<1x32x32xbf16> to vector<32x32xbf16>
    %cst_80 = arith.constant dense<0.000000e+00> : vector<2x32xf32>
    %244 = tpu.matmul %241, %243, %cst_80 {dimension_numbers = #tpu.dot_dimension_numbers<[1], [0], [0], [1], [0, 0, 1, 1], [], []>} : vector<2x32xbf16>, vector<32x32xbf16>, vector<2x32xf32> -> vector<2x32xf32>
    %c0_81 = arith.constant 0 : index
    %c0_82 = arith.constant 0 : index
    %c0_83 = arith.constant 0 : index
    %245 = vector.load %arg14[%c0_81, %c0_82, %c0_83] : memref<1x1x32xf32, #tpu.memory_space<vmem>>, vector<1x1x32xf32>
    %246 = vector.shape_cast %245 : vector<1x1x32xf32> to vector<1x32xf32>
    %247 = vector.broadcast %246 : vector<1x32xf32> to vector<2x32xf32>
    %248 = arith.addf %244, %247 : vector<2x32xf32>
    %249 = arith.truncf %240 : vector<2x32xf32> to vector<2x32xbf16>
    %c0_84 = arith.constant 0 : index
    %c0_85 = arith.constant 0 : index
    %c0_86 = arith.constant 0 : index
    %250 = vector.load %arg15[%c0_84, %c0_85, %c0_86] : memref<1x32x32xbf16, #tpu.memory_space<vmem>>, vector<1x32x32xbf16>
    %251 = vector.shape_cast %250 : vector<1x32x32xbf16> to vector<32x32xbf16>
    %cst_87 = arith.constant dense<0.000000e+00> : vector<2x32xf32>
    %252 = tpu.matmul %249, %251, %cst_87 {dimension_numbers = #tpu.dot_dimension_numbers<[1], [0], [0], [1], [0, 0, 1, 1], [], []>} : vector<2x32xbf16>, vector<32x32xbf16>, vector<2x32xf32> -> vector<2x32xf32>
    %c0_88 = arith.constant 0 : index
    %c0_89 = arith.constant 0 : index
    %c0_90 = arith.constant 0 : index
    %253 = vector.load %arg16[%c0_88, %c0_89, %c0_90] : memref<1x1x32xf32, #tpu.memory_space<vmem>>, vector<1x1x32xf32>
    %254 = vector.shape_cast %253 : vector<1x1x32xf32> to vector<1x32xf32>
    %255 = vector.broadcast %254 : vector<1x32xf32> to vector<2x32xf32>
    %256 = arith.addf %252, %255 : vector<2x32xf32>
    %257 = arith.truncf %239 : vector<34x32xf32> to vector<34x32xbf16>
    %c0_91 = arith.constant 0 : index
    %c0_92 = arith.constant 0 : index
    %c0_93 = arith.constant 0 : index
    %258 = vector.load %arg9[%c0_91, %c0_92, %c0_93] : memref<1x32x128xbf16, #tpu.memory_space<vmem>>, vector<1x32x128xbf16>
    %259 = vector.shape_cast %258 : vector<1x32x128xbf16> to vector<32x128xbf16>
    %cst_94 = arith.constant dense<0.000000e+00> : vector<34x128xf32>
    %260 = tpu.matmul %257, %259, %cst_94 {dimension_numbers = #tpu.dot_dimension_numbers<[1], [0], [0], [1], [0, 0, 1, 1], [], []>} : vector<34x32xbf16>, vector<32x128xbf16>, vector<34x128xf32> -> vector<34x128xf32>
    %c0_95 = arith.constant 0 : index
    %c0_96 = arith.constant 0 : index
    %c0_97 = arith.constant 0 : index
    %261 = vector.load %arg10[%c0_95, %c0_96, %c0_97] : memref<1x1x128xf32, #tpu.memory_space<vmem>>, vector<1x1x128xf32>
    %262 = vector.shape_cast %261 : vector<1x1x128xf32> to vector<1x128xf32>
    %263 = vector.broadcast %262 : vector<1x128xf32> to vector<34x128xf32>
    %264 = arith.addf %260, %263 : vector<34x128xf32>
    %cst_98 = arith.constant 5.000000e-01 : f32
    %265 = vector.broadcast %cst_98 : f32 to vector<34x128xf32>
    %266 = arith.mulf %265, %264 : vector<34x128xf32>
    %cst_99 = arith.constant 4.471500e-02 : f32
    %267 = vector.broadcast %cst_99 : f32 to vector<34x128xf32>
    %268 = arith.mulf %267, %264 : vector<34x128xf32>
    %269 = arith.mulf %268, %264 : vector<34x128xf32>
    %270 = arith.mulf %269, %264 : vector<34x128xf32>
    %271 = arith.addf %264, %270 : vector<34x128xf32>
    %cst_100 = arith.constant 0.797884583 : f32
    %272 = vector.broadcast %cst_100 : f32 to vector<34x128xf32>
    %273 = arith.mulf %272, %271 : vector<34x128xf32>
    %274 = math.tanh %273 : vector<34x128xf32>
    %cst_101 = arith.constant 1.000000e+00 : f32
    %275 = vector.broadcast %cst_101 : f32 to vector<34x128xf32>
    %276 = arith.addf %275, %274 : vector<34x128xf32>
    %277 = arith.mulf %266, %276 : vector<34x128xf32>
    %278 = arith.truncf %277 : vector<34x128xf32> to vector<34x128xbf16>
    %c0_102 = arith.constant 0 : index
    %c0_103 = arith.constant 0 : index
    %c0_104 = arith.constant 0 : index
    %279 = vector.load %arg11[%c0_102, %c0_103, %c0_104] : memref<1x128x32xbf16, #tpu.memory_space<vmem>>, vector<1x128x32xbf16>
    %280 = vector.shape_cast %279 : vector<1x128x32xbf16> to vector<128x32xbf16>
    %cst_105 = arith.constant dense<0.000000e+00> : vector<34x32xf32>
    %281 = tpu.matmul %278, %280, %cst_105 {dimension_numbers = #tpu.dot_dimension_numbers<[1], [0], [0], [1], [0, 0, 1, 1], [], []>} : vector<34x128xbf16>, vector<128x32xbf16>, vector<34x32xf32> -> vector<34x32xf32>
    %c0_106 = arith.constant 0 : index
    %c0_107 = arith.constant 0 : index
    %c0_108 = arith.constant 0 : index
    %282 = vector.load %arg12[%c0_106, %c0_107, %c0_108] : memref<1x1x32xf32, #tpu.memory_space<vmem>>, vector<1x1x32xf32>
    %283 = vector.shape_cast %282 : vector<1x1x32xf32> to vector<1x32xf32>
    %284 = vector.broadcast %283 : vector<1x32xf32> to vector<34x32xf32>
    %285 = arith.addf %281, %284 : vector<34x32xf32>
    %286 = vector.extract_strided_slice %248 {offsets = [0, 0], sizes = [1, 32], strides = [1, 1]} : vector<2x32xf32> to vector<1x32xf32>
    %287 = vector.shape_cast %286 : vector<1x32xf32> to vector<1x32xf32>
    %288 = vector.broadcast %287 : vector<1x32xf32> to vector<17x32xf32>
    %289 = vector.extract_strided_slice %248 {offsets = [1, 0], sizes = [1, 32], strides = [1, 1]} : vector<2x32xf32> to vector<1x32xf32>
    %290 = vector.shape_cast %289 : vector<1x32xf32> to vector<1x32xf32>
    %291 = vector.broadcast %290 : vector<1x32xf32> to vector<17x32xf32>
    %292 = tpu.concatenate %288, %291 in 0 : vector<17x32xf32>, vector<17x32xf32> -> vector<34x32xf32>
    %293 = vector.extract_strided_slice %256 {offsets = [0, 0], sizes = [1, 32], strides = [1, 1]} : vector<2x32xf32> to vector<1x32xf32>
    %294 = vector.shape_cast %293 : vector<1x32xf32> to vector<1x32xf32>
    %295 = vector.broadcast %294 : vector<1x32xf32> to vector<17x32xf32>
    %296 = vector.extract_strided_slice %256 {offsets = [1, 0], sizes = [1, 32], strides = [1, 1]} : vector<2x32xf32> to vector<1x32xf32>
    %297 = vector.shape_cast %296 : vector<1x32xf32> to vector<1x32xf32>
    %298 = vector.broadcast %297 : vector<1x32xf32> to vector<17x32xf32>
    %299 = tpu.concatenate %295, %298 in 0 : vector<17x32xf32>, vector<17x32xf32> -> vector<34x32xf32>
    %300 = arith.mulf %292, %285 : vector<34x32xf32>
    %301 = arith.addf %239, %300 : vector<34x32xf32>
    %302 = arith.addf %301, %299 : vector<34x32xf32>
    %cst_109 = arith.constant dense<0.000000e+00> : vector<34xf32>
    %303 = vector.multi_reduction <add>, %302, %cst_109 [1] : vector<34x32xf32> to vector<34xf32>
    %304 = vector.shape_cast %303 : vector<34xf32> to vector<34x1xf32>
    %cst_110 = arith.constant 3.200000e+01 : f32
    %305 = vector.broadcast %cst_110 : f32 to vector<34x1xf32>
    %306 = arith.divf %304, %305 : vector<34x1xf32>
    %307 = vector.broadcast %306 : vector<34x1xf32> to vector<34x32xf32>
    %308 = arith.subf %302, %307 : vector<34x32xf32>
    %309 = arith.mulf %308, %308 : vector<34x32xf32>
    %cst_111 = arith.constant dense<0.000000e+00> : vector<34xf32>
    %310 = vector.multi_reduction <add>, %309, %cst_111 [1] : vector<34x32xf32> to vector<34xf32>
    %311 = vector.shape_cast %310 : vector<34xf32> to vector<34x1xf32>
    %cst_112 = arith.constant 3.200000e+01 : f32
    %312 = vector.broadcast %cst_112 : f32 to vector<34x1xf32>
    %313 = arith.divf %311, %312 : vector<34x1xf32>
    %314 = vector.broadcast %306 : vector<34x1xf32> to vector<34x32xf32>
    %315 = arith.subf %302, %314 : vector<34x32xf32>
    %cst_113 = arith.constant 9.99999974E-6 : f32
    %316 = vector.broadcast %cst_113 : f32 to vector<34x1xf32>
    %317 = arith.addf %313, %316 : vector<34x1xf32>
    %318 = math.rsqrt %317 : vector<34x1xf32>
    %319 = vector.broadcast %318 : vector<34x1xf32> to vector<34x32xf32>
    %320 = arith.mulf %315, %319 : vector<34x32xf32>
    %c0_114 = arith.constant 0 : index
    %c0_115 = arith.constant 0 : index
    %c0_116 = arith.constant 0 : index
    %321 = vector.load %arg17[%c0_114, %c0_115, %c0_116] : memref<1x1x32xf32, #tpu.memory_space<vmem>>, vector<1x1x32xf32>
    %322 = vector.shape_cast %321 : vector<1x1x32xf32> to vector<1x32xf32>
    %323 = vector.broadcast %322 : vector<1x32xf32> to vector<34x32xf32>
    %324 = arith.mulf %320, %323 : vector<34x32xf32>
    %c0_117 = arith.constant 0 : index
    %c0_118 = arith.constant 0 : index
    %c0_119 = arith.constant 0 : index
    %325 = vector.load %arg18[%c0_117, %c0_118, %c0_119] : memref<1x1x32xf32, #tpu.memory_space<vmem>>, vector<1x1x32xf32>
    %326 = vector.shape_cast %325 : vector<1x1x32xf32> to vector<1x32xf32>
    %327 = vector.broadcast %326 : vector<1x32xf32> to vector<34x32xf32>
    %328 = arith.addf %324, %327 : vector<34x32xf32>
    %c0_120 = arith.constant 0 : index
    %c0_121 = arith.constant 0 : index
    %329 = vector.load %arg19[%c0_120, %c0_121] : memref<34x32xf32, #tpu.memory_space<vmem>>, vector<34x32xf32>
    tpu.vector_store %arg19[%c0_120, %c0_121], %328 {strides = array<i32>} : memref<34x32xf32, #tpu.memory_space<vmem>>, vector<34x32xf32>,
    return
  }
  func.func @transform_0(%arg0: i32) -> (i32, i32) {
    %c0_i32 = arith.constant 0 : i32
    %c0_i32_0 = arith.constant 0 : i32
    %c0_i32_1 = arith.constant 0 : i32
    return %c0_i32, %c0_i32_0 : i32, i32
  }
  func.func @transform_1(%arg0: i32) -> (i32, i32) {
    %c0_i32 = arith.constant 0 : i32
    %c0_i32_0 = arith.constant 0 : i32
    %c0_i32_1 = arith.constant 0 : i32
    return %c0_i32, %c0_i32_0 : i32, i32
  }
  func.func @transform_2(%arg0: i32) -> (i32, i32, i32) {
    %c0_i32 = arith.constant 0 : i32
    %c0_i32_0 = arith.constant 0 : i32
    %c0_i32_1 = arith.constant 0 : i32
    return %arg0, %c0_i32, %c0_i32_0 : i32, i32, i32
  }
  func.func @transform_3(%arg0: i32) -> (i32, i32, i32) {
    %c0_i32 = arith.constant 0 : i32
    %c0_i32_0 = arith.constant 0 : i32
    %c0_i32_1 = arith.constant 0 : i32
    return %arg0, %c0_i32, %c0_i32_0 : i32, i32, i32
  }
  func.func @transform_4(%arg0: i32) -> (i32, i32, i32) {
    %c0_i32 = arith.constant 0 : i32
    %c0_i32_0 = arith.constant 0 : i32
    %c0_i32_1 = arith.constant 0 : i32
    return %arg0, %c0_i32, %c0_i32_0 : i32, i32, i32
  }
  func.func @transform_5(%arg0: i32) -> (i32, i32, i32) {
    %c0_i32 = arith.constant 0 : i32
    %c0_i32_0 = arith.constant 0 : i32
    %c0_i32_1 = arith.constant 0 : i32
    return %arg0, %c0_i32, %c0_i32_0 : i32, i32, i32
  }
  func.func @transform_6(%arg0: i32) -> (i32, i32, i32) {
    %c0_i32 = arith.constant 0 : i32
    %c0_i32_0 = arith.constant 0 : i32
    %c0_i32_1 = arith.constant 0 : i32
    return %arg0, %c0_i32, %c0_i32_0 : i32, i32, i32
  }
  func.func @transform_7(%arg0: i32) -> (i32, i32, i32) {
    %c0_i32 = arith.constant 0 : i32
    %c0_i32_0 = arith.constant 0 : i32
    %c0_i32_1 = arith.constant 0 : i32
    return %arg0, %c0_i32, %c0_i32_0 : i32, i32, i32
  }
  func.func @transform_8(%arg0: i32) -> (i32, i32, i32) {
    %c0_i32 = arith.constant 0 : i32
    %c0_i32_0 = arith.constant 0 : i32
    %c0_i32_1 = arith.constant 0 : i32
    return %arg0, %c0_i32, %c0_i32_0 : i32, i32, i32
  }
  func.func @transform_9(%arg0: i32) -> (i32, i32, i32) {
    %c0_i32 = arith.constant 0 : i32
    %c0_i32_0 = arith.constant 0 : i32
    %c0_i32_1 = arith.constant 0 : i32
    return %arg0, %c0_i32, %c0_i32_0 : i32, i32, i32
  }
  func.func @transform_10(%arg0: i32) -> (i32, i32, i32) {
    %c0_i32 = arith.constant 0 : i32
    %c0_i32_0 = arith.constant 0 : i32
    %c0_i32_1 = arith.constant 0 : i32
    return %arg0, %c0_i32, %c0_i32_0 : i32, i32, i32
  }
  func.func @transform_11(%arg0: i32) -> (i32, i32, i32) {
    %c0_i32 = arith.constant 0 : i32
    %c0_i32_0 = arith.constant 0 : i32
    %c0_i32_1 = arith.constant 0 : i32
    return %arg0, %c0_i32, %c0_i32_0 : i32, i32, i32
  }
  func.func @transform_12(%arg0: i32) -> (i32, i32, i32) {
    %c0_i32 = arith.constant 0 : i32
    %c0_i32_0 = arith.constant 0 : i32
    %c0_i32_1 = arith.constant 0 : i32
    return %arg0, %c0_i32, %c0_i32_0 : i32, i32, i32
  }
  func.func @transform_13(%arg0: i32) -> (i32, i32, i32) {
    %c0_i32 = arith.constant 0 : i32
    %c0_i32_0 = arith.constant 0 : i32
    %c0_i32_1 = arith.constant 0 : i32
    return %arg0, %c0_i32, %c0_i32_0 : i32, i32, i32
  }
  func.func @transform_14(%arg0: i32) -> (i32, i32, i32) {
    %c0_i32 = arith.constant 0 : i32
    %c0_i32_0 = arith.constant 0 : i32
    %c0_i32_1 = arith.constant 0 : i32
    return %arg0, %c0_i32, %c0_i32_0 : i32, i32, i32
  }
  func.func @transform_15(%arg0: i32) -> (i32, i32, i32) {
    %c0_i32 = arith.constant 0 : i32
    %c0_i32_0 = arith.constant 0 : i32
    %c0_i32_1 = arith.constant 0 : i32
    return %arg0, %c0_i32, %c0_i32_0 : i32, i32, i32
  }
  func.func @transform_16(%arg0: i32) -> (i32, i32, i32) {
    %c0_i32 = arith.constant 0 : i32
    %c0_i32_0 = arith.constant 0 : i32
    %c0_i32_1 = arith.constant 0 : i32
    return %arg0, %c0_i32, %c0_i32_0 : i32, i32, i32
  }
  func.func @transform_17(%arg0: i32) -> (i32, i32, i32) {
    %c0_i32 = arith.constant 0 : i32
    %c0_i32_0 = arith.constant 0 : i32
    %c0_i32_1 = arith.constant 0 : i32
    return %arg0, %c0_i32, %c0_i32_0 : i32, i32, i32
  }
  func.func @transform_18(%arg0: i32) -> (i32, i32) {
    %c0_i32 = arith.constant 0 : i32
    %c0_i32_0 = arith.constant 0 : i32
    %c0_i32_1 = arith.constant 0 : i32
    return %c0_i32, %c0_i32_0 : i32, i32
  }
}

</mosaic_0001>

<bundles_post_ra>
// kernel: guided_mlmh_forward.2
= control target key start
LH: loop header
LB: loop body
LE: loop exit
PB: predicated region body
PF: predicated region fallthrough
CT: control target
= control target key end

     0   :  { %s2186_s0 = inlined_call_operand.vmem [shape: f32[8,2,16], index: 0, kind: input, shape index: {}]   ;;  %s2187_s1 = inlined_call_operand.vmem [shape: f32[2,16], index: 1, kind: input, shape index: {}]   ;;  %s2188_s2 = inlined_call_operand.vmem [shape: bf16[16,128], index: 2, kind: input, shape index: {}]   ;;  %s2189_s3 = inlined_call_operand.vmem [shape: bf16[32,128], index: 3, kind: input, shape index: {}]   ;;  %s2190_s4 = inlined_call_operand.vmem [shape: f32[1,128], index: 4, kind: input, shape index: {}]   ;;  %s2191_s5 = inlined_call_operand.vmem [shape: bf16[32,32], index: 5, kind: input, shape index: {}]   ;;  %s2192_s6 = inlined_call_operand.vmem [shape: f32[1,32], index: 6, kind: input, shape index: {}]   ;;  %s2193_s7 = inlined_call_operand.vmem [shape: bf16[16,128], index: 7, kind: input, shape index: {}]   ;;  %s2194_s8 = inlined_call_operand.vmem [shape: bf16[32,128], index: 8, kind: input, shape index: {}]   ;;  %s2195_s9 = inlined_call_operand.vmem [shape: f32[1,128], index: 9, kind: input, shape index: {}]   ;;  %s2196_s10 = inlined_call_operand.vmem [shape: bf16[32,24], index: 10, kind: input, shape index: {}]   ;;  %s2197_s11 = inlined_call_operand.vmem [shape: f32[1,24], index: 11, kind: input, shape index: {}]   ;;  %s2198_s12 = inlined_call_operand.vmem [shape: bf16[16,32], index: 12, kind: input, shape index: {}]   ;;  %s2199_s13 = inlined_call_operand.vmem [shape: f32[1,32], index: 13, kind: input, shape index: {}]   ;;  %s2200_s14 = inlined_call_operand.vmem [shape: bf16[16,16], index: 14, kind: input, shape index: {}]   ;;  %s2201_s15 = inlined_call_operand.vmem [shape: f32[1,16], index: 15, kind: input, shape index: {}]   ;;  %s2202_s16 = inlined_call_operand.hbm [shape: f32[2,32], index: 16, kind: output, shape index: {0}]   ;;  %s2203_s17 = inlined_call_operand.hbm [shape: f32[2,16], index: 17, kind: output, shape index: {1}]   ;;  %s2204_s18 = inlined_call_operand.vmem [shape: f32[2,32], index: 18, kind: output, shape index: {2}]   ;;  %s2205_s19 = inlined_call_operand.hbm [shape: f32[2,16], index: 19, kind: output, shape index: {3}]   ;;  %s2206_s20 = inlined_call_operand.hbm [shape: f32[16,24], index: 20, kind: output, shape index: {4}]  }
   0x1   :  { %2209 = sst [smem:[#allocation12_spill]] %s2186_s0 }
   0x2   :  { %2210 = sst [smem:[#allocation13_spill]] %s2187_s1 }
   0x3   :  { %2211 = sst [smem:[#allocation14_spill]] %s2188_s2 }
   0x4   :  { %2212 = sst [smem:[#allocation15_spill]] %s2189_s3 }
   0x5   :  { %2213 = sst [smem:[#allocation16_spill]] %s2190_s4 }
   0x6   :  { %26 = vsyncpa [#allocation3], 0 }
   0x7   :  { %27 = vsyncpa [#allocation5], 0  ;;  %s2214_s23 = sld [smem:[#allocation14_spill]]  ;;  %vm80_vm0 = vcmask 130048  }
   0x8   :  { %s2215_s25 = sld [smem:[#allocation15_spill]] }
   0x9   :  { %s2216_s27 = sld [smem:[#allocation12_spill]] }
   0xd   :  { %v1927_v0 = vld [vmem:[%s2214_s23] sm:$0xff] }
   0xe   :  { %v1932_v1 = vld [vmem:[%s2215_s25 + $0x8] sm:$0xff]  ;;  %v1940_v4 = vld [vmem:[%s2215_s25] sm:$0xff]  ;;  %91 = vmatpush.bf16.msra.mxu0 %v1927_v0  ;;  %177 = vmatpush.bf16.msra.mxu2 %v1927_v0 }
   0xf   :  { %v69_v2 = vld [vmem:[%s2216_s27] sm:$0x3]  ;;  %119 = vmatpush.bf16.msra.mxu1 %v1932_v1  ;;  %196 = vmatpush.bf16.msra.mxu3 %v1932_v1 }
  0x10   :  { %v70_v3 = vpack.c.bf16 %v69_v2, %v69_v2 }
  0x11   :  { %28 = vsyncpa [#allocation8], 0  ;;  %v1809_v5 = vmov 0   ;;  %s2217_s0 = sld [smem:[#allocation16_spill]]  ;;  %s1810_s21 = smov 64   ;;  %vm109_vm5 = vcmask 261120  }
  0x12   :  { %273 = vmatpush.bf16.msrb.mxu2 %v1932_v1  ;;  %254 = vmatpush.bf16.msrb.mxu0 %v1927_v0  ;;  %s1811_s1 = smov 32   ;;  %v1465_v33 = vld [vmem:[%s2216_s27 + $0x2] sm:$0x3]  ;;  %s2218_s2 = sld [smem:[#allocation13_spill]] }
  0x13   :  { %1455 = vmatmul.msk.bf16.vlgmr.msra.gmra.mxu0 %vm80_vm0, %v70_v3  ;;  %120 = vmatpush.bf16.msra.mxu1 %v1940_v4  ;;  %v166_v34 = vpack.c.bf16 %v1465_v33, %v1465_v33  ;;  %v1469_v3 = vld [vmem:[%s2216_s27 + $0x4] sm:$0x3]  ;;  %s1389_s23 = sshll.u32 %s2202_s16, 4  ;;  %s1816_s16 = smov [#allocation7]   ;;  %s1390_s23 = int_to_ptr.hbm [resolvable:$true] %s1389_s23 }
  0x14   :  { %197 = vmatpush.bf16.msra.mxu3 %v1940_v4  ;;  %s1421_s25 = sshll.u32 %s1816_s16, 4  ;;  %s1423_s28 = sshll.u32 %s2206_s20, 4  ;;  %s1422_s25 = int_to_ptr.vmem [resolvable:$true] %s1421_s25  ;;  %s1424_s28 = int_to_ptr.hbm [resolvable:$true] %s1423_s28 }
  0x15   :  { %1466 = vmatmul.msk.bf16.vlgmr.msra.gmra.mxu2 %vm80_vm0, %v166_v34 }
  0x16   :  { %408 = vmatpush.bf16.msra.mxu0 %v1927_v0  ;;  %274 = vmatpush.bf16.msrb.mxu2 %v1940_v4 }
  0x17   :  { %331 = vmatpush.bf16.msrb.mxu1 %v1927_v0  ;;  %v1961_v6 = vld [vmem:[%s2217_s0] ss:$0 sm:$0xff]  ;;  %s1400_s0 = sshll.u32 %s2203_s17, 4  ;;  %s1401_s0 = int_to_ptr.hbm [resolvable:$true] %s1400_s0 }
  0x18   :  { %350 = vmatpush.bf16.msrb.mxu3 %v1932_v1  ;;  %121 = vmatmul.bf16.vlgmr.msra.gmra.mxu1 %v1809_v5 }
  0x1a   :  { %427 = vmatpush.bf16.msra.mxu2 %v1932_v1 }
  0x1b   :  { %485 = vmatpush.bf16.msra.mxu1 %v1927_v0 }
  0x1c   :  { %351 = vmatpush.bf16.msrb.mxu3 %v1940_v4 }
  0x1e   :  { %428 = vmatpush.bf16.msra.mxu2 %v1940_v4 }
  0x90   :  { %v93_v7 = vpop.f32.mrf.mxu0 }
  0x91   :  { %v94_v8 = vadd.f32 %v1961_v6, %v93_v7  ;;  %v243_v7 = vpack.c.bf16 %v1469_v3, %v1469_v3 }
  0x93   :  { %1470 = vmatmul.msk.bf16.vlgmr.msrb.gmra.mxu0 %vm80_vm0, %v243_v7 }
  0x94   :  { %562 = vmatpush.bf16.msrb.mxu0 %v1927_v0 }
  0x95   :  { %v122_v9 = vpop.f32.mrf.mxu1 }
  0x96   :  { %v126_v10 = vadd.f32 %v122_v9, %v94_v8 }
  0x98   :  { %1577 = vtanh.f32 %v126_v10  ;;  %v95_v11 = vpop.f32.mrf.mxu0  ;;  %v1464_v14 = vmul.f32 -1.442695, %v126_v10  ;;  %v179_v38 = vpop.f32.mrf.mxu2 }
  0x99   :  { %v180_v41 = vadd.f32 %v1961_v6, %v179_v38  ;;  %v1473_v38 = vld [vmem:[%s2216_s27 + $0x6] sm:$0x3] }
  0x9a   :  { %1579 = vpow2.f32 %v1464_v14 }
  0x9d   :  { %v124_v12 = vpop.f32.mrf.mxu1 }
  0x9e   :  { %v1578_v13 = vpop.eup %1577 }
  0x9f   :  { %149 = vrot.lane.b32.xlu0 %v1578_v13, %s1810_s21 }
  0xa0   :  { %v1580_v15 = vpop.eup %1579  ;;  %v181_v39 = vpop.f32.mrf.mxu2 }
  0xa1   :  { %v130_v16 = vadd.f32 1.0, %v1580_v15  ;;  %v320_v39 = vpack.c.bf16 %v1473_v38, %v1473_v38 }
  0xa3   :  { %1581 = vrcp.f32 %v130_v16  ;;  %v142_v22 = vand.u32 2147483648, %v130_v16  ;;  %vm136_vm2 = vweird.f32 %v130_v16  ;;  %v140_v23 = vand.u32 2147483647, %v130_v16  ;;  %1474 = vmatmul.msk.bf16.vlgmr.msrb.gmra.mxu1 %vm80_vm0, %v320_v39 }
  0xa4   :  { %639 = vmatpush.bf16.msrb.mxu1 %v1927_v0 }
  0xa5   :  { %v143_v25 = vor.u32 1.1754944e-38, %v142_v22  ;;  %vm141_vm4 = vcmp.eq.f32.partialorder %v140_v23, 8.507059e+37 }
  0xa9   :  { %v1582_v17 = vpop.eup %1581 }
  0xaa   :  { %v132_v18 = vmul.f32 %v1582_v17, %v130_v16  ;;  %vm137_vm1 = vweird.f32 %v1582_v17 }
  0xab   :  { %vm138_vm3 = vmor %vm136_vm2, %vm137_vm1 }
  0xac   :  { %v133_v19 = vsub.f32 1.0, %v132_v18 }
  0xae   :  { %v134_v20 = vmul.f32 %v1582_v17, %v133_v19 }
  0xb0   :  { %v135_v21 = vadd.f32 %v1582_v17, %v134_v20 }
  0xb2   :  { %v139_v24 = vsel %vm138_vm3, %v1582_v17, %v135_v21 }
  0xb3   :  { %v144_v27 = vsel %vm141_vm4, %v143_v25, %v139_v24 }
  0xb4   :  { %v147_v29 = vmul.f32 0.0, %v144_v27 }
 0x110   :  { %v256_v11 = vpop.f32.mrf.mxu0 }
 0x111   :  { %v150_v26 = vpop.permute.xlu0 %149  ;;  %v257_v14 = vadd.f32 %v1961_v6, %v256_v11 }
 0x112   :  { %v152_v28 = vmul.f32 %v150_v26, %v144_v27 }
 0x114   :  { %154 = vrot.lane.b32.xlu0 %v152_v28, %s1811_s1 }
 0x118   :  { %v258_v12 = vpop.f32.mrf.mxu0 }
 0x186   :  { %v155_v30 = vpop.permute.xlu0 %154 }
 0x187   :  { %v157_v31 = vadd.f32 %v155_v30, %v147_v29 }
 0x189   :  { %1583 = vtanh.f32 %v157_v31 }
 0x18f   :  { %v1584_v32 = vpop.eup %1583 }
 0x190   :  { %160 = vrot.lane.b32.xlu1 %v1584_v32, %s1810_s21 }
 0x202   :  { %v161_v35 = vpop.permute.xlu1 %160 }
 0x203   :  { %v163_v36 = vmul.f32 %v161_v35, %v144_v27 }
 0x205   :  { %v183_v37 = vpack.c.bf16 %v163_v36, %v163_v36 }
 0x207   :  { %185 = vrot.lane.b32.xlu1 %v183_v37, %s1811_s1 }
 0x279   :  { %v186_v40 = vpop.permute.xlu1 %185 }
 0x27a   :  { %1467 = vmatmul.msk.bf16.vlgmr.msra.gmra.mxu3 %vm109_vm5, %v186_v40 }
 0x27b   :  { %504 = vmatpush.bf16.msra.mxu3 %v1932_v1 }
 0x27f   :  { %505 = vmatpush.bf16.msra.mxu3 %v1940_v4 }
 0x2fd   :  { %v199_v42 = vpop.f32.mrf.mxu3 }
 0x2fe   :  { %v203_v43 = vadd.f32 %v199_v42, %v180_v41 }
 0x300   :  { %1585 = vtanh.f32 %v203_v43  ;;  %v1468_v46 = vmul.f32 -1.442695, %v203_v43 }
 0x302   :  { %1587 = vpow2.f32 %v1468_v46 }
 0x305   :  { %v201_v44 = vpop.f32.mrf.mxu3 }
 0x306   :  { %v1586_v45 = vpop.eup %1585  ;;  %v333_v44 = vpop.f32.mrf.mxu1 }
 0x307   :  { %226 = vrot.lane.b32.xlu2 %v1586_v45, %s1810_s21  ;;  %v334_v46 = vadd.f32 %v1961_v6, %v333_v44 }
 0x308   :  { %v1588_v47 = vpop.eup %1587 }
 0x309   :  { %v207_v48 = vadd.f32 1.0, %v1588_v47 }
 0x30b   :  { %1589 = vrcp.f32 %v207_v48  ;;  %v219_v54 = vand.u32 2147483648, %v207_v48  ;;  %vm213_vm7 = vweird.f32 %v207_v48  ;;  %v217_v55 = vand.u32 2147483647, %v207_v48 }
 0x30d   :  { %v220_v57 = vor.u32 1.1754944e-38, %v219_v54  ;;  %vm218_vm9 = vcmp.eq.f32.partialorder %v217_v55, 8.507059e+37 }
 0x30e   :  { %v335_v45 = vpop.f32.mrf.mxu1 }
 0x311   :  { %v1590_v49 = vpop.eup %1589 }
 0x312   :  { %v209_v50 = vmul.f32 %v1590_v49, %v207_v48  ;;  %vm214_vm6 = vweird.f32 %v1590_v49 }
 0x313   :  { %vm215_vm8 = vmor %vm213_vm7, %vm214_vm6 }
 0x314   :  { %v210_v51 = vsub.f32 1.0, %v209_v50 }
 0x316   :  { %v211_v52 = vmul.f32 %v1590_v49, %v210_v51 }
 0x318   :  { %v212_v53 = vadd.f32 %v1590_v49, %v211_v52 }
 0x31a   :  { %v216_v56 = vsel %vm215_vm8, %v1590_v49, %v212_v53 }
 0x31b   :  { %v221_v59 = vsel %vm218_vm9, %v220_v57, %v216_v56 }
 0x31c   :  { %v224_v61 = vmul.f32 %v221_v59, %v157_v31 }
 0x361   :  { %v227_v58 = vpop.permute.xlu2 %226 }
 0x362   :  { %v229_v60 = vmul.f32 %v227_v58, %v221_v59 }
 0x364   :  { %231 = vrot.lane.b32.xlu2 %v229_v60, %s1811_s1 }
 0x3be   :  { %v232_v62 = vpop.permute.xlu2 %231 }
 0x3bf   :  { %v234_v63 = vadd.f32 %v232_v62, %v224_v61 }
 0x3c1   :  { %1591 = vtanh.f32 %v234_v63 }
 0x3c7   :  { %v1592_v2 = vpop.eup %1591 }
 0x3c8   :  { %237 = vrot.lane.b32.xlu0 %v1592_v2, %s1810_s21 }
 0x43a   :  { %v238_v8 = vpop.permute.xlu0 %237 }
 0x43b   :  { %v240_v9 = vmul.f32 %v238_v8, %v221_v59  ;;  %v1477_v8 = vld [vmem:[%s2216_s27 + $0x8] sm:$0x3] }
 0x43d   :  { %v260_v10 = vpack.c.bf16 %v240_v9, %v240_v9  ;;  %v397_v9 = vpack.c.bf16 %v1477_v8, %v1477_v8 }
 0x43f   :  { %262 = vrot.lane.b32.xlu1 %v260_v10, %s1811_s1  ;;  %1478 = vmatmul.msk.bf16.vlgmr.msra.gmra.mxu0 %vm80_vm0, %v397_v9 }
 0x4b1   :  { %v263_v13 = vpop.permute.xlu1 %262 }
 0x4b2   :  { %1471 = vmatmul.msk.bf16.vlgmr.msrb.gmra.mxu2 %vm109_vm5, %v263_v13 }
 0x4b3   :  { %581 = vmatpush.bf16.msrb.mxu2 %v1932_v1 }
 0x4b7   :  { %582 = vmatpush.bf16.msrb.mxu2 %v1940_v4 }
 0x4bc   :  { %v410_v13 = vpop.f32.mrf.mxu0 }
 0x535   :  { %v276_v15 = vpop.f32.mrf.mxu2 }
 0x536   :  { %v280_v16 = vadd.f32 %v276_v15, %v257_v14  ;;  %v412_v14 = vpop.f32.mrf.mxu0 }
 0x538   :  { %1593 = vtanh.f32 %v280_v16  ;;  %v1472_v19 = vmul.f32 -1.442695, %v280_v16  ;;  %v411_v16 = vadd.f32 %v1961_v6, %v410_v13 }
 0x53a   :  { %1595 = vpow2.f32 %v1472_v19 }
 0x53d   :  { %v278_v17 = vpop.f32.mrf.mxu2 }
 0x53e   :  { %v1594_v18 = vpop.eup %1593 }
 0x53f   :  { %303 = vrot.lane.b32.xlu2 %v1594_v18, %s1810_s21 }
 0x540   :  { %v1596_v20 = vpop.eup %1595 }
 0x541   :  { %v284_v21 = vadd.f32 1.0, %v1596_v20 }
 0x543   :  { %1597 = vrcp.f32 %v284_v21  ;;  %v296_v27 = vand.u32 2147483648, %v284_v21  ;;  %vm290_vm11 = vweird.f32 %v284_v21  ;;  %v294_v28 = vand.u32 2147483647, %v284_v21 }
 0x545   :  { %v297_v30 = vor.u32 1.1754944e-38, %v296_v27  ;;  %vm295_vm13 = vcmp.eq.f32.partialorder %v294_v28, 8.507059e+37 }
 0x549   :  { %v1598_v22 = vpop.eup %1597 }
 0x54a   :  { %v286_v23 = vmul.f32 %v1598_v22, %v284_v21  ;;  %vm291_vm10 = vweird.f32 %v1598_v22 }
 0x54b   :  { %vm292_vm12 = vmor %vm290_vm11, %vm291_vm10 }
 0x54c   :  { %v287_v24 = vsub.f32 1.0, %v286_v23 }
 0x54e   :  { %v288_v25 = vmul.f32 %v1598_v22, %v287_v24 }
 0x550   :  { %v289_v26 = vadd.f32 %v1598_v22, %v288_v25 }
 0x552   :  { %v293_v29 = vsel %vm292_vm12, %v1598_v22, %v289_v26 }
 0x553   :  { %v298_v32 = vsel %vm295_vm13, %v297_v30, %v293_v29 }
 0x554   :  { %v301_v34 = vmul.f32 %v298_v32, %v234_v63 }
 0x599   :  { %v304_v31 = vpop.permute.xlu2 %303 }
 0x59a   :  { %v306_v33 = vmul.f32 %v304_v31, %v298_v32 }
 0x59c   :  { %308 = vrot.lane.b32.xlu0 %v306_v33, %s1811_s1 }
 0x60e   :  { %v309_v35 = vpop.permute.xlu0 %308 }
 0x60f   :  { %v311_v36 = vadd.f32 %v309_v35, %v301_v34 }
 0x611   :  { %1599 = vtanh.f32 %v311_v36 }
 0x617   :  { %v1600_v37 = vpop.eup %1599 }
 0x618   :  { %314 = vrot.lane.b32.xlu1 %v1600_v37, %s1810_s21 }
 0x68a   :  { %v315_v40 = vpop.permute.xlu1 %314 }
 0x68b   :  { %v317_v41 = vmul.f32 %v315_v40, %v298_v32  ;;  %v1481_v40 = vld [vmem:[%s2216_s27 + $0xa] sm:$0x3] }
 0x68d   :  { %v337_v42 = vpack.c.bf16 %v317_v41, %v317_v41  ;;  %v474_v41 = vpack.c.bf16 %v1481_v40, %v1481_v40 }
 0x68f   :  { %339 = vrot.lane.b32.xlu2 %v337_v42, %s1811_s1  ;;  %1482 = vmatmul.msk.bf16.vlgmr.msra.gmra.mxu1 %vm80_vm0, %v474_v41 }
 0x6e9   :  { %v340_v43 = vpop.permute.xlu2 %339 }
 0x6ea   :  { %1475 = vmatmul.msk.bf16.vlgmr.msrb.gmra.mxu3 %vm109_vm5, %v340_v43 }
 0x6eb   :  { %658 = vmatpush.bf16.msrb.mxu3 %v1932_v1 }
 0x6ef   :  { %659 = vmatpush.bf16.msrb.mxu3 %v1940_v4 }
 0x70c   :  { %v487_v45 = vpop.f32.mrf.mxu1 }
 0x76d   :  { %v353_v47 = vpop.f32.mrf.mxu3 }
 0x76e   :  { %v357_v48 = vadd.f32 %v353_v47, %v334_v46  ;;  %v489_v46 = vpop.f32.mrf.mxu1 }
 0x770   :  { %1601 = vtanh.f32 %v357_v48  ;;  %v1476_v50 = vmul.f32 -1.442695, %v357_v48  ;;  %v488_v48 = vadd.f32 %v1961_v6, %v487_v45 }
 0x772   :  { %1603 = vpow2.f32 %v1476_v50 }
 0x775   :  { %v355_v0 = vpop.f32.mrf.mxu3 }
 0x776   :  { %v1602_v49 = vpop.eup %1601 }
 0x777   :  { %380 = vrot.lane.b32.xlu0 %v1602_v49, %s1810_s21 }
 0x778   :  { %v1604_v51 = vpop.eup %1603 }
 0x779   :  { %v361_v52 = vadd.f32 1.0, %v1604_v51 }
 0x77b   :  { %1605 = vrcp.f32 %v361_v52  ;;  %v373_v56 = vand.u32 2147483648, %v361_v52  ;;  %vm367_vm15 = vweird.f32 %v361_v52  ;;  %v371_v57 = vand.u32 2147483647, %v361_v52 }
 0x77d   :  { %v374_v59 = vor.u32 1.1754944e-38, %v373_v56  ;;  %vm372_vm2 = vcmp.eq.f32.partialorder %v371_v57, 8.507059e+37 }
 0x781   :  { %v1606_v53 = vpop.eup %1605 }
 0x782   :  { %v363_v1 = vmul.f32 %v1606_v53, %v361_v52  ;;  %vm368_vm14 = vweird.f32 %v1606_v53 }
 0x783   :  { %vm369_vm1 = vmor %vm367_vm15, %vm368_vm14 }
 0x784   :  { %v364_v54 = vsub.f32 1.0, %v363_v1 }
 0x786   :  { %v365_v55 = vmul.f32 %v1606_v53, %v364_v54 }
 0x788   :  { %v366_v4 = vadd.f32 %v1606_v53, %v365_v55 }
 0x78a   :  { %v370_v58 = vsel %vm369_vm1, %v1606_v53, %v366_v4 }
 0x78b   :  { %v375_v61 = vsel %vm372_vm2, %v374_v59, %v370_v58 }
 0x78c   :  { %v378_v63 = vmul.f32 %v375_v61, %v311_v36 }
 0x7e9   :  { %v381_v60 = vpop.permute.xlu0 %380 }
 0x7ea   :  { %v383_v62 = vmul.f32 %v381_v60, %v375_v61 }
 0x7ec   :  { %385 = vrot.lane.b32.xlu1 %v383_v62, %s1811_s1 }
 0x85e   :  { %v386_v2 = vpop.permute.xlu1 %385 }
 0x85f   :  { %v388_v3 = vadd.f32 %v386_v2, %v378_v63 }
 0x861   :  { %1607 = vtanh.f32 %v388_v3 }
 0x867   :  { %v1608_v7 = vpop.eup %1607 }
 0x868   :  { %391 = vrot.lane.b32.xlu2 %v1608_v7, %s1810_s21 }
 0x8c2   :  { %v392_v10 = vpop.permute.xlu2 %391 }
 0x8c3   :  { %v394_v11 = vmul.f32 %v392_v10, %v375_v61  ;;  %v1485_v10 = vld [vmem:[%s2216_s27 + $0xc] sm:$0x3] }
 0x8c5   :  { %v414_v12 = vpack.c.bf16 %v394_v11, %v394_v11  ;;  %v551_v11 = vpack.c.bf16 %v1485_v10, %v1485_v10 }
 0x8c7   :  { %416 = vrot.lane.b32.xlu0 %v414_v12, %s1811_s1  ;;  %1486 = vmatmul.msk.bf16.vlgmr.msrb.gmra.mxu0 %vm80_vm0, %v551_v11  ;;  %v1553_v11 = vld [vmem:[%s2191_s5 + $0x8] sm:$0xff] }
 0x8c8   :  { %736 = vmatpush.bf16.msra.mxu0 %v1553_v11 }
 0x939   :  { %v417_v15 = vpop.permute.xlu0 %416 }
 0x93a   :  { %1479 = vmatmul.msk.bf16.vlgmr.msra.gmra.mxu2 %vm109_vm5, %v417_v15 }
 0x9bd   :  { %v430_v17 = vpop.f32.mrf.mxu2 }
 0x9be   :  { %v434_v18 = vadd.f32 %v430_v17, %v411_v16  ;;  %v564_v16 = vpop.f32.mrf.mxu0 }
 0x9c0   :  { %1609 = vtanh.f32 %v434_v18  ;;  %v1480_v21 = vmul.f32 -1.442695, %v434_v18  ;;  %v565_v18 = vadd.f32 %v1961_v6, %v564_v16 }
 0x9c2   :  { %1611 = vpow2.f32 %v1480_v21 }
 0x9c5   :  { %v432_v19 = vpop.f32.mrf.mxu2 }
 0x9c6   :  { %v1610_v20 = vpop.eup %1609  ;;  %v566_v17 = vpop.f32.mrf.mxu0 }
 0x9c7   :  { %457 = vrot.lane.b32.xlu1 %v1610_v20, %s1810_s21  ;;  %v1556_v17 = vld [vmem:[%s2193_s7] sm:$0xff]  ;;  %s1812_s7 = smov 112  }
 0x9c8   :  { %v1612_v22 = vpop.eup %1611 }
 0x9c9   :  { %v438_v23 = vadd.f32 1.0, %v1612_v22 }
 0x9cb   :  { %1613 = vrcp.f32 %v438_v23  ;;  %v450_v29 = vand.u32 2147483648, %v438_v23  ;;  %vm444_vm4 = vweird.f32 %v438_v23  ;;  %v448_v30 = vand.u32 2147483647, %v438_v23 }
 0x9cd   :  { %v451_v32 = vor.u32 1.1754944e-38, %v450_v29  ;;  %vm449_vm7 = vcmp.eq.f32.partialorder %v448_v30, 8.507059e+37 }
 0x9d1   :  { %v1614_v24 = vpop.eup %1613 }
 0x9d2   :  { %v440_v25 = vmul.f32 %v1614_v24, %v438_v23  ;;  %vm445_vm3 = vweird.f32 %v1614_v24 }
 0x9d3   :  { %vm446_vm6 = vmor %vm444_vm4, %vm445_vm3 }
 0x9d4   :  { %v441_v26 = vsub.f32 1.0, %v440_v25 }
 0x9d6   :  { %v442_v27 = vmul.f32 %v1614_v24, %v441_v26 }
 0x9d8   :  { %v443_v28 = vadd.f32 %v1614_v24, %v442_v27 }
 0x9da   :  { %v447_v31 = vsel %vm446_vm6, %v1614_v24, %v443_v28  ;;  %vm743_vm6 = vcmask 254976  }
 0x9db   :  { %v452_v34 = vsel %vm449_vm7, %v451_v32, %v447_v31  ;;  %vm755_vm7 = vcmask 123904  }
 0x9dc   :  { %v455_v36 = vmul.f32 %v452_v34, %v388_v3 }
 0xa39   :  { %v458_v33 = vpop.permute.xlu1 %457 }
 0xa3a   :  { %v460_v35 = vmul.f32 %v458_v33, %v452_v34 }
 0xa3c   :  { %462 = vrot.lane.b32.xlu2 %v460_v35, %s1811_s1 }
 0xa96   :  { %v463_v37 = vpop.permute.xlu2 %462 }
 0xa97   :  { %v465_v38 = vadd.f32 %v463_v37, %v455_v36 }
 0xa99   :  { %1615 = vtanh.f32 %v465_v38 }
 0xa9f   :  { %v1616_v39 = vpop.eup %1615 }
 0xaa0   :  { %468 = vrot.lane.b32.xlu0 %v1616_v39, %s1810_s21 }
 0xb12   :  { %v469_v42 = vpop.permute.xlu0 %468 }
 0xb13   :  { %v471_v43 = vmul.f32 %v469_v42, %v452_v34  ;;  %v1489_v42 = vld [vmem:[%s2216_s27 + $0xe] sm:$0x3] }
 0xb15   :  { %v491_v44 = vpack.c.bf16 %v471_v43, %v471_v43  ;;  %v628_v43 = vpack.c.bf16 %v1489_v42, %v1489_v42 }
 0xb17   :  { %493 = vrot.lane.b32.xlu1 %v491_v44, %s1811_s1  ;;  %1490 = vmatmul.msk.bf16.vlgmr.msrb.gmra.mxu1 %vm80_vm0, %v628_v43 }
 0xb89   :  { %v494_v47 = vpop.permute.xlu1 %493 }
 0xb8a   :  { %1483 = vmatmul.msk.bf16.vlgmr.msra.gmra.mxu3 %vm109_vm5, %v494_v47 }
 0xb8b   :  { %832 = vmatpush.bf16.msra.mxu3 %v1556_v17 }
 0xb94   :  { %v641_v47 = vpop.f32.mrf.mxu1 }
 0xc0d   :  { %v507_v0 = vpop.f32.mrf.mxu3 }
 0xc0e   :  { %v511_v49 = vadd.f32 %v507_v0, %v488_v48  ;;  %v643_v48 = vpop.f32.mrf.mxu1 }
 0xc10   :  { %1617 = vtanh.f32 %v511_v49  ;;  %v1484_v52 = vmul.f32 -1.442695, %v511_v49  ;;  %v642_v49 = vadd.f32 %v1961_v6, %v641_v47 }
 0xc12   :  { %1619 = vpow2.f32 %v1484_v52 }
 0xc15   :  { %v509_v50 = vpop.f32.mrf.mxu3 }
 0xc16   :  { %v1618_v51 = vpop.eup %1617 }
 0xc17   :  { %534 = vrot.lane.b32.xlu2 %v1618_v51, %s1810_s21 }
 0xc18   :  { %v1620_v53 = vpop.eup %1619 }
 0xc19   :  { %v515_v1 = vadd.f32 1.0, %v1620_v53 }
 0xc1b   :  { %1621 = vrcp.f32 %v515_v1  ;;  %v527_v58 = vand.u32 2147483648, %v515_v1  ;;  %vm521_vm9 = vweird.f32 %v515_v1  ;;  %v525_v59 = vand.u32 2147483647, %v515_v1 }
 0xc1d   :  { %v528_v61 = vor.u32 1.1754944e-38, %v527_v58  ;;  %vm526_vm11 = vcmp.eq.f32.partialorder %v525_v59, 8.507059e+37 }
 0xc21   :  { %v1622_v54 = vpop.eup %1621 }
 0xc22   :  { %v517_v55 = vmul.f32 %v1622_v54, %v515_v1  ;;  %vm522_vm8 = vweird.f32 %v1622_v54 }
 0xc23   :  { %vm523_vm10 = vmor %vm521_vm9, %vm522_vm8 }
 0xc24   :  { %v518_v4 = vsub.f32 1.0, %v517_v55 }
 0xc26   :  { %v519_v56 = vmul.f32 %v1622_v54, %v518_v4 }
 0xc28   :  { %v520_v57 = vadd.f32 %v1622_v54, %v519_v56 }
 0xc2a   :  { %v524_v60 = vsel %vm523_vm10, %v1622_v54, %v520_v57 }
 0xc2b   :  { %v529_v63 = vsel %vm526_vm11, %v528_v61, %v524_v60 }
 0xc2c   :  { %v532_v3 = vmul.f32 %v529_v63, %v465_v38 }
 0xc71   :  { %v535_v62 = vpop.permute.xlu2 %534 }
 0xc72   :  { %v537_v2 = vmul.f32 %v535_v62, %v529_v63 }
 0xc74   :  { %539 = vrot.lane.b32.xlu0 %v537_v2, %s1811_s1 }
 0xce6   :  { %v540_v7 = vpop.permute.xlu0 %539 }
 0xce7   :  { %v542_v8 = vadd.f32 %v540_v7, %v532_v3 }
 0xce9   :  { %1623 = vtanh.f32 %v542_v8 }
 0xcef   :  { %v1624_v9 = vpop.eup %1623 }
 0xcf0   :  { %545 = vrot.lane.b32.xlu1 %v1624_v9, %s1810_s21 }
 0xd62   :  { %v546_v12 = vpop.permute.xlu1 %545 }
 0xd63   :  { %v548_v13 = vmul.f32 %v546_v12, %v529_v63  ;;  %v1552_v12 = vld [vmem:[%s2191_s5] sm:$0xff] }
 0xd64   :  { %737 = vmatpush.bf16.msra.mxu0 %v1552_v12 }
 0xd65   :  { %v568_v14 = vpack.c.bf16 %v548_v13, %v548_v13 }
 0xd67   :  { %570 = vrot.lane.b32.xlu2 %v568_v14, %s1811_s1 }
 0xdc1   :  { %v571_v15 = vpop.permute.xlu2 %570 }
 0xdc2   :  { %1487 = vmatmul.msk.bf16.vlgmr.msrb.gmra.mxu2 %vm109_vm5, %v571_v15 }
 0xe45   :  { %v584_v19 = vpop.f32.mrf.mxu2 }
 0xe46   :  { %v588_v20 = vadd.f32 %v584_v19, %v565_v18  ;;  %v1558_v18 = vld [vmem:[%s2194_s8 + $0x8] sm:$0xff]  ;;  %v1572_v19 = vld [vmem:[%s2192_s6] ss:$0 sm:$0xff]  ;;  %s1814_s6 = smov [#allocation2]  }
 0xe47   :  { %860 = vmatpush.bf16.msrb.mxu0 %v1558_v18  ;;  %s1387_s27 = sshll.u32 %s1814_s6, 4  ;;  %s1388_s27 = int_to_ptr.vmem [resolvable:$true] %s1387_s27 }
 0xe48   :  { %1625 = vtanh.f32 %v588_v20  ;;  %v1488_v23 = vmul.f32 -1.442695, %v588_v20 }
 0xe4a   :  { %1627 = vpow2.f32 %v1488_v23 }
 0xe4d   :  { %v586_v21 = vpop.f32.mrf.mxu2 }
 0xe4e   :  { %v1626_v22 = vpop.eup %1625 }
 0xe4f   :  { %611 = vrot.lane.b32.xlu0 %v1626_v22, %s1810_s21 }
 0xe50   :  { %v1628_v24 = vpop.eup %1627 }
 0xe51   :  { %v592_v25 = vadd.f32 1.0, %v1628_v24 }
 0xe53   :  { %1629 = vrcp.f32 %v592_v25  ;;  %v604_v31 = vand.u32 2147483648, %v592_v25  ;;  %vm598_vm13 = vweird.f32 %v592_v25  ;;  %v602_v32 = vand.u32 2147483647, %v592_v25 }
 0xe55   :  { %v605_v34 = vor.u32 1.1754944e-38, %v604_v31  ;;  %vm603_vm15 = vcmp.eq.f32.partialorder %v602_v32, 8.507059e+37 }
 0xe59   :  { %v1630_v26 = vpop.eup %1629 }
 0xe5a   :  { %v594_v27 = vmul.f32 %v1630_v26, %v592_v25  ;;  %vm599_vm12 = vweird.f32 %v1630_v26 }
 0xe5b   :  { %vm600_vm14 = vmor %vm598_vm13, %vm599_vm12 }
 0xe5c   :  { %v595_v28 = vsub.f32 1.0, %v594_v27  ;;  %v1555_v27 = vld [vmem:[%s2200_s14] sm:$0xff] }
 0xe5d   :  { %806 = vmatpush.bf16.msra.mxu1 %v1555_v27 }
 0xe5e   :  { %v596_v29 = vmul.f32 %v1630_v26, %v595_v28  ;;  %v1557_v28 = vld [vmem:[%s2194_s8] sm:$0xff]  ;;  %s1413_s8 = sshll.u32 %s2205_s19, 4  ;;  %s1817_s19 = smov 128   ;;  %s1414_s8 = int_to_ptr.hbm [resolvable:$true] %s1413_s8 }
 0xe5f   :  { %861 = vmatpush.bf16.msrb.mxu0 %v1557_v28 }
 0xe60   :  { %v597_v30 = vadd.f32 %v1630_v26, %v596_v29  ;;  %v745_v29 = vld [vmem:[%s2218_s2] sm:$0x3] }
 0xe61   :  { %976 = vmatpush.bf16.msrb.mxu1 %v1558_v18 }
 0xe62   :  { %v601_v33 = vsel %vm600_vm14, %v1630_v26, %v597_v30  ;;  %v1554_v26 = vld [vmem:[%s2198_s12] sm:$0xff] }
 0xe63   :  { %v606_v36 = vsel %vm603_vm15, %v605_v34, %v601_v33  ;;  %780 = vmatpush.bf16.msra.mxu2 %v1554_v26 }
 0xe64   :  { %v609_v38 = vmul.f32 %v606_v36, %v542_v8 }
 0xe65   :  { %977 = vmatpush.bf16.msrb.mxu1 %v1557_v28 }
 0xe67   :  { %918 = vmatpush.bf16.msrb.mxu2 %v1558_v18 }
 0xe6b   :  { %919 = vmatpush.bf16.msrb.mxu2 %v1557_v28 }
 0xec1   :  { %v612_v35 = vpop.permute.xlu0 %611 }
 0xec2   :  { %v614_v37 = vmul.f32 %v612_v35, %v606_v36  ;;  %v1573_v35 = vld [vmem:[%s2201_s15] ss:$0 sm:$0xff]  ;;  %s1818_s15 = smov 8  }
 0xec4   :  { %616 = vrot.lane.b32.xlu1 %v614_v37, %s1811_s1 }
 0xf36   :  { %v617_v39 = vpop.permute.xlu1 %616 }
 0xf37   :  { %v619_v40 = vadd.f32 %v617_v39, %v609_v38  ;;  %v1574_v38 = vld [vmem:[%s2199_s13] ss:$0 sm:$0xff] }
 0xf38   :  { %v1575_v39 = vld [vmem:[%s2195_s9] ss:$0 sm:$0xff] }
 0xf39   :  { %1631 = vtanh.f32 %v619_v40 }
 0xf3f   :  { %v1632_v41 = vpop.eup %1631 }
 0xf40   :  { %622 = vrot.lane.b32.xlu2 %v1632_v41, %s1810_s21 }
 0xf9a   :  { %v623_v44 = vpop.permute.xlu2 %622 }
 0xf9b   :  { %v625_v45 = vmul.f32 %v623_v44, %v606_v36 }
 0xf9d   :  { %v645_v46 = vpack.c.bf16 %v625_v45, %v625_v45 }
 0xf9f   :  { %647 = vrot.lane.b32.xlu0 %v645_v46, %s1811_s1 }
0x1011   :  { %v648_v0 = vpop.permute.xlu0 %647 }
0x1012   :  { %1491 = vmatmul.msk.bf16.vlgmr.msrb.gmra.mxu3 %vm109_vm5, %v648_v0 }
0x1013   :  { %1034 = vmatpush.bf16.msrb.mxu3 %v1558_v18 }
0x1017   :  { %1035 = vmatpush.bf16.msrb.mxu3 %v1557_v28 }
0x1095   :  { %v661_v50 = vpop.f32.mrf.mxu3 }
0x1096   :  { %v665_v51 = vadd.f32 %v661_v50, %v642_v49 }
0x1098   :  { %1633 = vtanh.f32 %v665_v51  ;;  %v1492_v1 = vmul.f32 -1.442695, %v665_v51 }
0x109a   :  { %1635 = vpow2.f32 %v1492_v1 }
0x109d   :  { %v663_v52 = vpop.f32.mrf.mxu3 }
0x109e   :  { %v1634_v53 = vpop.eup %1633 }
0x109f   :  { %688 = vrot.lane.b32.xlu1 %v1634_v53, %s1810_s21 }
0x10a0   :  { %v1636_v54 = vpop.eup %1635 }
0x10a1   :  { %v669_v55 = vadd.f32 1.0, %v1636_v54 }
0x10a3   :  { %1637 = vrcp.f32 %v669_v55  ;;  %v681_v60 = vand.u32 2147483648, %v669_v55  ;;  %vm675_vm2 = vweird.f32 %v669_v55  ;;  %v679_v6 = vand.u32 2147483647, %v669_v55 }
0x10a5   :  { %v682_v62 = vor.u32 1.1754944e-38, %v681_v60  ;;  %vm680_vm4 = vcmp.eq.f32.partialorder %v679_v6, 8.507059e+37 }
0x10a9   :  { %v1638_v4 = vpop.eup %1637 }
0x10aa   :  { %v671_v56 = vmul.f32 %v1638_v4, %v669_v55  ;;  %vm676_vm1 = vweird.f32 %v1638_v4 }
0x10ab   :  { %vm677_vm3 = vmor %vm675_vm2, %vm676_vm1 }
0x10ac   :  { %v672_v57 = vsub.f32 1.0, %v671_v56 }
0x10ae   :  { %v673_v58 = vmul.f32 %v1638_v4, %v672_v57 }
0x10b0   :  { %v674_v59 = vadd.f32 %v1638_v4, %v673_v58 }
0x10b2   :  { %v678_v61 = vsel %vm677_vm3, %v1638_v4, %v674_v59 }
0x10b3   :  { %v683_v2 = vsel %vm680_vm4, %v682_v62, %v678_v61  ;;  %vm1329_vm4 = vcmask 1041408  }
0x10b4   :  { %v686_v7 = vmul.f32 %v683_v2, %v619_v40 }
0x1111   :  { %v689_v63 = vpop.permute.xlu1 %688 }
0x1112   :  { %v691_v3 = vmul.f32 %v689_v63, %v683_v2 }
0x1114   :  { %693 = vrot.lane.b32.xlu2 %v691_v3, %s1811_s1 }
0x116e   :  { %v694_v8 = vpop.permute.xlu2 %693 }
0x116f   :  { %v696_v9 = vadd.f32 %v694_v8, %v686_v7 }
0x1171   :  { %1639 = vtanh.f32 %v696_v9 }
0x1177   :  { %v1640_v10 = vpop.eup %1639 }
0x1178   :  { %699 = vrot.lane.b32.xlu0 %v1640_v10, %s1810_s21 }
0x11ea   :  { %v700_v13 = vpop.permute.xlu0 %699 }
0x11eb   :  { %v702_v14 = vmul.f32 %v700_v13, %v683_v2 }
0x11ed   :  { %v703_v15 = vpack.c.bf16 %v702_v14, %v702_v14 }
0x11ef   :  { %713 = vrot.lane.b32.xlu1 %v703_v15, %s1811_s1 }
0x1261   :  { %v714_v16 = vpop.permute.xlu1 %713 }
0x1262   :  { %1501 = vmatmul.msk.bf16.vlgmr.msra.gmra.mxu0 %vm109_vm5, %v714_v16 }
0x1263   :  { %1092 = vmatpush.bf16.msra.mxu0 %v1558_v18 }
0x1267   :  { %1093 = vmatpush.bf16.msra.mxu0 %v1557_v28 }
0x1272   :  { %862 = vmatmul.bf16.vlgmr.msrb.gmra.mxu0 %v1809_v5 }
0x12df   :  { %v739_v20 = vpop.f32.mrf.mxu0 }
0x12e0   :  { %v740_v21 = vadd.f32 %v1572_v19, %v739_v20 }
0x12e2   :  { %v746_v22 = vmul.f32 0.5, %v740_v21  ;;  %744 = vst.msk [vmem:[#allocation2] sm:$0x3] %vm743_vm6, %v740_v21 }
0x12e3   :  { %1392 = dma.vmem_to_hbm [thread:$0]  %s1388_s27, 32, %s1390_s23, [#allocation3]  }
0x12e4   :  { %v747_v23 = vmul.f32 1.442695, %v746_v22 }
0x12e6   :  { %1641 = vpow2.f32 %v747_v23 }
0x12e7   :  { %v741_v24 = vpop.f32.mrf.mxu0 }
0x12ec   :  { %v1642_v25 = vpop.eup %1641 }
0x12ed   :  { %750 = vrot.lane.b32.xlu2 %v1642_v25, %s1812_s7 }
0x12ef   :  { %v863_v5 = vpop.f32.mrf.mxu0 }
0x12f7   :  { %v865_v34 = vpop.f32.mrf.mxu0 }
0x1347   :  { %v751_v30 = vpop.permute.xlu2 %750 }
0x1348   :  { %v753_v31 = vmul.f32 %v751_v30, %v745_v29 }
0x134a   :  { %v754_v32 = vadd.f32 %v753_v31, %v740_v21 }
0x134c   :  { %v757_v33 = vpack.c.bf16 %v754_v32, %v754_v32  ;;  %756 = vst.msk [vmem:[#allocation4] sm:$0x3] %vm755_vm7, %v754_v32 }
0x134e   :  { %1506 = vmatmul.msk.bf16.vlgmr.msra.gmra.mxu2 %vm80_vm0, %v757_v33  ;;  %1511 = vmatmul.msk.bf16.vlgmr.msra.gmra.mxu1 %vm80_vm0, %v757_v33 }
0x134f   :  { %1516 = vmatmul.msk.bf16.vlgmr.msra.gmra.mxu3 %vm80_vm0, %v757_v33  ;;  %1150 = vmatpush.bf16.msra.mxu2 %v1558_v18 }
0x1350   :  { %1208 = vmatpush.bf16.msra.mxu1 %v1558_v18  ;;  %1266 = vmatpush.bf16.msra.mxu3 %v1558_v18 }
0x1353   :  { %1151 = vmatpush.bf16.msra.mxu2 %v1557_v28 }
0x1354   :  { %1209 = vmatpush.bf16.msra.mxu1 %v1557_v28  ;;  %1267 = vmatpush.bf16.msra.mxu3 %v1557_v28 }
0x13cb   :  { %v808_v36 = vpop.f32.mrf.mxu1 }
0x13cc   :  { %v809_v37 = vadd.f32 %v1573_v35, %v808_v36 }
0x13ce   :  { %812 = vst.msk [vmem:[#allocation6] sm:$0x3] %vm755_vm7, %v809_v37 }
0x13d1   :  { %v782_v40 = vpop.f32.mrf.mxu2 }
0x13d2   :  { %v783_v41 = vadd.f32 %v1574_v38, %v782_v40  ;;  %v834_v42 = vpop.f32.mrf.mxu3 }
0x13d3   :  { %v2092_v43 = vadd.f32 %v1575_v39, %v834_v42  ;;  %v810_v44 = vpop.f32.mrf.mxu1 }
0x13d4   :  { %786 = vst.msk [vmem:[%s2204_s18] sm:$0x3] %vm743_vm6, %v783_v41  ;;  %vm1331_vm6 = vcmask 1043456  }
0x13d5   :  { %v867_v45 = vadd.f32 %v863_v5, %v2092_v43 }
0x13d7   :  { %1643 = vtanh.f32 %v867_v45  ;;  %v1525_v0 = vmul.f32 -1.442695, %v867_v45 }
0x13d9   :  { %v784_v46 = vpop.f32.mrf.mxu2  ;;  %1645 = vpow2.f32 %v1525_v0 }
0x13da   :  { %v836_v47 = vpop.f32.mrf.mxu3 }
0x13dd   :  { %v1644_v48 = vpop.eup %1643 }
0x13de   :  { %890 = vrot.lane.b32.xlu0 %v1644_v48, %s1810_s21 }
0x13df   :  { %v1646_v49 = vpop.eup %1645 }
0x13e0   :  { %v871_v50 = vadd.f32 1.0, %v1646_v49 }
0x13e2   :  { %1647 = vrcp.f32 %v871_v50  ;;  %v883_v55 = vand.u32 2147483648, %v871_v50  ;;  %vm877_vm8 = vweird.f32 %v871_v50  ;;  %v881_v4 = vand.u32 2147483647, %v871_v50 }
0x13e4   :  { %v884_v57 = vor.u32 1.1754944e-38, %v883_v55  ;;  %vm882_vm10 = vcmp.eq.f32.partialorder %v881_v4, 8.507059e+37 }
0x13e8   :  { %v1648_v51 = vpop.eup %1647 }
0x13e9   :  { %v873_v52 = vmul.f32 %v1648_v51, %v871_v50  ;;  %vm878_vm0 = vweird.f32 %v1648_v51 }
0x13ea   :  { %vm879_vm9 = vmor %vm877_vm8, %vm878_vm0 }
0x13eb   :  { %v874_v53 = vsub.f32 1.0, %v873_v52 }
0x13ed   :  { %v875_v1 = vmul.f32 %v1648_v51, %v874_v53 }
0x13ef   :  { %v876_v54 = vadd.f32 %v1648_v51, %v875_v1 }
0x13f1   :  { %v880_v56 = vsel %vm879_vm9, %v1648_v51, %v876_v54 }
0x13f2   :  { %v885_v59 = vsel %vm882_vm10, %v884_v57, %v880_v56  ;;  %vm1333_vm10 = vcmask 1045504  }
0x13f3   :  { %v888_v6 = vmul.f32 0.0, %v885_v59 }
0x1450   :  { %v891_v58 = vpop.permute.xlu0 %890 }
0x1451   :  { %v893_v60 = vmul.f32 %v891_v58, %v885_v59 }
0x1453   :  { %895 = vrot.lane.b32.xlu1 %v893_v60, %s1811_s1 }
0x14c5   :  { %v896_v61 = vpop.permute.xlu1 %895 }
0x14c6   :  { %v898_v62 = vadd.f32 %v896_v61, %v888_v6 }
0x14c8   :  { %1649 = vtanh.f32 %v898_v62 }
0x14ce   :  { %v1650_v63 = vpop.eup %1649 }
0x14cf   :  { %901 = vrot.lane.b32.xlu2 %v1650_v63, %s1810_s21 }
0x1529   :  { %v902_v2 = vpop.permute.xlu2 %901 }
0x152a   :  { %v2102_v3 = vmul.f32 %v902_v2, %v885_v59 }
0x152c   :  { %v905_v7 = vpack.c.bf16 %v2102_v3, %v2102_v3 }
0x152e   :  { %907 = vrot.lane.b32.xlu0 %v905_v7, %s1811_s1 }
0x15a0   :  { %v908_v8 = vpop.permute.xlu0 %907 }
0x15a1   :  { %1526 = vmatmul.msk.bf16.vlgmr.msrb.gmra.mxu2 %vm109_vm5, %v908_v8 }
0x1624   :  { %v921_v9 = vpop.f32.mrf.mxu2 }
0x1625   :  { %v925_v10 = vadd.f32 %v921_v9, %v2092_v43 }
0x1627   :  { %1651 = vtanh.f32 %v925_v10  ;;  %v1527_v13 = vmul.f32 -1.442695, %v925_v10 }
0x1629   :  { %1653 = vpow2.f32 %v1527_v13 }
0x162c   :  { %v923_v11 = vpop.f32.mrf.mxu2 }
0x162d   :  { %v1652_v12 = vpop.eup %1651 }
0x162e   :  { %948 = vrot.lane.b32.xlu1 %v1652_v12, %s1810_s21 }
0x162f   :  { %v1654_v14 = vpop.eup %1653 }
0x1630   :  { %v929_v15 = vadd.f32 1.0, %v1654_v14 }
0x1632   :  { %1655 = vrcp.f32 %v929_v15  ;;  %v941_v21 = vand.u32 2147483648, %v929_v15  ;;  %vm935_vm12 = vweird.f32 %v929_v15  ;;  %v939_v22 = vand.u32 2147483647, %v929_v15 }
0x1634   :  { %v942_v24 = vor.u32 1.1754944e-38, %v941_v21  ;;  %vm940_vm14 = vcmp.eq.f32.partialorder %v939_v22, 8.507059e+37 }
0x1638   :  { %v1656_v16 = vpop.eup %1655 }
0x1639   :  { %v931_v17 = vmul.f32 %v1656_v16, %v929_v15  ;;  %vm936_vm11 = vweird.f32 %v1656_v16 }
0x163a   :  { %vm937_vm13 = vmor %vm935_vm12, %vm936_vm11 }
0x163b   :  { %v932_v18 = vsub.f32 1.0, %v931_v17 }
0x163d   :  { %v933_v19 = vmul.f32 %v1656_v16, %v932_v18 }
0x163f   :  { %v934_v20 = vadd.f32 %v1656_v16, %v933_v19 }
0x1641   :  { %v938_v23 = vsel %vm937_vm13, %v1656_v16, %v934_v20 }
0x1642   :  { %v943_v26 = vsel %vm940_vm14, %v942_v24, %v938_v23 }
0x1643   :  { %v946_v28 = vmul.f32 %v943_v26, %v898_v62 }
0x16a0   :  { %v949_v25 = vpop.permute.xlu1 %948 }
0x16a1   :  { %v951_v27 = vmul.f32 %v949_v25, %v943_v26 }
0x16a3   :  { %953 = vrot.lane.b32.xlu2 %v951_v27, %s1811_s1 }
0x16fd   :  { %v954_v29 = vpop.permute.xlu2 %953 }
0x16fe   :  { %v956_v30 = vadd.f32 %v954_v29, %v946_v28 }
0x1700   :  { %1657 = vtanh.f32 %v956_v30 }
0x1706   :  { %v1658_v31 = vpop.eup %1657 }
0x1707   :  { %959 = vrot.lane.b32.xlu0 %v1658_v31, %s1810_s21 }
0x1779   :  { %v960_v32 = vpop.permute.xlu0 %959 }
0x177a   :  { %v962_v33 = vmul.f32 %v960_v32, %v943_v26 }
0x177c   :  { %v963_v5 = vpack.c.bf16 %v962_v33, %v962_v33  ;;  %v1312_v56 = vrot.slane %v962_v33, 6 }
0x177e   :  { %965 = vrot.lane.b32.xlu1 %v963_v5, %s1811_s1  ;;  %v1330_v6 = vsel %vm1329_vm4, %v2102_v3, %v1312_v56 }
0x17f0   :  { %v966_v34 = vpop.permute.xlu1 %965 }
0x17f1   :  { %1528 = vmatmul.msk.bf16.vlgmr.msrb.gmra.mxu1 %vm109_vm5, %v966_v34 }
0x186e   :  { %v979_v35 = vpop.f32.mrf.mxu1 }
0x186f   :  { %v983_v36 = vadd.f32 %v979_v35, %v2092_v43 }
0x1871   :  { %1659 = vtanh.f32 %v983_v36  ;;  %v1529_v39 = vmul.f32 -1.442695, %v983_v36 }
0x1873   :  { %1661 = vpow2.f32 %v1529_v39 }
0x1876   :  { %v981_v37 = vpop.f32.mrf.mxu1 }
0x1877   :  { %v1660_v38 = vpop.eup %1659 }
0x1878   :  { %1006 = vrot.lane.b32.xlu2 %v1660_v38, %s1810_s21 }
0x1879   :  { %v1662_v40 = vpop.eup %1661 }
0x187a   :  { %v987_v41 = vadd.f32 1.0, %v1662_v40 }
0x187c   :  { %1663 = vrcp.f32 %v987_v41  ;;  %v999_v48 = vand.u32 2147483648, %v987_v41  ;;  %vm993_vm1 = vweird.f32 %v987_v41  ;;  %v997_v0 = vand.u32 2147483647, %v987_v41 }
0x187e   :  { %v1000_v50 = vor.u32 1.1754944e-38, %v999_v48  ;;  %vm998_vm3 = vcmp.eq.f32.partialorder %v997_v0, 8.507059e+37 }
0x1882   :  { %v1664_v42 = vpop.eup %1663 }
0x1883   :  { %v989_v44 = vmul.f32 %v1664_v42, %v987_v41  ;;  %vm994_vm15 = vweird.f32 %v1664_v42 }
0x1884   :  { %vm995_vm2 = vmor %vm993_vm1, %vm994_vm15 }
0x1885   :  { %v990_v45 = vsub.f32 1.0, %v989_v44 }
0x1887   :  { %v991_v46 = vmul.f32 %v1664_v42, %v990_v45 }
0x1889   :  { %v992_v47 = vadd.f32 %v1664_v42, %v991_v46 }
0x188b   :  { %v996_v49 = vsel %vm995_vm2, %v1664_v42, %v992_v47 }
0x188c   :  { %v1001_v52 = vsel %vm998_vm3, %v1000_v50, %v996_v49 }
0x188d   :  { %v1004_v1 = vmul.f32 %v1001_v52, %v956_v30 }
0x18d2   :  { %v1007_v51 = vpop.permute.xlu2 %1006 }
0x18d3   :  { %v1009_v53 = vmul.f32 %v1007_v51, %v1001_v52 }
0x18d5   :  { %1011 = vrot.lane.b32.xlu0 %v1009_v53, %s1811_s1 }
0x1947   :  { %v1012_v54 = vpop.permute.xlu0 %1011 }
0x1948   :  { %v1014_v55 = vadd.f32 %v1012_v54, %v1004_v1 }
0x194a   :  { %1665 = vtanh.f32 %v1014_v55 }
0x1950   :  { %v1666_v4 = vpop.eup %1665 }
0x1951   :  { %1017 = vrot.lane.b32.xlu1 %v1666_v4, %s1810_s21 }
0x19c3   :  { %v1018_v57 = vpop.permute.xlu1 %1017 }
0x19c4   :  { %v1020_v58 = vmul.f32 %v1018_v57, %v1001_v52 }
0x19c6   :  { %v1021_v59 = vpack.c.bf16 %v1020_v58, %v1020_v58  ;;  %v1315_v60 = vrot.slane %v1020_v58, 4 }
0x19c8   :  { %v1332_v61 = vsel %vm1331_vm6, %v1330_v6, %v1315_v60  ;;  %1023 = vrot.lane.b32.xlu2 %v1021_v59, %s1811_s1 }
0x1a22   :  { %v1024_v62 = vpop.permute.xlu2 %1023 }
0x1a23   :  { %1530 = vmatmul.msk.bf16.vlgmr.msrb.gmra.mxu3 %vm109_vm5, %v1024_v62 }
0x1aa6   :  { %v1037_v63 = vpop.f32.mrf.mxu3 }
0x1aa7   :  { %v1041_v2 = vadd.f32 %v1037_v63, %v2092_v43 }
0x1aa9   :  { %1667 = vtanh.f32 %v1041_v2  ;;  %v1531_v9 = vmul.f32 -1.442695, %v1041_v2 }
0x1aab   :  { %1669 = vpow2.f32 %v1531_v9 }
0x1aae   :  { %v1039_v7 = vpop.f32.mrf.mxu3 }
0x1aaf   :  { %v1668_v8 = vpop.eup %1667 }
0x1ab0   :  { %1064 = vrot.lane.b32.xlu0 %v1668_v8, %s1810_s21 }
0x1ab1   :  { %v1670_v10 = vpop.eup %1669 }
0x1ab2   :  { %v1045_v11 = vadd.f32 1.0, %v1670_v10 }
0x1ab4   :  { %1671 = vrcp.f32 %v1045_v11  ;;  %v1057_v16 = vand.u32 2147483648, %v1045_v11  ;;  %vm1051_vm0 = vweird.f32 %v1045_v11  ;;  %v1055_v17 = vand.u32 2147483647, %v1045_v11 }
0x1ab6   :  { %v1058_v19 = vor.u32 1.1754944e-38, %v1057_v16  ;;  %vm1056_vm9 = vcmp.eq.f32.partialorder %v1055_v17, 8.507059e+37 }
0x1aba   :  { %v1672_v3 = vpop.eup %1671 }
0x1abb   :  { %v1047_v12 = vmul.f32 %v1672_v3, %v1045_v11  ;;  %vm1052_vm7 = vweird.f32 %v1672_v3 }
0x1abc   :  { %vm1053_vm8 = vmor %vm1051_vm0, %vm1052_vm7 }
0x1abd   :  { %v1048_v13 = vsub.f32 1.0, %v1047_v12 }
0x1abf   :  { %v1049_v14 = vmul.f32 %v1672_v3, %v1048_v13 }
0x1ac1   :  { %v1050_v15 = vadd.f32 %v1672_v3, %v1049_v14 }
0x1ac3   :  { %v1054_v18 = vsel %vm1053_vm8, %v1672_v3, %v1050_v15 }
0x1ac4   :  { %v1059_v21 = vsel %vm1056_vm9, %v1058_v19, %v1054_v18 }
0x1ac5   :  { %v1062_v23 = vmul.f32 %v1059_v21, %v1014_v55 }
0x1b22   :  { %v1065_v20 = vpop.permute.xlu0 %1064 }
0x1b23   :  { %v1067_v22 = vmul.f32 %v1065_v20, %v1059_v21 }
0x1b25   :  { %1069 = vrot.lane.b32.xlu1 %v1067_v22, %s1811_s1 }
0x1b97   :  { %v1070_v24 = vpop.permute.xlu1 %1069 }
0x1b98   :  { %v1072_v25 = vadd.f32 %v1070_v24, %v1062_v23 }
0x1b9a   :  { %1673 = vtanh.f32 %v1072_v25 }
0x1ba0   :  { %v1674_v26 = vpop.eup %1673 }
0x1ba1   :  { %1075 = vrot.lane.b32.xlu2 %v1674_v26, %s1810_s21 }
0x1bfb   :  { %v1076_v27 = vpop.permute.xlu2 %1075 }
0x1bfc   :  { %v1078_v28 = vmul.f32 %v1076_v27, %v1059_v21 }
0x1bfe   :  { %v1079_v29 = vpack.c.bf16 %v1078_v28, %v1078_v28  ;;  %v1318_v30 = vrot.slane %v1078_v28, 2 }
0x1c00   :  { %1081 = vrot.lane.b32.xlu0 %v1079_v29, %s1811_s1  ;;  %v2129_v31 = vsel %vm1333_vm10, %v1332_v61, %v1318_v30 }
0x1c72   :  { %v1082_v32 = vpop.permute.xlu0 %1081 }
0x1c73   :  { %1532 = vmatmul.msk.bf16.vlgmr.msra.gmra.mxu0 %vm109_vm5, %v1082_v32 }
0x1cf0   :  { %v1095_v33 = vpop.f32.mrf.mxu0 }
0x1cf1   :  { %v1099_v5 = vadd.f32 %v1095_v33, %v2092_v43 }
0x1cf3   :  { %1675 = vtanh.f32 %v1099_v5  ;;  %v1533_v36 = vmul.f32 -1.442695, %v1099_v5 }
0x1cf5   :  { %1677 = vpow2.f32 %v1533_v36 }
0x1cf8   :  { %v1097_v34 = vpop.f32.mrf.mxu0 }
0x1cf9   :  { %v1676_v35 = vpop.eup %1675 }
0x1cfa   :  { %1122 = vrot.lane.b32.xlu1 %v1676_v35, %s1810_s21 }
0x1cfb   :  { %v1678_v37 = vpop.eup %1677 }
0x1cfc   :  { %v1103_v38 = vadd.f32 1.0, %v1678_v37 }
0x1cfe   :  { %1679 = vrcp.f32 %v1103_v38  ;;  %v1115_v45 = vand.u32 2147483648, %v1103_v38  ;;  %vm1109_vm12 = vweird.f32 %v1103_v38  ;;  %v1113_v46 = vand.u32 2147483647, %v1103_v38 }
0x1d00   :  { %v1116_v48 = vor.u32 1.1754944e-38, %v1115_v45  ;;  %vm1114_vm14 = vcmp.eq.f32.partialorder %v1113_v46, 8.507059e+37 }
0x1d04   :  { %v1680_v39 = vpop.eup %1679 }
0x1d05   :  { %v1105_v40 = vmul.f32 %v1680_v39, %v1103_v38  ;;  %vm1110_vm11 = vweird.f32 %v1680_v39 }
0x1d06   :  { %vm1111_vm13 = vmor %vm1109_vm12, %vm1110_vm11 }
0x1d07   :  { %v1106_v41 = vsub.f32 1.0, %v1105_v40 }
0x1d09   :  { %v1107_v42 = vmul.f32 %v1680_v39, %v1106_v41 }
0x1d0b   :  { %v1108_v44 = vadd.f32 %v1680_v39, %v1107_v42 }
0x1d0d   :  { %v1112_v47 = vsel %vm1111_vm13, %v1680_v39, %v1108_v44 }
0x1d0e   :  { %v1117_v49 = vsel %vm1114_vm14, %v1116_v48, %v1112_v47 }
0x1d0f   :  { %v1120_v51 = vmul.f32 %v1117_v49, %v1072_v25 }
0x1d6c   :  { %v1123_v0 = vpop.permute.xlu1 %1122 }
0x1d6d   :  { %v1125_v50 = vmul.f32 %v1123_v0, %v1117_v49 }
0x1d6f   :  { %1127 = vrot.lane.b32.xlu2 %v1125_v50, %s1811_s1 }
0x1dc9   :  { %v1128_v52 = vpop.permute.xlu2 %1127 }
0x1dca   :  { %v1130_v53 = vadd.f32 %v1128_v52, %v1120_v51 }
0x1dcc   :  { %1681 = vtanh.f32 %v1130_v53 }
0x1dd2   :  { %v1682_v1 = vpop.eup %1681 }
0x1dd3   :  { %1133 = vrot.lane.b32.xlu0 %v1682_v1, %s1810_s21 }
0x1e45   :  { %v1134_v54 = vpop.permute.xlu0 %1133 }
0x1e46   :  { %v2136_v55 = vmul.f32 %v1134_v54, %v1117_v49 }
0x1e48   :  { %v1137_v4 = vpack.c.bf16 %v2136_v55, %v2136_v55 }
0x1e4a   :  { %1139 = vrot.lane.b32.xlu1 %v1137_v4, %s1811_s1 }
0x1ebc   :  { %v1140_v56 = vpop.permute.xlu1 %1139 }
0x1ebd   :  { %1534 = vmatmul.msk.bf16.vlgmr.msra.gmra.mxu2 %vm109_vm5, %v1140_v56 }
0x1f40   :  { %v1153_v57 = vpop.f32.mrf.mxu2 }
0x1f41   :  { %v1157_v58 = vadd.f32 %v1153_v57, %v2092_v43 }
0x1f43   :  { %1683 = vtanh.f32 %v1157_v58  ;;  %v1535_v6 = vmul.f32 -1.442695, %v1157_v58 }
0x1f45   :  { %1685 = vpow2.f32 %v1535_v6 }
0x1f48   :  { %v1155_v59 = vpop.f32.mrf.mxu2 }
0x1f49   :  { %v1684_v60 = vpop.eup %1683 }
0x1f4a   :  { %1180 = vrot.lane.b32.xlu2 %v1684_v60, %s1810_s21 }
0x1f4b   :  { %v1686_v61 = vpop.eup %1685 }
0x1f4c   :  { %v1161_v62 = vadd.f32 1.0, %v1686_v61 }
0x1f4e   :  { %1687 = vrcp.f32 %v1161_v62  ;;  %v1173_v10 = vand.u32 2147483648, %v1161_v62  ;;  %vm1167_vm1 = vweird.f32 %v1161_v62  ;;  %v1171_v11 = vand.u32 2147483647, %v1161_v62 }
0x1f50   :  { %v1174_v12 = vor.u32 1.1754944e-38, %v1173_v10  ;;  %vm1172_vm3 = vcmp.eq.f32.partialorder %v1171_v11, 8.507059e+37 }
0x1f54   :  { %v1688_v63 = vpop.eup %1687 }
0x1f55   :  { %v1163_v2 = vmul.f32 %v1688_v63, %v1161_v62  ;;  %vm1168_vm15 = vweird.f32 %v1688_v63 }
0x1f56   :  { %vm1169_vm2 = vmor %vm1167_vm1, %vm1168_vm15 }
0x1f57   :  { %v1164_v7 = vsub.f32 1.0, %v1163_v2 }
0x1f59   :  { %v1165_v8 = vmul.f32 %v1688_v63, %v1164_v7 }
0x1f5b   :  { %v1166_v9 = vadd.f32 %v1688_v63, %v1165_v8 }
0x1f5d   :  { %v1170_v3 = vsel %vm1169_vm2, %v1688_v63, %v1166_v9 }
0x1f5e   :  { %v1175_v14 = vsel %vm1172_vm3, %v1174_v12, %v1170_v3 }
0x1f5f   :  { %v1178_v16 = vmul.f32 %v1175_v14, %v1130_v53 }
0x1fa4   :  { %v1181_v13 = vpop.permute.xlu2 %1180 }
0x1fa5   :  { %v1183_v15 = vmul.f32 %v1181_v13, %v1175_v14 }
0x1fa7   :  { %1185 = vrot.lane.b32.xlu0 %v1183_v15, %s1811_s1  ;;  %v1560_v15 = vld [vmem:[%s2196_s10 + $0x8] sm:$0xff] }
0x1fa8   :  { %1371 = vmatpush.bf16.msrb.mxu0 %v1560_v15 }
0x2019   :  { %v1186_v17 = vpop.permute.xlu0 %1185 }
0x201a   :  { %v1188_v18 = vadd.f32 %v1186_v17, %v1178_v16  ;;  %v1559_v16 = vld [vmem:[%s2196_s10] sm:$0xff] }
0x201b   :  { %1372 = vmatpush.bf16.msrb.mxu0 %v1559_v16 }
0x201c   :  { %1689 = vtanh.f32 %v1188_v18 }
0x2022   :  { %v1690_v19 = vpop.eup %1689 }
0x2023   :  { %1191 = vrot.lane.b32.xlu1 %v1690_v19, %s1810_s21 }
0x2095   :  { %v1192_v20 = vpop.permute.xlu1 %1191 }
0x2096   :  { %v1194_v21 = vmul.f32 %v1192_v20, %v1175_v14 }
0x2098   :  { %v1195_v22 = vpack.c.bf16 %v1194_v21, %v1194_v21  ;;  %v1321_v48 = vrot.slane %v1194_v21, 6 }
0x209a   :  { %1197 = vrot.lane.b32.xlu2 %v1195_v22, %s1811_s1  ;;  %v1335_v52 = vsel %vm1329_vm4, %v2136_v55, %v1321_v48 }
0x20f4   :  { %v1198_v23 = vpop.permute.xlu2 %1197 }
0x20f5   :  { %1536 = vmatmul.msk.bf16.vlgmr.msra.gmra.mxu1 %vm109_vm5, %v1198_v23 }
0x2172   :  { %v1211_v24 = vpop.f32.mrf.mxu1 }
0x2173   :  { %v1215_v25 = vadd.f32 %v1211_v24, %v2092_v43 }
0x2175   :  { %1691 = vtanh.f32 %v1215_v25  ;;  %v1537_v28 = vmul.f32 -1.442695, %v1215_v25 }
0x2177   :  { %1693 = vpow2.f32 %v1537_v28 }
0x217a   :  { %v1213_v26 = vpop.f32.mrf.mxu1 }
0x217b   :  { %v1692_v27 = vpop.eup %1691 }
0x217c   :  { %1238 = vrot.lane.b32.xlu0 %v1692_v27, %s1810_s21 }
0x217d   :  { %v1694_v29 = vpop.eup %1693 }
0x217e   :  { %v1219_v30 = vadd.f32 1.0, %v1694_v29 }
0x2180   :  { %1695 = vrcp.f32 %v1219_v30  ;;  %v1231_v36 = vand.u32 2147483648, %v1219_v30  ;;  %vm1225_vm0 = vweird.f32 %v1219_v30  ;;  %v1229_v37 = vand.u32 2147483647, %v1219_v30 }
0x2182   :  { %v1232_v39 = vor.u32 1.1754944e-38, %v1231_v36  ;;  %vm1230_vm9 = vcmp.eq.f32.partialorder %v1229_v37, 8.507059e+37 }
0x2186   :  { %v1696_v32 = vpop.eup %1695 }
0x2187   :  { %v1221_v33 = vmul.f32 %v1696_v32, %v1219_v30  ;;  %vm1226_vm7 = vweird.f32 %v1696_v32 }
0x2188   :  { %vm1227_vm8 = vmor %vm1225_vm0, %vm1226_vm7 }
0x2189   :  { %v1222_v5 = vsub.f32 1.0, %v1221_v33 }
0x218b   :  { %v1223_v34 = vmul.f32 %v1696_v32, %v1222_v5 }
0x218d   :  { %v1224_v35 = vadd.f32 %v1696_v32, %v1223_v34 }
0x218f   :  { %v1228_v38 = vsel %vm1227_vm8, %v1696_v32, %v1224_v35 }
0x2190   :  { %v1233_v41 = vsel %vm1230_vm9, %v1232_v39, %v1228_v38 }
0x2191   :  { %v1236_v44 = vmul.f32 %v1233_v41, %v1188_v18 }
0x21ee   :  { %v1239_v40 = vpop.permute.xlu0 %1238 }
0x21ef   :  { %v1241_v42 = vmul.f32 %v1239_v40, %v1233_v41 }
0x21f1   :  { %1243 = vrot.lane.b32.xlu1 %v1241_v42, %s1811_s1 }
0x2263   :  { %v1244_v45 = vpop.permute.xlu1 %1243 }
0x2264   :  { %v1246_v46 = vadd.f32 %v1244_v45, %v1236_v44 }
0x2266   :  { %1697 = vtanh.f32 %v1246_v46 }
0x226c   :  { %v1698_v47 = vpop.eup %1697 }
0x226d   :  { %1249 = vrot.lane.b32.xlu2 %v1698_v47, %s1810_s21 }
0x22c7   :  { %v1250_v0 = vpop.permute.xlu2 %1249 }
0x22c8   :  { %v1252_v49 = vmul.f32 %v1250_v0, %v1233_v41 }
0x22ca   :  { %v1253_v50 = vpack.c.bf16 %v1252_v49, %v1252_v49  ;;  %v1324_v51 = vrot.slane %v1252_v49, 4 }
0x22cc   :  { %v1336_v53 = vsel %vm1331_vm6, %v1335_v52, %v1324_v51  ;;  %1255 = vrot.lane.b32.xlu0 %v1253_v50, %s1811_s1 }
0x233e   :  { %v1256_v1 = vpop.permute.xlu0 %1255 }
0x233f   :  { %1538 = vmatmul.msk.bf16.vlgmr.msra.gmra.mxu3 %vm109_vm5, %v1256_v1 }
0x23c2   :  { %v1269_v54 = vpop.f32.mrf.mxu3 }
0x23c3   :  { %v1273_v4 = vadd.f32 %v1269_v54, %v2092_v43 }
0x23c5   :  { %1699 = vtanh.f32 %v1273_v4  ;;  %v1539_v58 = vmul.f32 -1.442695, %v1273_v4 }
0x23c7   :  { %1701 = vpow2.f32 %v1539_v58 }
0x23ca   :  { %v1271_v56 = vpop.f32.mrf.mxu3 }
0x23cb   :  { %v1700_v57 = vpop.eup %1699 }
0x23cc   :  { %1296 = vrot.lane.b32.xlu1 %v1700_v57, %s1810_s21 }
0x23cd   :  { %v1702_v59 = vpop.eup %1701 }
0x23ce   :  { %v1277_v60 = vadd.f32 1.0, %v1702_v59 }
0x23d0   :  { %1703 = vrcp.f32 %v1277_v60  ;;  %v1289_v2 = vand.u32 2147483648, %v1277_v60  ;;  %vm1283_vm6 = vweird.f32 %v1277_v60  ;;  %v1287_v7 = vand.u32 2147483647, %v1277_v60 }
0x23d2   :  { %v1290_v8 = vor.u32 1.1754944e-38, %v1289_v2  ;;  %vm1288_vm12 = vcmp.eq.f32.partialorder %v1287_v7, 8.507059e+37 }
0x23d6   :  { %v1704_v55 = vpop.eup %1703 }
0x23d7   :  { %v1279_v6 = vmul.f32 %v1704_v55, %v1277_v60  ;;  %vm1284_vm4 = vweird.f32 %v1704_v55 }
0x23d8   :  { %vm1285_vm11 = vmor %vm1283_vm6, %vm1284_vm4 }
0x23d9   :  { %v1280_v61 = vsub.f32 1.0, %v1279_v6 }
0x23db   :  { %v1281_v62 = vmul.f32 %v1704_v55, %v1280_v61 }
0x23dd   :  { %v1282_v63 = vadd.f32 %v1704_v55, %v1281_v62 }
0x23df   :  { %v1286_v43 = vsel %vm1285_vm11, %v1704_v55, %v1282_v63 }
0x23e0   :  { %v1291_v10 = vsel %vm1288_vm12, %v1290_v8, %v1286_v43 }
0x23e1   :  { %v1294_v3 = vmul.f32 %v1291_v10, %v1246_v46 }
0x243e   :  { %v1297_v9 = vpop.permute.xlu1 %1296 }
0x243f   :  { %v1299_v11 = vmul.f32 %v1297_v9, %v1291_v10 }
0x2441   :  { %1301 = vrot.lane.b32.xlu2 %v1299_v11, %s1811_s1 }
0x249b   :  { %v1302_v12 = vpop.permute.xlu2 %1301 }
0x249c   :  { %v1304_v13 = vadd.f32 %v1302_v12, %v1294_v3 }
0x249e   :  { %1705 = vtanh.f32 %v1304_v13 }
0x24a4   :  { %v1706_v14 = vpop.eup %1705 }
0x24a5   :  { %1307 = vrot.lane.b32.xlu0 %v1706_v14, %s1810_s21  ;;  %s1813_s21 = smov [#allocation4]  }
0x24a6   :  { %s1398_s29 = sshll.u32 %s1813_s21, 4  ;;  %s1399_s29 = int_to_ptr.vmem [resolvable:$true] %s1398_s29 }
0x24a7   :  { %1403 = dma.vmem_to_hbm [thread:$0]  %s1399_s29, 32, %s1401_s0, [#allocation5]  }
0x2517   :  { %v1308_v17 = vpop.permute.xlu0 %1307 }
0x2518   :  { %v1310_v18 = vmul.f32 %v1308_v17, %v1291_v10 }
0x251a   :  { %v1327_v19 = vrot.slane %v1310_v18, 2 }
0x251c   :  { %v1337_v20 = vsel %vm1333_vm10, %v1336_v53, %v1327_v19 }
0x251d   :  { %v1338_v21 = vpack.c.bf16 %v1337_v20, %v2129_v31  ;;  %v1576_v31 = vld [vmem:[%s2197_s11] ss:$0 sm:$0xff] }
0x251f   :  { %1348 = vrot.lane.b32.xlu1 %v1338_v21, %s1811_s1  ;;  %s1815_s1 = smov [#allocation6]  }
0x2520   :  { %s1411_s12 = sshll.u32 %s1815_s1, 4  ;;  %s1412_s12 = int_to_ptr.vmem [resolvable:$true] %s1411_s12 }
0x2521   :  { %1416 = dma.vmem_to_hbm [thread:$0]  %s1412_s12, 32, %s1414_s8, [#allocation5]  }
0x2591   :  { %v1349_v22 = vpop.permute.xlu1 %1348 }
0x2592   :  { %1548 = vmatmul.msk.bf16.vlgmr.msrb.gmra.mxu0 %vm109_vm5, %v1349_v22  ;;  %vm1379_vm5 = vcmask 195584  }
0x260f   :  { %v1374_v23 = vpop.f32.mrf.mxu0 }
0x2610   :  { %v1375_v24 = vadd.f32 %v1576_v31, %v1374_v23 }
0x2612   :  { %1380 = vst.msk [vmem:[#allocation7] sm:$0xff] %vm1379_vm5, %v1375_v24 }
0x2617   :  { %v1376_v25 = vpop.f32.mrf.mxu0 }
0x2618   :  { %v1377_v26 = vadd.f32 %v1576_v31, %v1376_v25 }
0x261a   :  { %1381 = vst.msk [vmem:[#allocation7 + $0x8] sm:$0xff] %vm1379_vm5, %v1377_v26 }
0x261b   :  { %1429 = dma.vmem_to_hbm [thread:$0]  %s1422_s25, 256, %s1424_s28, [#allocation8], %s1817_s19, %s1817_s19, %s1818_s15  }
0x261c   :  { %1803 = dma.done.wait [#allocation3], 32  }
0x261d   :  { %1804 = vsyncadd [#allocation3], 4294967264 }
0x261e   :  { %1805 = dma.done.wait [#allocation5], 64  }
0x261f   :  { %1806 = vsyncadd [#allocation5], 4294967232 }
0x2620   :  { %1807 = dma.done.wait [#allocation8], 256  }
0x2621   :  { %1808 = vsyncadd [#allocation8], 4294967040 }
0x2622   :  { %1448 = vsyncpa [#allocation3], 1 }
0x2623   :  { %1449 = vsyncpa [#allocation5], 1 }
0x2624   :  { %1450 = vsyncpa [#allocation8], 1 }

// kernel: guided_mlmh_forward.3
= control target key start
LH: loop header
LB: loop body
LE: loop exit
PB: predicated region body
PF: predicated region fallthrough
CT: control target
= control target key end

     0   :  { %s3516_s27 = smov 0   ;;  %s4376_s0 = inlined_call_operand.vmem [shape: f32[34,32], index: 0, kind: input, shape index: {}]   ;;  %s4377_s1 = inlined_call_operand.vmem [shape: f32[2,32], index: 1, kind: input, shape index: {}]   ;;  %s4378_s2 = inlined_call_operand.vmem [shape: bf16[2,32,96], index: 2, kind: input, shape index: {}]   ;;  %s4379_s3 = inlined_call_operand.vmem [shape: f32[2,1,96], index: 3, kind: input, shape index: {}]   ;;  %s4380_s4 = inlined_call_operand.vmem [shape: bf16[2,32,32], index: 4, kind: input, shape index: {}]   ;;  %s4381_s5 = inlined_call_operand.vmem [shape: f32[2,1,32], index: 5, kind: input, shape index: {}]   ;;  %s4382_s6 = inlined_call_operand.vmem [shape: f32[2,1,32], index: 6, kind: input, shape index: {}, may-alias: {6,16}]   ;;  %s4383_s7 = inlined_call_operand.vmem [shape: f32[2,1,32], index: 7, kind: input, shape index: {}, may-alias: {7,17}]   ;;  %s4384_s8 = inlined_call_operand.vmem [shape: bf16[2,32,128], index: 8, kind: input, shape index: {}]   ;;  %s4385_s9 = inlined_call_operand.vmem [shape: f32[2,1,128], index: 9, kind: input, shape index: {}]   ;;  %s4386_s10 = inlined_call_operand.vmem [shape: bf16[2,128,32], index: 10, kind: input, shape index: {}]   ;;  %s4387_s11 = inlined_call_operand.vmem [shape: f32[2,1,32], index: 11, kind: input, shape index: {}]   ;;  %s4388_s12 = inlined_call_operand.vmem [shape: bf16[2,32,32], index: 12, kind: input, shape index: {}]   ;;  %s4389_s13 = inlined_call_operand.vmem [shape: f32[2,1,32], index: 13, kind: input, shape index: {}]   ;;  %s4390_s14 = inlined_call_operand.vmem [shape: bf16[2,32,32], index: 14, kind: input, shape index: {}]   ;;  %s4391_s15 = inlined_call_operand.vmem [shape: f32[2,1,32], index: 15, kind: input, shape index: {}]   ;;  %s4392_s16 = inlined_call_operand.vmem [shape: f32[2,1,32], index: 16, kind: input, shape index: {}, may-alias: {6,16}]   ;;  %s4393_s17 = inlined_call_operand.vmem [shape: f32[2,1,32], index: 17, kind: input, shape index: {}, may-alias: {7,17}]   ;;  %s4394_s18 = inlined_call_operand.vmem [shape: f32[34,32], index: 18, kind: output, shape index: {}]  }
   0x1   :  { %4400 = sst [smem:[#allocation4_spill]] %s4376_s0 }
   0x2   :  { %4401 = sst [smem:[#allocation5_spill]] %s4377_s1 }
   0x3   :  { %4402 = sst [smem:[#allocation6_spill]] %s4378_s2 }
   0x4   :  { %4403 = sst [smem:[#allocation7_spill]] %s4379_s3 }
   0x5   :  { %4404 = sst [smem:[#allocation8_spill]] %s4380_s4 }
   0x6   :  { %4405 = sst [smem:[#allocation9_spill]] %s4384_s8 }
   0x7   :  { %4406 = sst [smem:[#allocation10_spill]] %s4386_s10 }
   0x8   :  { %4407 = sst [smem:[#allocation11_spill]] %s4387_s11 }
   0x9   :  { %4408 = sst [smem:[#allocation12_spill]] %s4388_s12 }
   0xa   :  { %4409 = sst [smem:[#allocation13_spill]] %s4392_s16 }
   0xb   :  { %4410 = sst [smem:[#allocation14_spill]] %s4393_s17 }
   0xc   :  { %4411 = sst [smem:[#allocation15_spill]] %s4394_s18 }
   0xd LB: > { %4412 = sst [smem:[#allocation2_spill]] %s3406_s27  ;;  %s3071_s28 = sadd.s32 4294967295, %s3406_s27   ;;  %s3406_s27 = sphi %s3516_s27, %s28_s27  }
   0xe   : > { %p3074_p0 = scmp.ge.s32.totalorder %s3406_s27, 1  ;;  %p637_p1 = scmp.lt.s32.totalorder %s3406_s27, 3 }
  0x10   : > { %p638_p2 = pnand %p3074_p0, %p637_p1 }
  0x12   : > { %641 = sbr.rel (%p638_p2) target bundleno = 3350 (0xd16), region = 92 }
  0x17   : > { %p741_p3 = scmp.lt.s32.totalorder %s3071_s28, 1  ;;  %s4414_s22 = sld [smem:[#allocation6_spill]] }
  0x18   : > { %s4415_s4 = sld [smem:[#allocation8_spill]]  ;;  %p3087_p4 = scmp.ne.s32.totalorder %s3071_s28, 0 }
  0x19   : > { %s3524_s29 = scalar_select %p741_p3, %s3071_s28, 1 }
  0x1a   : > { %s4417_s8 = sld [smem:[#allocation9_spill]] }
  0x1b   : > { %s3210_s30 = sshll.u32 %s3524_s29, 4  ;;  %s4418_s10 = sld [smem:[#allocation10_spill]] }
  0x1c   : > { %s4420_s12 = sld [smem:[#allocation12_spill]]  ;;  %s794_s26 = scalar_lea.vmem %s4391_s15, %s3524_s29 }
  0x1d   : > { %s3534_s2 = scalar_lea.vmem %s4414_s22, %s3210_s30  ;;  %s4421_s1 = sld [smem:[#allocation13_spill]] }
  0x1e   : > { %s3539_s25 = scalar_lea.vmem %s4415_s4, %s3210_s30  ;;  %s4423_s23 = sld [smem:[#allocation4_spill]] (!%p3087_p4) }
  0x1f   : > { %4416 = sst [smem:[#allocation3_spill]] %s3539_s25  ;;  %s3213_s25 = sshll.u32 %s3524_s29, 6 }
  0x20   : > { %s3556_s3 = scalar_lea.vmem %s4417_s8, %s3210_s30  ;;  %s3584_s8 = scalar_lea.vmem %s4390_s14, %s3210_s30 }
  0x21   : > { %s3566_s18 = scalar_lea.vmem %s4418_s10, %s3213_s25  ;;  %s4424_s16 = sld [smem:[#allocation15_spill]] (!%p3087_p4) }
  0x22   : > { %s3575_s21 = scalar_lea.vmem %s4420_s12, %s3210_s30  ;;  %s4422_s12 = sld [smem:[#allocation14_spill]] }
  0x23   : > { %s797_s10 = scalar_lea.vmem %s4421_s1, %s3524_s29 }
  0x24   : > { %805 = sbr.rel (%p3087_p4) target bundleno = 47 (0x2f), region = 96 }
  0x28   : > { %s800_s11 = scalar_lea.vmem %s4422_s12, %s3524_s29 }
  0x29   : > { %v806_v0 = vld [vmem:[%s4423_s23] sm:$0xff]  ;;  %vm811_vm0 = vcmask 261120   ;;  %v807_v1 = vld [vmem:[%s4423_s23 + $0x8] sm:$0xff]  ;;  %v808_v2 = vld [vmem:[%s4423_s23 + $0x10] sm:$0xff]  ;;  %vm816_vm1 = vcmask 254976  }
  0x2a   : > { %812 = vst.msk [vmem:[%s4424_s16] sm:$0xff] %vm811_vm0, %v806_v0  ;;  %v809_v3 = vld [vmem:[%s4423_s23 + $0x18] sm:$0xff]  ;;  %v810_v4 = vld [vmem:[%s4423_s23 + $0x20] sm:$0x3] }
  0x2b   : > { %813 = vst.msk [vmem:[%s4424_s16 + $0x8] sm:$0xff] %vm811_vm0, %v807_v1 }
  0x2c   : > { %814 = vst.msk [vmem:[%s4424_s16 + $0x10] sm:$0xff] %vm811_vm0, %v808_v2 }
  0x2d   : > { %815 = vst.msk [vmem:[%s4424_s16 + $0x18] sm:$0xff] %vm811_vm0, %v809_v3 }
  0x2e   : > { %817 = vst.msk [vmem:[%s4424_s16 + $0x20] sm:$0x3] %vm816_vm1, %v810_v4 }
  0x2f PF: > { %v3217_v5 = vld [vmem:[%s3534_s2 + $0x8] sm:$0xff]  ;;  %v3216_v6 = vld [vmem:[%s3534_s2] sm:$0xff]  ;;  %s4425_s28 = sld [smem:[#allocation15_spill]]  ;;  %vm846_vm2 = vcmask 261120   ;;  %s3408_s27 = smov 88   ;;  %vm896_vm4 = vcmask 64512  }
  0x30   : > { %862 = vmatpush.bf16.msra.mxu0 %v3217_v5  ;;  %3232 = vmatpush.bf16.msra.mxu3 %v3217_v5  ;;  %s4426_s25 = sld [smem:[#allocation7_spill]]  ;;  %s3409_s12 = smov 96   ;;  %vm1601_vm3 = vsmask.f32 7424  ;;  %vm927_vm5 = vcmask 138240   ;;  %vm934_vm6 = vcmask 131072  }
  0x31   : > { %s3410_s17 = smov 120   ;;  %s3411_s20 = smov 80   ;;  %vm1014_vm7 = vcmask 1040384  }
  0x32   : > { %s3412_s19 = smov 112   ;;  %s3413_s0 = smov 56  }
  0x33   : > { %s3415_s16 = smov 48   ;;  %s3416_s22 = smov 64  }
  0x34   : > { %863 = vmatpush.bf16.msra.mxu0 %v3216_v6  ;;  %3233 = vmatpush.bf16.msra.mxu3 %v3216_v6  ;;  %s3417_s2 = smov 72   ;;  %s3418_s4 = smov 104  }
  0x35   : > { %v818_v7 = vld [vmem:[%s4425_s28] sm:$0xff]  ;;  %v819_v8 = vld [vmem:[%s4425_s28 + $0x8] sm:$0xff]  ;;  %v820_v9 = vld [vmem:[%s4425_s28 + $0x10] sm:$0xff]  ;;  %s4430_s30 = sld [smem:[#allocation3_spill]]  ;;  %s3419_s24 = smov 40  }
  0x36   : > { %v821_v10 = vld [vmem:[%s4425_s28 + $0x18] sm:$0xff]  ;;  %v823_v11 = vpack.c.bf16 %v819_v8, %v818_v7  ;;  %v822_v13 = vld [vmem:[%s4425_s28 + $0x20] sm:$0x3]  ;;  %s4427_s1 = scalar_lea.vmem %s4426_s25, %s3524_s29  ;;  %s4432_s25 = scalar_lea.vmem %s4382_s6, %s3524_s29 }
  0x37   : > { %v824_v12 = vpack.c.bf16 %v821_v10, %v820_v9  ;;  %v825_v14 = vpack.c.bf16 %v822_v13, %v822_v13  ;;  %v3257_v16 = vld [vmem:[%s4427_s1] ss:$0 sm:$0xff] }
  0x38   : > { %3096 = vmatmul.msk.bf16.vlgmr.msra.gmra.mxu0 %vm846_vm2, %v823_v11 }
  0x39   : > { %3097 = vmatmul.msk.bf16.vlgmr.msra.gmra.mxu3 %vm846_vm2, %v824_v12 }
  0x49   : > { %3098 = vmatmul.msk.bf16.gmra.mxu3 %vm846_vm2, %v825_v14 }
  0xb5   : > { %v865_v15 = vpop.f32.mrf.mxu0 }
  0xb6   : > { %v866_v18 = vadd.f32 %v3257_v16, %v865_v15 }
  0xb8   : > { %v883_v23 = vmul.f32 0.35355338, %v866_v18 }
  0xbc   : > { %v870_v17 = vpop.f32.mrf.mxu3 }
  0xbd   : > { %v871_v19 = vadd.f32 %v3257_v16, %v870_v17  ;;  %v867_v20 = vpop.f32.mrf.mxu0 }
  0xbe   : > { %v868_v22 = vadd.f32 %v3257_v16, %v867_v20 }
  0xbf   : > { %v3653_v21 = vpack.c.bf16 %v871_v19, %v871_v19  ;;  %v885_v29 = vmul.f32 0.35355338, %v871_v19 }
  0xc0   : > { %v884_v24 = vmul.f32 0.35355338, %v868_v22  ;;  %v3655_v25 = vpack.c.bf16 %v868_v22, %v866_v18 }
  0xc1   : > { %1048 = vrot.lane.b32.xlu0 %v3653_v21, %s3408_s27  ;;  %v3671_v37 = vpack.c.bf16 %v885_v29, %v885_v29 }
  0xc2   : > { %v3659_v26 = vpack.c.bf16 %v884_v24, %v883_v23  ;;  %892 = vrot.lane.b32.xlu2 %v3655_v25, %s3409_s12 }
  0xc4   : > { %v872_v27 = vpop.f32.mrf.mxu3  ;;  %1042 = vrot.lane.b32.xlu1 %v3659_v26, %s3410_s17 }
  0xc5   : > { %v873_v28 = vadd.f32 %v3257_v16, %v872_v27 }
  0xc7   : > { %v1595_v30 = vmul.f32 0.35355338, %v873_v28  ;;  %v1599_v31 = vpack.c.bf16 %v873_v28, %v871_v19 }
  0xc9   : > { %v1597_v32 = vpack.c.bf16 %v1595_v30, %v885_v29  ;;  %1046 = vrot.lane.b32.xlu0 %v3655_v25, %s3408_s27  ;;  %v1619_v33 = vshll.u32 %v1599_v31, 16  ;;  %v1617_v42 = vshrl.u32 %v1599_v31, 16 }
  0xca   : > { %1249 = vrot.lane.b32.xlu2 %v3653_v21, %s3411_s20 }
  0xcb   : > { %v1605_v35 = vshll.u32 %v1597_v32, 16  ;;  %v1621_v38 = vrot.slane %v1619_v33, 1  ;;  %v1603_v45 = vshrl.u32 %v1597_v32, 16 }
  0xcc   : > { %v875_v34 = vpop.f32.mrf.mxu3  ;;  %894 = vrot.lane.b32.xlu1 %v3653_v21, %s3409_s12 }
  0xcd   : > { %v876_v36 = vadd.f32 %v3257_v16, %v875_v34  ;;  %v1607_v41 = vrot.slane %v1605_v35, 1  ;;  %v1622_v46 = vor.u32 %v1621_v38, %v1617_v42 }
  0xcf   : > { %v1596_v39 = vmul.f32 0.35355338, %v876_v36  ;;  %v3673_v40 = vpack.c.bf16 %v876_v36, %v876_v36  ;;  %v1608_v50 = vor.u32 %v1607_v41, %v1603_v45  ;;  %v3414_v45 = vmov 0  }
  0xd1   : > { %v3675_v43 = vpack.c.bf16 %v1596_v39, %v1596_v39  ;;  %v1624_v44 = vshll.u32 %v3673_v40, 16  ;;  %1044 = vrot.lane.b32.xlu0 %v3671_v37, %s3410_s17 }
  0xd2   : > { %1243 = vrot.lane.b32.xlu2 %v3659_v26, %s3412_s19 }
  0xd3   : > { %v1610_v47 = vshll.u32 %v3675_v43, 16  ;;  %v1626_v48 = vrot.slane %v1624_v44, 1 }
  0xd4   : > { %v877_v49 = vpop.f32.mrf.mxu3  ;;  %1247 = vrot.lane.b32.xlu1 %v3655_v25, %s3411_s20 }
  0xd5   : > { %v1612_v51 = vrot.slane %v1610_v47, 1  ;;  %v3683_v52 = vsel %vm1601_vm3, %v1622_v46, %v1626_v48  ;;  %v3730_v46 = vsel %vm1014_vm7, 65535, %v3414_v45 }
  0xd7   : > { %v3687_v53 = vsel %vm1601_vm3, %v1608_v50, %v1612_v51 }
  0xd9   : > { %1245 = vrot.lane.b32.xlu0 %v3671_v37, %s3412_s19 }
 0x11c   : > { %v893_v58 = vpop.permute.xlu2 %892 }
 0x11d   : > { %v904_v63 = vsel %vm896_vm4, %v893_v58, 0 }
 0x124   : > { %v1250_v62 = vpop.permute.xlu2 %1249 }
 0x125   : > { %v1261_v0 = vsel %vm896_vm4, %v1250_v62, 0 }
 0x12c   : > { %v1244_v4 = vpop.permute.xlu2 %1243 }
 0x133   : > { %v1049_v54 = vpop.permute.xlu0 %1048 }
 0x134   : > { %v1060_v55 = vsel %vm896_vm4, %v1049_v54, 0 }
 0x135   : > { %1068 = vmatpush.bf16.xpose.msrb.mxu3 %v1060_v55 }
 0x136   : > { %v1043_v56 = vpop.permute.xlu1 %1042 }
 0x13b   : > { %v1047_v57 = vpop.permute.xlu0 %1046 }
 0x13c   : > { %v1057_v59 = vsel %vm896_vm4, %v1047_v57, 0 }
 0x13d   : > { %1069 = vmatpush.bf16.xpose.msrb.mxu3 %v1057_v59 }
 0x13e   : > { %v895_v60 = vpop.permute.xlu1 %894 }
 0x13f   : > { %v907_v61 = vsel %vm896_vm4, %v895_v60, 0 }
 0x140   : > { %915 = vmatpush.bf16.xpose.msrb.mxu0 %v907_v61  ;;  %3234 = vmatpush.bf16.xpose.msra.mxu1 %v907_v61 }
 0x143   : > { %v1045_v3 = vpop.permute.xlu0 %1044 }
 0x144   : > { %3103 = vmatmul.msk.bf16.vlgmr.msrb.gmra.mxu3 %vm896_vm4, %v1043_v56 }
 0x146   : > { %v1248_v1 = vpop.permute.xlu1 %1247 }
 0x147   : > { %v1258_v2 = vsel %vm896_vm4, %v1248_v1, 0 }
 0x148   : > { %916 = vmatpush.bf16.xpose.msrb.mxu0 %v904_v63  ;;  %3235 = vmatpush.bf16.xpose.msra.mxu1 %v904_v63 }
 0x14b   : > { %v1246_v5 = vpop.permute.xlu0 %1245 }
 0x14f   : > { %3099 = vmatmul.msk.bf16.vlgmr.msrb.gmra.mxu0 %vm896_vm4, %v3659_v26  ;;  %3100 = vmatmul.msk.bf16.vlgmr.msra.gmra.mxu1 %vm896_vm4, %v3671_v37 }
 0x150   : > { %1269 = vmatpush.bf16.xpose.msra.mxu0 %v1261_v0 }
 0x154   : > { %3104 = vmatmul.msk.bf16.gmra.mxu3 %vm896_vm4, %v1045_v3 }
 0x158   : > { %1270 = vmatpush.bf16.xpose.msra.mxu0 %v1258_v2 }
 0x15f   : > { %3111 = vmatmul.msk.bf16.vlgmr.msra.gmra.mxu0 %vm896_vm4, %v1244_v4 }
 0x16f   : > { %3112 = vmatmul.msk.bf16.gmra.mxu0 %vm896_vm4, %v1246_v5 }
 0x1c7   : > { %v1071_v6 = vpop.f32.mrf.mxu3 }
 0x1c8   : > { %v1080_v7 = vsel %vm927_vm5, %v1071_v6, -inf }
 0x1c9   : > { %1081 = vmax.xlane.f32.xlu1 %v1080_v7 }
 0x1cc   : > { %v3706_v8 = vpop.f32.mrf.mxu0  ;;  %v3708_v9 = vpop.f32.mrf.mxu1 }
 0x1cd   : > { %v935_v2 = vsel %vm934_vm6, %v3708_v9, -inf  ;;  %v928_v4 = vsel %vm927_vm5, %v3706_v8, -inf }
 0x1cf   : > { %v1073_v10 = vpop.f32.mrf.mxu3 }
 0x1d0   : > { %v1083_v11 = vsel %vm927_vm5, %v1073_v10, -inf }
 0x1d1   : > { %1084 = vmax.xlane.f32.xlu2 %v1083_v11 }
 0x1d4   : > { %v3711_v12 = vpop.f32.mrf.mxu0  ;;  %v925_v13 = vpop.f32.mrf.mxu1 }
 0x1d5   : > { %v931_v5 = vsel %vm927_vm5, %v3711_v12, -inf }
 0x1d7   : > { %v1076_v14 = vpop.f32.mrf.mxu3 }
 0x1d8   : > { %v1086_v15 = vsel %vm934_vm6, %v1076_v14, -inf }
 0x1d9   : > { %1087 = vmax.xlane.f32.xlu0 %v1086_v15 }
 0x1dc   : > { %v1272_v16 = vpop.f32.mrf.mxu0 }
 0x1dd   : > { %v1281_v17 = vsel %vm927_vm5, %v1272_v16, -inf }
 0x1de   : > { %1282 = vmax.xlane.f32.xlu2 %v1281_v17 }
 0x1df   : > { %v1078_v18 = vpop.f32.mrf.mxu3 }
 0x1e4   : > { %v1274_v19 = vpop.f32.mrf.mxu0 }
 0x1e5   : > { %v1284_v20 = vsel %vm927_vm5, %v1274_v19, -inf }
 0x1e6   : > { %1285 = vmax.xlane.f32.xlu1 %v1284_v20 }
 0x1ec   : > { %v1277_v22 = vpop.f32.mrf.mxu0 }
 0x1ed   : > { %v1287_v23 = vsel %vm934_vm6, %v1277_v22, -inf }
 0x1ee   : > { %1288 = vmax.xlane.f32.xlu1 %v1287_v23 }
 0x1f4   : > { %v1279_v24 = vpop.f32.mrf.mxu0 }
 0x1f6   : > { %1156 = vrot.lane.b32.xlu2 %v3653_v21, %s3413_s0 }
 0x207   : > { %1154 = vrot.lane.b32.xlu1 %v3655_v25, %s3413_s0 }
 0x23c   : > { %v1082_v27 = vpop.xlane.xlu1 %1081 }
 0x23d   : > { %v1089_v28 = vsub.f32 %v1071_v6, %v1082_v27 }
 0x23f   : > { %v1092_v29 = vmul.f32 1.442695, %v1089_v28 }
 0x241   : > { %3267 = vpow2.f32 %v1092_v29 }
 0x244   : > { %v1085_v30 = vpop.xlane.xlu2 %1084 }
 0x245   : > { %v1090_v31 = vsub.f32 %v1073_v10, %v1085_v30 }
 0x247   : > { %v3721_v32 = vpop.eup %3267  ;;  %v1094_v33 = vmul.f32 1.442695, %v1090_v31 }
 0x248   : > { %v1098_v34 = vsel %vm927_vm5, %v3721_v32, 0.0 }
 0x249   : > { %3269 = vpow2.f32 %v1094_v33  ;;  %1099 = vadd.xlane.f32.xlu2 %v1098_v34 }
 0x24c   : > { %v1088_v38 = vpop.xlane.xlu0 %1087 }
 0x24d   : > { %v1091_v42 = vsub.f32 %v1076_v14, %v1088_v38 }
 0x24f   : > { %v3725_v35 = vpop.eup %3269  ;;  %v1096_v47 = vmul.f32 1.442695, %v1091_v42 }
 0x250   : > { %v1101_v36 = vsel %vm927_vm5, %v3725_v35, 0.0 }
 0x251   : > { %1102 = vadd.xlane.f32.xlu0 %v1101_v36  ;;  %v1283_v39 = vpop.xlane.xlu2 %1282 }
 0x252   : > { %v1290_v41 = vsub.f32 %v1272_v16, %v1283_v39 }
 0x254   : > { %v1293_v44 = vmul.f32 1.442695, %v1290_v41 }
 0x256   : > { %3271 = vpow2.f32 %v1293_v44 }
 0x257   : > { %3273 = vpow2.f32 %v1096_v47 }
 0x259   : > { %v1157_v48 = vpop.permute.xlu2 %1156  ;;  %v1286_v49 = vpop.xlane.xlu1 %1285 }
 0x25a   : > { %v1166_v50 = vand.u32 %v1157_v48, %v3730_v46  ;;  %v1291_v54 = vsub.f32 %v1274_v19, %v1286_v49 }
 0x25c   : > { %v3733_v51 = vpop.eup %3271  ;;  %1174 = vmatpush.bf16.msra.mxu2 %v1166_v50  ;;  %v1295_v56 = vmul.f32 1.442695, %v1291_v54 }
 0x25d   : > { %v1299_v55 = vsel %vm927_vm5, %v3733_v51, 0.0  ;;  %v3739_v58 = vpop.eup %3273 }
 0x25e   : > { %1300 = vadd.xlane.f32.xlu0 %v1299_v55  ;;  %3275 = vpow2.f32 %v1295_v56  ;;  %v1104_v61 = vsel %vm934_vm6, %v3739_v58, 0.0 }
 0x261   : > { %1357 = vrot.lane.b32.xlu2 %v3653_v21, %s3415_s16  ;;  %v1289_v57 = vpop.xlane.xlu1 %1288 }
 0x262   : > { %v1292_v59 = vsub.f32 %v1277_v22, %v1289_v57 }
 0x264   : > { %v1297_v60 = vmul.f32 1.442695, %v1292_v59  ;;  %v3743_v62 = vpop.eup %3275 }
 0x265   : > { %v1302_v0 = vsel %vm927_vm5, %v3743_v62, 0.0 }
 0x266   : > { %3277 = vpow2.f32 %v1297_v60  ;;  %1105 = vadd.xlane.f32.xlu0 %v1104_v61 }
 0x26c   : > { %v3745_v63 = vpop.eup %3277 }
 0x26d   : > { %v1305_v1 = vsel %vm934_vm6, %v3745_v63, 0.0 }
 0x26e   : > { %1303 = vadd.xlane.f32.xlu0 %v1302_v0  ;;  %1306 = vadd.xlane.f32.xlu1 %v1305_v1 }
 0x276   : > { %936 = vmax.xlane.f32.xlu1 %v935_v2 }
 0x279   : > { %v1155_v3 = vpop.permute.xlu1 %1154 }
 0x27a   : > { %1175 = vmatpush.bf16.msra.mxu2 %v1155_v3 }
 0x282   : > { %1355 = vrot.lane.b32.xlu0 %v3655_v25, %s3415_s16 }
 0x28a   : > { %929 = vmax.xlane.f32.xlu2 %v928_v4 }
 0x2ac   : > { %932 = vmax.xlane.f32.xlu0 %v931_v5 }
 0x2bc   : > { %v1100_v6 = vpop.xlane.xlu2 %1099 }
 0x2bd   : > { %3279 = vrcp.f32 %v1100_v6  ;;  %v1118_v20 = vand.u32 2147483648, %v1100_v6  ;;  %vm1112_vm9 = vweird.f32 %v1100_v6  ;;  %v1116_v22 = vand.u32 2147483647, %v1100_v6 }
 0x2bf   : > { %v1119_v31 = vor.u32 1.1754944e-38, %v1118_v20  ;;  %vm1117_vm12 = vcmp.eq.f32.partialorder %v1116_v22, 8.507059e+37 }
 0x2c0   : > { %1003 = vrot.lane.b32.xlu0 %v3655_v25, %s3416_s22 }
 0x2c3   : > { %v3280_v7 = vpop.eup %3279 }
 0x2c4   : > { %v1108_v10 = vmul.f32 %v3280_v7, %v1100_v6  ;;  %v1103_v11 = vpop.xlane.xlu0 %1102  ;;  %v1358_v13 = vpop.permute.xlu2 %1357  ;;  %vm1113_vm8 = vweird.f32 %v3280_v7 }
 0x2c5   : > { %3281 = vrcp.f32 %v1103_v11  ;;  %v1367_v15 = vand.u32 %v1358_v13, %v3730_v46  ;;  %vm3764_vm10 = vmor %vm1112_vm9, %vm1113_vm8  ;;  %v1133_v27 = vand.u32 2147483648, %v1103_v11  ;;  %v1131_v29 = vand.u32 2147483647, %v1103_v11 }
 0x2c6   : > { %v1109_v14 = vsub.f32 1.0, %v1108_v10  ;;  %vm1127_vm13 = vweird.f32 %v1103_v11 }
 0x2c7   : > { %1375 = vmatpush.bf16.msrb.mxu2 %v1367_v15  ;;  %v1134_v36 = vor.u32 1.1754944e-38, %v1133_v27  ;;  %vm1132_vm15 = vcmp.eq.f32.partialorder %v1131_v29, 8.507059e+37 }
 0x2c8   : > { %v1110_v16 = vmul.f32 %v3280_v7, %v1109_v14  ;;  %1425 = vrot.lane.b32.xlu0 %v3653_v21, %s3417_s2 }
 0x2ca   : > { %v1111_v18 = vadd.f32 %v3280_v7, %v1110_v16 }
 0x2cb   : > { %v3282_v17 = vpop.eup %3281 }
 0x2cc   : > { %v1123_v19 = vmul.f32 %v3282_v17, %v1103_v11  ;;  %vm1128_vm11 = vweird.f32 %v3282_v17  ;;  %v1115_v30 = vsel %vm3764_vm10, %v3280_v7, %v1111_v18 }
 0x2cd   : > { %vm1129_vm14 = vmor %vm1127_vm13, %vm1128_vm11  ;;  %v1120_v38 = vsel %vm1117_vm12, %v1119_v31, %v1115_v30 }
 0x2ce   : > { %v1124_v23 = vsub.f32 1.0, %v1123_v19  ;;  %v1121_v42 = vmul.f32 %v3721_v32, %v1120_v38 }
 0x2d0   : > { %v1125_v28 = vmul.f32 %v3282_v17, %v1124_v23  ;;  %1419 = vrot.lane.b32.xlu0 %v3659_v26, %s3418_s4 }
 0x2d1   : > { %v3772_v34 = vpop.xlane.xlu0 %1300 }
 0x2d2   : > { %v1126_v33 = vadd.f32 %v3282_v17, %v1125_v28  ;;  %vm1313_vm13 = vweird.f32 %v3772_v34 }
 0x2d4   : > { %v1130_v39 = vsel %vm1129_vm14, %v3282_v17, %v1126_v33  ;;  %v1319_v17 = vand.u32 2147483648, %v3772_v34 }
 0x2d5   : > { %v1135_v41 = vsel %vm1132_vm15, %v1134_v36, %v1130_v39 }
 0x2d6   : > { %v1136_v44 = vmul.f32 %v3725_v35, %v1135_v41  ;;  %v1320_v24 = vor.u32 1.1754944e-38, %v1319_v17 }
 0x2d8   : > { %v1152_v45 = vpack.c.bf16 %v1136_v44, %v1121_v42 }
 0x2d9   : > { %v1106_v47 = vpop.xlane.xlu0 %1105 }
 0x2da   : > { %3105 = vmatmul.msk.bf16.vlgmr.msra.gmra.mxu2 %vm927_vm5, %v1152_v45  ;;  %3283 = vrcp.f32 %v1106_v47  ;;  %v1148_v55 = vand.u32 2147483648, %v1106_v47  ;;  %v1146_v32 = vand.u32 2147483647, %v1106_v47  ;;  %vm1142_vm1 = vweird.f32 %v1106_v47 }
 0x2db   : > { %3285 = vrcp.f32 %v3772_v34 }
 0x2dc   : > { %v1149_v61 = vor.u32 1.1754944e-38, %v1148_v55  ;;  %vm1147_vm8 = vcmp.eq.f32.partialorder %v1146_v32, 8.507059e+37 }
 0x2e0   : > { %v3284_v26 = vpop.eup %3283 }
 0x2e1   : > { %v1138_v48 = vmul.f32 %v3284_v26, %v1106_v47  ;;  %v1304_v49 = vpop.xlane.xlu0 %1303  ;;  %v3286_v50 = vpop.eup %3285  ;;  %vm1143_vm0 = vweird.f32 %v3284_v26 }
 0x2e2   : > { %3287 = vrcp.f32 %v1304_v49  ;;  %v1309_v56 = vmul.f32 %v3286_v50, %v3772_v34  ;;  %v1307_v35 = vpop.xlane.xlu1 %1306  ;;  %vm1144_vm3 = vmor %vm1142_vm1, %vm1143_vm0  ;;  %v1334_v14 = vand.u32 2147483648, %v1304_v49  ;;  %vm1314_vm10 = vweird.f32 %v3286_v50 }
 0x2e3   : > { %v1139_v54 = vsub.f32 1.0, %v1138_v48  ;;  %3289 = vrcp.f32 %v1307_v35  ;;  %vm1328_vm11 = vweird.f32 %v1304_v49  ;;  %v1332_v16 = vand.u32 2147483647, %v1304_v49  ;;  %vm1315_vm14 = vmor %vm1313_vm13, %vm1314_vm10 }
 0x2e4   : > { %v1310_v0 = vsub.f32 1.0, %v1309_v56  ;;  %v1335_v20 = vor.u32 1.1754944e-38, %v1334_v14  ;;  %v1349_v42 = vand.u32 2147483648, %v1307_v35  ;;  %v1347_v44 = vand.u32 2147483647, %v1307_v35 }
 0x2e5   : > { %v1140_v57 = vmul.f32 %v3284_v26, %v1139_v54  ;;  %vm1333_vm15 = vcmp.eq.f32.partialorder %v1332_v16, 8.507059e+37  ;;  %vm1194_vm10 = vcmask 1043456  }
 0x2e6   : > { %v1311_v6 = vmul.f32 %v3286_v50, %v1310_v0 }
 0x2e7   : > { %v1141_v59 = vadd.f32 %v3284_v26, %v1140_v57 }
 0x2e8   : > { %v3288_v60 = vpop.eup %3287  ;;  %v1312_v15 = vadd.f32 %v3286_v50, %v1311_v6 }
 0x2e9   : > { %v1324_v1 = vmul.f32 %v3288_v60, %v1304_v49  ;;  %v1145_v2 = vsel %vm1144_vm3, %v3284_v26, %v1141_v59  ;;  %vm1329_vm9 = vweird.f32 %v3288_v60  ;;  %v3290_v13 = vpop.eup %3289  ;;  %vm1343_vm3 = vweird.f32 %v1307_v35  ;;  %v879_v49 = vld [vmem:[%s4430_s30] sm:$0xf] }
 0x2ea   : > { %v1150_v3 = vsel %vm1147_vm8, %v1149_v61, %v1145_v2  ;;  %vm1330_vm12 = vmor %vm1328_vm11, %vm1329_vm9  ;;  %v1339_v19 = vmul.f32 %v3290_v13, %v1307_v35  ;;  %v1316_v23 = vsel %vm1315_vm14, %v3286_v50, %v1312_v15  ;;  %vm1344_vm1 = vweird.f32 %v3290_v13  ;;  %v937_v54 = vpop.xlane.xlu1 %936 }
 0x2eb   : > { %v1325_v4 = vsub.f32 1.0, %v1324_v1  ;;  %v1151_v5 = vmul.f32 %v3739_v58, %v1150_v3  ;;  %v1317_v58 = vand.u32 2147483647, %v3772_v34  ;;  %vm1345_vm8 = vmor %vm1343_vm3, %vm1344_vm1  ;;  %vm1348_vm9 = vcmp.eq.f32.partialorder %v1347_v44, 8.507059e+37 }
 0x2ec   : > { %v1340_v28 = vsub.f32 1.0, %v1339_v19  ;;  %v3796_v50 = vsel %vm1194_vm10, %v879_v49, 0  ;;  %v940_v57 = vsub.f32 %v3708_v9, %v937_v54  ;;  %v3817_v1 = vshrl.u32 %v3673_v40, 16 }
 0x2ed   : > { %v1326_v7 = vmul.f32 %v3288_v60, %v1325_v4  ;;  %v1153_v10 = vpack.c.bf16 %v1151_v5, %v1151_v5  ;;  %vm1318_vm0 = vcmp.eq.f32.partialorder %v1317_v58, 8.507059e+37  ;;  %1232 = vmatpush.bf16.msra.mxu3 %v3796_v50 }
 0x2ee   : > { %v1321_v29 = vsel %vm1318_vm0, %v1320_v24, %v1316_v23  ;;  %v1341_v31 = vmul.f32 %v3290_v13, %v1340_v28  ;;  %v945_v32 = vmul.f32 1.442695, %v940_v57 }
 0x2ef   : > { %v1327_v11 = vadd.f32 %v3288_v60, %v1326_v7  ;;  %3106 = vmatmul.msk.bf16.gmra.mxu2 %vm927_vm5, %v1153_v10  ;;  %v1322_v33 = vmul.f32 %v3733_v51, %v1321_v29 }
 0x2f0   : > { %v1342_v41 = vadd.f32 %v3290_v13, %v1341_v31 }
 0x2f1   : > { %v1331_v18 = vsel %vm1330_vm12, %v3288_v60, %v1327_v11 }
 0x2f2   : > { %v1336_v27 = vsel %vm1333_vm15, %v1335_v20, %v1331_v18  ;;  %v1346_v45 = vsel %vm1345_vm8, %v3290_v13, %v1342_v41  ;;  %v880_v20 = vld [vmem:[%s4430_s30 + $0x4] sm:$0xf] }
 0x2f3   : > { %v1337_v30 = vmul.f32 %v3743_v62, %v1336_v27  ;;  %v1350_v62 = vor.u32 1.1754944e-38, %v1349_v42 }
 0x2f4   : > { %v1356_v22 = vpop.permute.xlu0 %1355 }
 0x2f5   : > { %1376 = vmatpush.bf16.msrb.mxu2 %v1356_v22  ;;  %v1353_v38 = vpack.c.bf16 %v1337_v30, %v1322_v33  ;;  %v1351_v47 = vsel %vm1348_vm9, %v1350_v62, %v1346_v45  ;;  %v3841_v22 = vsel %vm1194_vm10, %v880_v20, 0 }
 0x2f6   : > { %v1352_v26 = vmul.f32 %v3745_v63, %v1351_v47 }
 0x2f8   : > { %v1354_v48 = vpack.c.bf16 %v1352_v26, %v1352_v26 }
 0x2fd   : > { %v930_v36 = vpop.xlane.xlu2 %929 }
 0x2fe   : > { %v938_v34 = vsub.f32 %v3706_v8, %v930_v36 }
 0x2ff   : > { %3113 = vmatmul.msk.bf16.vlgmr.msrb.gmra.mxu2 %vm927_vm5, %v1353_v38 }
 0x300   : > { %v941_v39 = vmul.f32 1.442695, %v938_v34 }
 0x302   : > { %3291 = vpow2.f32 %v941_v39 }
 0x308   : > { %v3788_v51 = vpop.eup %3291 }
 0x309   : > { %v947_v8 = vsel %vm927_vm5, %v3788_v51, 0.0 }
 0x30a   : > { %948 = vadd.xlane.f32.xlu2 %v947_v8 }
 0x30f   : > { %3114 = vmatmul.msk.bf16.gmra.mxu2 %vm927_vm5, %v1354_v48  ;;  %v881_v48 = vld [vmem:[%s4430_s30 + $0x8] sm:$0xf] }
 0x31f   : > { %v933_v55 = vpop.xlane.xlu0 %932 }
 0x320   : > { %v939_v56 = vsub.f32 %v3711_v12, %v933_v55 }
 0x322   : > { %1005 = vrot.lane.b32.xlu2 %v3653_v21, %s3416_s22  ;;  %v943_v63 = vmul.f32 1.442695, %v939_v56 }
 0x324   : > { %3293 = vpow2.f32 %v943_v63  ;;  %v1396_v63 = vsel %vm1194_vm10, %v881_v48, 0 }
 0x325   : > { %3295 = vpow2.f32 %v945_v32 }
 0x32a   : > { %1630 = vrot.lane.b32.xlu2 %v3683_v52, %s3409_s12  ;;  %v3805_v35 = vpop.eup %3293 }
 0x32b   : > { %v950_v59 = vsel %vm927_vm5, %v3805_v35, 0.0  ;;  %v3809_v60 = vpop.eup %3295 }
 0x32c   : > { %951 = vadd.xlane.f32.xlu1 %v950_v59  ;;  %v953_v9 = vsel %vm934_vm6, %v3809_v60, 0.0 }
 0x332   : > { %1423 = vrot.lane.b32.xlu2 %v3655_v25, %s3417_s2  ;;  %v1004_v12 = vpop.permute.xlu0 %1003 }
 0x334   : > { %954 = vadd.xlane.f32.xlu1 %v953_v9 }
 0x33a   : > { %v1426_v61 = vpop.permute.xlu0 %1425 }
 0x33b   : > { %v1437_v0 = vsel %vm896_vm4, %v1426_v61, 0 }
 0x33c   : > { %1445 = vmatpush.bf16.xpose.msrb.mxu3 %v1437_v0 }
 0x34d   : > { %1632 = vrot.lane.b32.xlu1 %v3817_v1, %s3409_s12  ;;  %s4433_s12 = scalar_lea.vmem %s4383_s7, %s3524_s29 }
 0x355   : > { %1421 = vrot.lane.b32.xlu1 %v3671_v37, %s3418_s4 }
 0x35d   : > { %v3823_v2 = vpop.f32.mrf.mxu2 }
 0x365   : > { %v3825_v3 = vpop.f32.mrf.mxu2 }
 0x372   : > { %v3827_v4 = vpop.f32.mrf.mxu2 }
 0x37a   : > { %v1184_v5 = vpop.f32.mrf.mxu2 }
 0x37d   : > { %v949_v6 = vpop.xlane.xlu2 %948 }
 0x37e   : > { %3297 = vrcp.f32 %v949_v6  ;;  %v967_v30 = vand.u32 2147483648, %v949_v6  ;;  %vm961_vm12 = vweird.f32 %v949_v6  ;;  %v965_v31 = vand.u32 2147483647, %v949_v6 }
 0x380   : > { %v968_v41 = vor.u32 1.1754944e-38, %v967_v30  ;;  %vm966_vm15 = vcmp.eq.f32.partialorder %v965_v31, 8.507059e+37 }
 0x382   : > { %v3829_v7 = vpop.f32.mrf.mxu2 }
 0x384   : > { %v3298_v16 = vpop.eup %3297 }
 0x385   : > { %v1006_v10 = vpop.permute.xlu2 %1005  ;;  %v957_v58 = vmul.f32 %v3298_v16, %v949_v6  ;;  %vm962_vm11 = vweird.f32 %v3298_v16  ;;  %v1186_v6 = vpack.c.bf16 %v3825_v3, %v3823_v2  ;;  %v3870_v3 = vshrl.u32 %v3675_v43, 16 }
 0x386   : > { %v1018_v40 = vand.u32 %v3730_v46, %v1006_v10  ;;  %vm963_vm13 = vmor %vm961_vm12, %vm962_vm11 }
 0x387   : > { %v958_v18 = vsub.f32 1.0, %v957_v58  ;;  %v1420_v58 = vpop.permute.xlu0 %1419 }
 0x388   : > { %1026 = vmatpush.bf16.msrb.mxu1 %v1018_v40 }
 0x389   : > { %v959_v23 = vmul.f32 %v3298_v16, %v958_v18 }
 0x38a   : > { %v3832_v11 = vpop.f32.mrf.mxu2 }
 0x38b   : > { %v960_v27 = vadd.f32 %v3298_v16, %v959_v23 }
 0x38c   : > { %1027 = vmatpush.bf16.msrb.mxu1 %v1004_v12 }
 0x38d   : > { %v3834_v13 = vpop.permute.xlu2 %1630  ;;  %v964_v34 = vsel %vm963_vm13, %v3298_v16, %v960_v27 }
 0x38e   : > { %v969_v62 = vsel %vm966_vm15, %v968_v41, %v964_v34  ;;  %v1641_v40 = vsel %vm896_vm4, %v3834_v13, 0 }
 0x38f   : > { %v970_v54 = vmul.f32 %v3788_v51, %v969_v62 }
 0x390   : > { %1205 = vmatpush.bf16.msra.mxu1 %v3841_v22 }
 0x392   : > { %v3836_v37 = vpop.f32.mrf.mxu2 }
 0x393   : > { %v1388_v2 = vpack.c.bf16 %v3836_v37, %v3836_v37 }
 0x395   : > { %v1424_v14 = vpop.permute.xlu2 %1423 }
 0x396   : > { %v1434_v15 = vsel %vm896_vm4, %v1424_v14, 0  ;;  %v1187_v14 = vpack.c.bf16 %v3827_v4, %v3827_v4 }
 0x397   : > { %1446 = vmatpush.bf16.xpose.msrb.mxu3 %v1434_v15 }
 0x39a   : > { %v1385_v17 = vpop.f32.mrf.mxu2 }
 0x39f   : > { %v952_v19 = vpop.xlane.xlu1 %951 }
 0x3a0   : > { %3299 = vrcp.f32 %v952_v19  ;;  %v982_v36 = vand.u32 2147483648, %v952_v19  ;;  %v980_v39 = vand.u32 2147483647, %v952_v19  ;;  %vm976_vm0 = vweird.f32 %v952_v19 }
 0x3a2   : > { %v983_v45 = vor.u32 1.1754944e-38, %v982_v36  ;;  %vm981_vm3 = vcmp.eq.f32.partialorder %v980_v39, 8.507059e+37 }
 0x3a6   : > { %v3300_v24 = vpop.eup %3299 }
 0x3a7   : > { %v972_v28 = vmul.f32 %v3300_v24, %v952_v19  ;;  %v955_v29 = vpop.xlane.xlu1 %954  ;;  %vm977_vm14 = vweird.f32 %v3300_v24 }
 0x3a8   : > { %3301 = vrcp.f32 %v955_v29  ;;  %vm978_vm1 = vmor %vm976_vm0, %vm977_vm14  ;;  %v997_v59 = vand.u32 2147483648, %v955_v29  ;;  %vm991_vm9 = vweird.f32 %v955_v29  ;;  %v995_v12 = vand.u32 2147483647, %v955_v29 }
 0x3a9   : > { %v973_v33 = vsub.f32 1.0, %v972_v28 }
 0x3aa   : > { %v998_v61 = vor.u32 1.1754944e-38, %v997_v59  ;;  %vm996_vm12 = vcmp.eq.f32.partialorder %v995_v12, 8.507059e+37 }
 0x3ab   : > { %v974_v38 = vmul.f32 %v3300_v24, %v973_v33 }
 0x3ad   : > { %v975_v42 = vadd.f32 %v3300_v24, %v974_v38 }
 0x3ae   : > { %v3302_v44 = vpop.eup %3301 }
 0x3af   : > { %v979_v47 = vsel %vm978_vm1, %v3300_v24, %v975_v42  ;;  %v987_v8 = vmul.f32 %v3302_v44, %v955_v29  ;;  %vm992_vm8 = vweird.f32 %v3302_v44 }
 0x3b0   : > { %v984_v26 = vsel %vm981_vm3, %v983_v45, %v979_v47  ;;  %vm993_vm11 = vmor %vm991_vm9, %vm992_vm8 }
 0x3b1   : > { %v988_v49 = vsub.f32 1.0, %v987_v8  ;;  %v985_v55 = vmul.f32 %v3805_v35, %v984_v26 }
 0x3b3   : > { %v989_v56 = vmul.f32 %v3302_v44, %v988_v49  ;;  %v1001_v57 = vpack.c.bf16 %v985_v55, %v970_v54 }
 0x3b5   : > { %3101 = vmatmul.msk.bf16.vlgmr.msrb.gmra.mxu1 %vm927_vm5, %v1001_v57  ;;  %v990_v32 = vadd.f32 %v3302_v44, %v989_v56 }
 0x3b6   : > { %1405 = vmatpush.bf16.msrb.mxu1 %v1396_v63 }
 0x3b7   : > { %v994_v9 = vsel %vm993_vm11, %v3302_v44, %v990_v32 }
 0x3b8   : > { %v999_v0 = vsel %vm996_vm12, %v998_v61, %v994_v9 }
 0x3b9   : > { %v1000_v51 = vmul.f32 %v3809_v60, %v999_v0  ;;  %v1387_v60 = vpack.c.bf16 %v3832_v11, %v3829_v7 }
 0x3bb   : > { %v1002_v35 = vpack.c.bf16 %v1000_v51, %v1000_v51 }
 0x3bf   : > { %v1633_v5 = vpop.permute.xlu1 %1632 }
 0x3c0   : > { %v1644_v10 = vsel %vm896_vm4, %v1633_v5, 0 }
 0x3c5   : > { %3102 = vmatmul.msk.bf16.gmra.mxu1 %vm927_vm5, %v1002_v35 }
 0x3c7   : > { %v1422_v19 = vpop.permute.xlu1 %1421 }
 0x3d5   : > { %3107 = vmatmul.msk.bf16.vlgmr.msra.gmra.mxu1 %vm896_vm4, %v1186_v6 }
 0x3d6   : > { %1652 = vmatpush.bf16.xpose.msra.mxu1 %v1644_v10 }
 0x3de   : > { %1653 = vmatpush.bf16.xpose.msra.mxu1 %v1641_v40 }
 0x3e5   : > { %3108 = vmatmul.msk.bf16.gmra.mxu1 %vm896_vm4, %v1187_v14 }
 0x3f5   : > { %3115 = vmatmul.msk.bf16.vlgmr.msrb.gmra.mxu1 %vm896_vm4, %v1387_v60 }
 0x3f6   : > { %1931 = vmatpush.bf16.msrb.mxu1 %v3841_v22 }
 0x405   : > { %3116 = vmatmul.msk.bf16.gmra.mxu1 %vm896_vm4, %v1388_v2 }
 0x415   : > { %3123 = vmatmul.msk.bf16.vlgmr.msra.gmra.mxu1 %vm896_vm4, %v3687_v53 }
 0x416   : > { %2125 = vmatpush.bf16.msra.mxu1 %v1396_v63 }
 0x425   : > { %3124 = vmatmul.msk.bf16.gmra.mxu1 %vm896_vm4, %v3870_v3 }
 0x432   : > { %v1029_v4 = vpop.f32.mrf.mxu1 }
 0x43a   : > { %v1031_v7 = vpop.f32.mrf.mxu1 }
 0x43b   : > { %v1038_v11 = vpack.c.bf16 %v1031_v7, %v1029_v4 }
 0x43d   : > { %3109 = vmatmul.msk.bf16.vlgmr.msra.gmra.mxu3 %vm896_vm4, %v1038_v11 }
 0x442   : > { %v1034_v13 = vpop.f32.mrf.mxu1 }
 0x443   : > { %v1039_v37 = vpack.c.bf16 %v1034_v13, %v1034_v13 }
 0x44a   : > { %v1036_v15 = vpop.f32.mrf.mxu1 }
 0x44d   : > { %3110 = vmatmul.msk.bf16.gmra.mxu3 %vm896_vm4, %v1039_v37 }
 0x452   : > { %v3876_v16 = vpop.f32.mrf.mxu1 }
 0x45a   : > { %v3878_v17 = vpop.f32.mrf.mxu1 }
 0x45d   : > { %3117 = vmatmul.msk.bf16.vlgmr.msrb.gmra.mxu3 %vm896_vm4, %v1420_v58 }
 0x462   : > { %v3881_v43 = vpop.f32.mrf.mxu1 }
 0x46a   : > { %v1214_v18 = vpop.f32.mrf.mxu1 }
 0x46d   : > { %3118 = vmatmul.msk.bf16.gmra.mxu3 %vm896_vm4, %v1422_v19 }
 0x472   : > { %v3884_v20 = vpop.f32.mrf.mxu1 }
 0x47a   : > { %v3886_v22 = vpop.f32.mrf.mxu1 }
 0x482   : > { %v3888_v23 = vpop.f32.mrf.mxu1 }
 0x48a   : > { %v1414_v24 = vpop.f32.mrf.mxu1 }
 0x492   : > { %v1655_v27 = vpop.f32.mrf.mxu1 }
 0x493   : > { %v1664_v28 = vsel %vm927_vm5, %v1655_v27, -inf }
 0x494   : > { %1665 = vmax.xlane.f32.xlu2 %v1664_v28 }
 0x49a   : > { %v1657_v29 = vpop.f32.mrf.mxu1 }
 0x49b   : > { %v1667_v30 = vsel %vm927_vm5, %v1657_v29, -inf }
 0x49c   : > { %1668 = vmax.xlane.f32.xlu0 %v1667_v30 }
 0x4a2   : > { %v1660_v31 = vpop.f32.mrf.mxu1 }
 0x4a3   : > { %v1670_v33 = vsel %vm934_vm6, %v1660_v31, -inf }
 0x4a4   : > { %1671 = vmax.xlane.f32.xlu1 %v1670_v33 }
 0x4aa   : > { %v1662_v36 = vpop.f32.mrf.mxu1 }
 0x4bd   : > { %1740 = vrot.lane.b32.xlu1 %v3817_v1, %s3416_s22 }
 0x4c0   : > { %v3895_v34 = vpop.f32.mrf.mxu3 }
 0x4c8   : > { %v3897_v38 = vpop.f32.mrf.mxu3 }
 0x4d0   : > { %v3899_v39 = vpop.f32.mrf.mxu3 }
 0x4d8   : > { %v1241_v41 = vpop.f32.mrf.mxu3 }
 0x4e0   : > { %v3901_v42 = vpop.f32.mrf.mxu3 }
 0x4e1   : > { %v1457_v0 = vsel %vm927_vm5, %v3901_v42, -inf }
 0x4e8   : > { %v3903_v44 = vpop.f32.mrf.mxu3 }
 0x4e9   : > { %v1460_v5 = vsel %vm927_vm5, %v3903_v44, -inf }
 0x4f0   : > { %v3905_v45 = vpop.f32.mrf.mxu3 }
 0x4f1   : > { %v1463_v62 = vsel %vm934_vm6, %v3905_v45, -inf }
 0x4f2   : > { %1464 = vmax.xlane.f32.xlu1 %v1463_v62 }
 0x4f8   : > { %v1455_v47 = vpop.f32.mrf.mxu3 }
 0x507   : > { %v1666_v8 = vpop.xlane.xlu2 %1665 }
 0x508   : > { %v1673_v26 = vsub.f32 %v1655_v27, %v1666_v8 }
 0x50a   : > { %v1676_v48 = vmul.f32 1.442695, %v1673_v26 }
 0x50b   : > { %1531 = vrot.lane.b32.xlu1 %v3655_v25, %s3419_s24 }
 0x50c   : > { %3303 = vpow2.f32 %v1676_v48 }
 0x50f   : > { %v1669_v49 = vpop.xlane.xlu0 %1668 }
 0x510   : > { %v1674_v54 = vsub.f32 %v1657_v29, %v1669_v49 }
 0x512   : > { %v3911_v55 = vpop.eup %3303  ;;  %v1678_v56 = vmul.f32 1.442695, %v1674_v54 }
 0x513   : > { %1776 = vrot.lane.b32.xlu1 %v3683_v52, %s3408_s27  ;;  %v1682_v57 = vsel %vm927_vm5, %v3911_v55, 0.0 }
 0x514   : > { %3305 = vpow2.f32 %v1678_v56  ;;  %1683 = vadd.xlane.f32.xlu2 %v1682_v57 }
 0x517   : > { %v1672_v63 = vpop.xlane.xlu1 %1671 }
 0x518   : > { %v1675_v32 = vsub.f32 %v1660_v31, %v1672_v63 }
 0x51a   : > { %v3306_v59 = vpop.eup %3305  ;;  %v1680_v12 = vmul.f32 1.442695, %v1675_v32 }
 0x51b   : > { %1774 = vrot.lane.b32.xlu1 %v3870_v3, %s3410_s17  ;;  %v1685_v25 = vsel %vm927_vm5, %v3306_v59, 0.0 }
 0x51c   : > { %3307 = vpow2.f32 %v1680_v12  ;;  %1686 = vadd.xlane.f32.xlu0 %v1685_v25 }
 0x522   : > { %v3920_v9 = vpop.eup %3307 }
 0x523   : > { %2143 = vrot.lane.b32.xlu1 %v3683_v52, %s3417_s2  ;;  %v1688_v61 = vsel %vm934_vm6, %v3920_v9, 0.0 }
 0x524   : > { %1689 = vadd.xlane.f32.xlu0 %v1688_v61 }
 0x52b   : > { %2139 = vrot.lane.b32.xlu1 %v3687_v53, %s3418_s4 }
 0x52c   : > { %1738 = vrot.lane.b32.xlu2 %v3683_v52, %s3416_s22  ;;  %1458 = vmax.xlane.f32.xlu0 %v1457_v0  ;;  %s4435_s22 = sld [smem:[#allocation5_spill]] }
 0x52f   : > { %v1741_v51 = vpop.permute.xlu1 %1740 }
 0x530   : > { %v1750_v35 = vand.u32 %v1741_v51, %v3730_v46 }
 0x532   : > { %1758 = vmatpush.bf16.msra.mxu3 %v1750_v35 }
 0x533   : > { %1968 = vrot.lane.b32.xlu1 %v3870_v3, %s3412_s19 }
 0x534   : > { %1461 = vmax.xlane.f32.xlu0 %v1460_v5 }
 0x587   : > { %v1684_v6 = vpop.xlane.xlu2 %1683 }
 0x588   : > { %3309 = vrcp.f32 %v1684_v6  ;;  %v1702_v37 = vand.u32 2147483648, %v1684_v6  ;;  %vm1696_vm14 = vweird.f32 %v1684_v6  ;;  %v1700_v58 = vand.u32 2147483647, %v1684_v6 }
 0x58a   : > { %v1703_v29 = vor.u32 1.1754944e-38, %v1702_v37  ;;  %vm1701_vm1 = vcmp.eq.f32.partialorder %v1700_v58, 8.507059e+37 }
 0x58e   : > { %v3310_v10 = vpop.eup %3309 }
 0x58f   : > { %v1692_v40 = vmul.f32 %v3310_v10, %v1684_v6  ;;  %v1739_v14 = vpop.permute.xlu2 %1738  ;;  %v1687_v60 = vpop.xlane.xlu0 %1686  ;;  %vm1697_vm13 = vweird.f32 %v3310_v10 }
 0x590   : > { %3311 = vrcp.f32 %v1687_v60  ;;  %1759 = vmatpush.bf16.msra.mxu3 %v1739_v14  ;;  %vm1698_vm15 = vmor %vm1696_vm14, %vm1697_vm13  ;;  %v1717_v19 = vand.u32 2147483648, %v1687_v60  ;;  %v1715_v28 = vand.u32 2147483647, %v1687_v60  ;;  %vm1711_vm3 = vweird.f32 %v1687_v60 }
 0x591   : > { %v1693_v2 = vsub.f32 1.0, %v1692_v40 }
 0x592   : > { %v1718_v33 = vor.u32 1.1754944e-38, %v1717_v19  ;;  %vm1716_vm9 = vcmp.eq.f32.partialorder %v1715_v28, 8.507059e+37 }
 0x593   : > { %v1694_v4 = vmul.f32 %v3310_v10, %v1693_v2 }
 0x594   : > { %1955 = vmatpush.bf16.msrb.mxu3 %v3796_v50 }
 0x595   : > { %v1695_v11 = vadd.f32 %v3310_v10, %v1694_v4 }
 0x596   : > { %v3312_v7 = vpop.eup %3311 }
 0x597   : > { %v1707_v13 = vmul.f32 %v3312_v7, %v1687_v60  ;;  %v1690_v15 = vpop.xlane.xlu0 %1689  ;;  %v1699_v24 = vsel %vm1698_vm15, %v3310_v10, %v1695_v11  ;;  %vm1712_vm0 = vweird.f32 %v3312_v7 }
 0x598   : > { %3313 = vrcp.f32 %v1690_v15  ;;  %v1704_v31 = vsel %vm1701_vm1, %v1703_v29, %v1699_v24  ;;  %vm1713_vm8 = vmor %vm1711_vm3, %vm1712_vm0  ;;  %v1732_v32 = vand.u32 2147483648, %v1690_v15  ;;  %vm1726_vm12 = vweird.f32 %v1690_v15 }
 0x599   : > { %v1708_v18 = vsub.f32 1.0, %v1707_v13  ;;  %v1705_v26 = vmul.f32 %v3911_v55, %v1704_v31  ;;  %v1730_v25 = vand.u32 2147483647, %v1690_v15 }
 0x59a   : > { %v1733_v55 = vor.u32 1.1754944e-38, %v1732_v32 }
 0x59b   : > { %v1709_v27 = vmul.f32 %v3312_v7, %v1708_v18  ;;  %vm1731_vm14 = vcmp.eq.f32.partialorder %v1730_v25, 8.507059e+37 }
 0x59d   : > { %v1710_v50 = vadd.f32 %v3312_v7, %v1709_v27 }
 0x59e   : > { %v3314_v30 = vpop.eup %3313 }
 0x59f   : > { %v1714_v36 = vsel %vm1713_vm8, %v3312_v7, %v1710_v50  ;;  %v1722_v41 = vmul.f32 %v3314_v30, %v1690_v15  ;;  %v1459_v62 = vpop.xlane.xlu0 %1458  ;;  %vm1727_vm11 = vweird.f32 %v3314_v30 }
 0x5a0   : > { %v1719_v47 = vsel %vm1716_vm9, %v1718_v33, %v1714_v36  ;;  %v1466_v8 = vsub.f32 %v3901_v42, %v1459_v62  ;;  %vm1728_vm13 = vmor %vm1726_vm12, %vm1727_vm11 }
 0x5a1   : > { %v1720_v48 = vmul.f32 %v3306_v59, %v1719_v47  ;;  %v1723_v49 = vsub.f32 1.0, %v1722_v41 }
 0x5a2   : > { %v1469_v54 = vmul.f32 1.442695, %v1466_v8 }
 0x5a3   : > { %v1724_v56 = vmul.f32 %v3314_v30, %v1723_v49  ;;  %v1736_v57 = vpack.c.bf16 %v1720_v48, %v1705_v26 }
 0x5a4   : > { %3315 = vpow2.f32 %v1469_v54 }
 0x5a5   : > { %3125 = vmatmul.msk.bf16.vlgmr.msra.gmra.mxu3 %vm927_vm5, %v1736_v57  ;;  %v1725_v63 = vadd.f32 %v3314_v30, %v1724_v56 }
 0x5a7   : > { %v1462_v12 = vpop.xlane.xlu0 %1461  ;;  %v1729_v42 = vsel %vm1728_vm13, %v3314_v30, %v1725_v63 }
 0x5a8   : > { %v1467_v61 = vsub.f32 %v3903_v44, %v1462_v12  ;;  %v1734_v35 = vsel %vm1731_vm14, %v1733_v55, %v1729_v42 }
 0x5a9   : > { %v1735_v5 = vmul.f32 %v3920_v9, %v1734_v35  ;;  %v1465_v9 = vpop.xlane.xlu1 %1464 }
 0x5aa   : > { %v3942_v0 = vpop.eup %3315  ;;  %v1471_v59 = vmul.f32 1.442695, %v1467_v61  ;;  %v1468_v40 = vsub.f32 %v3905_v45, %v1465_v9 }
 0x5ab   : > { %v1475_v51 = vsel %vm927_vm5, %v3942_v0, 0.0  ;;  %v1737_v44 = vpack.c.bf16 %v1735_v5, %v1735_v5 }
 0x5ac   : > { %3317 = vpow2.f32 %v1471_v59  ;;  %1476 = vadd.xlane.f32.xlu2 %v1475_v51  ;;  %v1473_v14 = vmul.f32 1.442695, %v1468_v40 }
 0x5ae   : > { %3319 = vpow2.f32 %v1473_v14 }
 0x5b1   : > { %v1532_v54 = vpop.permute.xlu1 %1531 }
 0x5b2   : > { %v3947_v6 = vpop.eup %3317 }
 0x5b3   : > { %v1478_v10 = vsel %vm927_vm5, %v3947_v6, 0.0 }
 0x5b4   : > { %1479 = vadd.xlane.f32.xlu0 %v1478_v10  ;;  %v3965_v60 = vpop.eup %3319 }
 0x5b5   : > { %3126 = vmatmul.msk.bf16.gmra.mxu3 %vm927_vm5, %v1737_v44 }
 0x5b9   : > { %v1777_v55 = vpop.permute.xlu1 %1776 }
 0x5ba   : > { %v1787_v59 = vsel %vm896_vm4, %v1777_v55, 0 }
 0x5c4   : > { %1778 = vrot.lane.b32.xlu2 %v3817_v1, %s3408_s27  ;;  %s4431_s27 = scalar_lea.vmem %s4381_s5, %s3524_s29 }
 0x5c8   : > { %1533 = vrot.lane.b32.xlu0 %v3653_v21, %s3419_s24  ;;  %v1481_v21 = vsel %vm934_vm6, %v3965_v60, 0.0 }
 0x5cc   : > { %1772 = vrot.lane.b32.xlu2 %v3687_v53, %s3410_s17 }
 0x5d4   : > { %1972 = vrot.lane.b32.xlu2 %v3817_v1, %s3411_s20 }
 0x5dc   : > { %1970 = vrot.lane.b32.xlu2 %v3683_v52, %s3411_s20 }
 0x5e4   : > { %1966 = vrot.lane.b32.xlu2 %v3687_v53, %s3412_s19  ;;  %s4434_s19 = scalar_lea.vmem %s4385_s9, %s3524_s29 }
 0x5f2   : > { %1482 = vadd.xlane.f32.xlu0 %v1481_v21 }
 0x606   : > { %2145 = vrot.lane.b32.xlu0 %v3817_v1, %s3417_s2 }
 0x60e   : > { %2141 = vrot.lane.b32.xlu0 %v3870_v3, %s3418_s4 }
 0x61f   : > { %v1477_v2 = vpop.xlane.xlu2 %1476 }
 0x620   : > { %3321 = vrcp.f32 %v1477_v2  ;;  %v1495_v30 = vand.u32 2147483648, %v1477_v2  ;;  %vm1489_vm8 = vweird.f32 %v1477_v2  ;;  %v1493_v31 = vand.u32 2147483647, %v1477_v2 }
 0x622   : > { %v1496_v8 = vor.u32 1.1754944e-38, %v1495_v30  ;;  %vm1494_vm12 = vcmp.eq.f32.partialorder %v1493_v31, 8.507059e+37 }
 0x626   : > { %v3322_v45 = vpop.eup %3321 }
 0x627   : > { %v1480_v4 = vpop.xlane.xlu0 %1479  ;;  %v1485_v53 = vmul.f32 %v3322_v45, %v1477_v2  ;;  %v1779_v58 = vpop.permute.xlu2 %1778  ;;  %vm1490_vm0 = vweird.f32 %v3322_v45 }
 0x628   : > { %3323 = vrcp.f32 %v1480_v4  ;;  %v1761_v7 = vpop.f32.mrf.mxu3  ;;  %v1510_v28 = vand.u32 2147483648, %v1480_v4  ;;  %vm1504_vm1 = vweird.f32 %v1480_v4  ;;  %v1508_v50 = vand.u32 2147483647, %v1480_v4  ;;  %vm1491_vm9 = vmor %vm1489_vm8, %vm1490_vm0  ;;  %v1775_v2 = vpop.permute.xlu1 %1774 }
 0x629   : > { %v1486_v13 = vsub.f32 1.0, %v1485_v53  ;;  %v1790_v12 = vsel %vm896_vm4, %v1779_v58, 0 }
 0x62a   : > { %v1511_v41 = vor.u32 1.1754944e-38, %v1510_v28  ;;  %vm1509_vm11 = vcmp.eq.f32.partialorder %v1508_v50, 8.507059e+37 }
 0x62b   : > { %v1487_v24 = vmul.f32 %v3322_v45, %v1486_v13 }
 0x62d   : > { %v1488_v29 = vadd.f32 %v3322_v45, %v1487_v24 }
 0x62e   : > { %v3324_v11 = vpop.eup %3323 }
 0x62f   : > { %v1500_v15 = vmul.f32 %v3324_v11, %v1480_v4  ;;  %vm1505_vm15 = vweird.f32 %v3324_v11  ;;  %v1492_v62 = vsel %vm1491_vm9, %v3322_v45, %v1488_v29  ;;  %v1773_v48 = vpop.permute.xlu2 %1772 }
 0x630   : > { %v1763_v37 = vpop.f32.mrf.mxu3  ;;  %vm1506_vm3 = vmor %vm1504_vm1, %vm1505_vm15  ;;  %v1497_v56 = vsel %vm1494_vm12, %v1496_v8, %v1492_v62 }
 0x631   : > { %v1501_v18 = vsub.f32 1.0, %v1500_v15  ;;  %v1770_v19 = vpack.c.bf16 %v1763_v37, %v1761_v7  ;;  %v1498_v63 = vmul.f32 %v3942_v0, %v1497_v56  ;;  %v2144_v37 = vpop.permute.xlu1 %2143 }
 0x632   : > { %v2154_v58 = vsel %vm896_vm4, %v2144_v37, 0 }
 0x633   : > { %v1502_v27 = vmul.f32 %v3324_v11, %v1501_v18  ;;  %3133 = vmatmul.msk.bf16.vlgmr.msrb.gmra.mxu3 %vm896_vm4, %v1770_v19 }
 0x635   : > { %v1503_v3 = vadd.f32 %v3324_v11, %v1502_v27 }
 0x637   : > { %v1507_v33 = vsel %vm1506_vm3, %v3324_v11, %v1503_v3  ;;  %v1973_v42 = vpop.permute.xlu2 %1972 }
 0x638   : > { %v1766_v36 = vpop.f32.mrf.mxu3  ;;  %v1512_v26 = vsel %vm1509_vm11, %v1511_v41, %v1507_v33  ;;  %v1984_v51 = vsel %vm896_vm4, %v1973_v42, 0 }
 0x639   : > { %v1513_v57 = vmul.f32 %v3947_v6, %v1512_v26  ;;  %v1771_v25 = vpack.c.bf16 %v1766_v36, %v1766_v36  ;;  %v2140_v18 = vpop.permute.xlu1 %2139 }
 0x63a   : > { %v1534_v47 = vpop.permute.xlu0 %1533 }
 0x63b   : > { %v1543_v49 = vand.u32 %v1534_v47, %v3730_v46  ;;  %v1529_v61 = vpack.c.bf16 %v1513_v57, %v1498_v63 }
 0x63d   : > { %1551 = vmatpush.bf16.msrb.mxu0 %v1543_v49 }
 0x63f   : > { %v1971_v0 = vpop.permute.xlu2 %1970 }
 0x640   : > { %v1768_v32 = vpop.f32.mrf.mxu3  ;;  %v1981_v35 = vsel %vm896_vm4, %v1971_v0, 0 }
 0x641   : > { %1552 = vmatpush.bf16.msrb.mxu0 %v1532_v54  ;;  %v1969_v28 = vpop.permute.xlu1 %1968 }
 0x643   : > { %3134 = vmatmul.msk.bf16.gmra.mxu3 %vm896_vm4, %v1771_v25 }
 0x644   : > { %3119 = vmatmul.msk.bf16.vlgmr.msrb.gmra.mxu0 %vm927_vm5, %v1529_v61 }
 0x645   : > { %1798 = vmatpush.bf16.xpose.msra.mxu0 %v1790_v12 }
 0x647   : > { %v1967_v24 = vpop.permute.xlu2 %1966 }
 0x64d   : > { %1799 = vmatpush.bf16.xpose.msra.mxu0 %v1787_v59 }
 0x655   : > { %1992 = vmatpush.bf16.xpose.msrb.mxu0 %v1984_v51 }
 0x65d   : > { %1993 = vmatpush.bf16.xpose.msrb.mxu0 %v1981_v35 }
 0x665   : > { %v1483_v5 = vpop.xlane.xlu0 %1482 }
 0x666   : > { %3325 = vrcp.f32 %v1483_v5  ;;  %v1525_v9 = vand.u32 2147483648, %v1483_v5  ;;  %v1523_v14 = vand.u32 2147483647, %v1483_v5  ;;  %vm1519_vm14 = vweird.f32 %v1483_v5 }
 0x668   : > { %v1526_v45 = vor.u32 1.1754944e-38, %v1525_v9  ;;  %vm1524_vm0 = vcmp.eq.f32.partialorder %v1523_v14, 8.507059e+37  ;;  %v1237_v9 = vadd.f32 %v3897_v38, %v3878_v17 }
 0x66c   : > { %v3326_v6 = vpop.eup %3325 }
 0x66d   : > { %v1515_v10 = vmul.f32 %v3326_v6, %v1483_v5  ;;  %vm1520_vm13 = vweird.f32 %v3326_v6  ;;  %v1235_v5 = vadd.f32 %v3895_v34, %v3876_v16 }
 0x66e   : > { %vm1521_vm15 = vmor %vm1519_vm14, %vm1520_vm13 }
 0x66f   : > { %v1516_v44 = vsub.f32 1.0, %v1515_v10 }
 0x671   : > { %v1517_v40 = vmul.f32 %v3326_v6, %v1516_v44 }
 0x673   : > { %v1518_v21 = vadd.f32 %v3326_v6, %v1517_v40  ;;  %v1417_v40 = vadd.f32 %v3886_v22, %v1237_v9 }
 0x675   : > { %v1522_v4 = vsel %vm1521_vm15, %v3326_v6, %v1518_v21  ;;  %v1416_v6 = vadd.f32 %v3884_v20, %v1235_v5 }
 0x676   : > { %v1527_v7 = vsel %vm1524_vm0, %v1526_v45, %v1522_v4 }
 0x677   : > { %v1528_v53 = vmul.f32 %v3965_v60, %v1527_v7  ;;  %v882_v60 = vld [vmem:[%s4430_s30 + $0xc] sm:$0xf] }
 0x678   : > { %v2146_v11 = vpop.permute.xlu0 %2145  ;;  %v3993_v27 = vsel %vm1194_vm10, %v882_v60, 0 }
 0x679   : > { %v2157_v13 = vsel %vm896_vm4, %v2146_v11, 0  ;;  %v1530_v15 = vpack.c.bf16 %v1528_v53, %v1528_v53  ;;  %1581 = vmatpush.bf16.msra.mxu2 %v3993_v27 }
 0x67a   : > { %2165 = vmatpush.bf16.xpose.msra.mxu3 %v2157_v13 }
 0x67b   : > { %3120 = vmatmul.msk.bf16.gmra.mxu0 %vm927_vm5, %v1530_v15 }
 0x680   : > { %v2142_v19 = vpop.permute.xlu0 %2141 }
 0x682   : > { %2166 = vmatpush.bf16.xpose.msra.mxu3 %v2154_v58 }
 0x689   : > { %3141 = vmatmul.msk.bf16.vlgmr.msra.gmra.mxu3 %vm896_vm4, %v2140_v18 }
 0x68b   : > { %3127 = vmatmul.msk.bf16.vlgmr.msra.gmra.mxu0 %vm896_vm4, %v1773_v48 }
 0x699   : > { %3142 = vmatmul.msk.bf16.gmra.mxu3 %vm896_vm4, %v2142_v19 }
 0x69b   : > { %3128 = vmatmul.msk.bf16.gmra.mxu0 %vm896_vm4, %v1775_v2  ;;  %v1240_v2 = vadd.f32 %v3899_v39, %v3881_v43 }
 0x69d   : > { %v1418_v4 = vadd.f32 %v3888_v23, %v1240_v2 }
 0x6ab   : > { %3135 = vmatmul.msk.bf16.vlgmr.msrb.gmra.mxu0 %vm896_vm4, %v1967_v24 }
 0x6b6   : > { %v3997_v3 = vpop.f32.mrf.mxu3 }
 0x6bb   : > { %3136 = vmatmul.msk.bf16.gmra.mxu0 %vm896_vm4, %v1969_v28 }
 0x6be   : > { %v4000_v29 = vpop.f32.mrf.mxu3 }
 0x6c1   : > { %v1554_v50 = vpop.f32.mrf.mxu0 }
 0x6c6   : > { %v4002_v30 = vpop.f32.mrf.mxu3 }
 0x6c9   : > { %v1556_v31 = vpop.f32.mrf.mxu0 }
 0x6ca   : > { %v1563_v33 = vpack.c.bf16 %v1556_v31, %v1554_v50 }
 0x6cc   : > { %3121 = vmatmul.msk.bf16.vlgmr.msra.gmra.mxu2 %vm896_vm4, %v1563_v33 }
 0x6ce   : > { %v1964_v36 = vpop.f32.mrf.mxu3 }
 0x6f8   : > { %v1559_v41 = vpop.f32.mrf.mxu0 }
 0x6f9   : > { %v1564_v62 = vpack.c.bf16 %v1559_v41, %v1559_v41 }
 0x6fb   : > { %3122 = vmatmul.msk.bf16.gmra.mxu2 %vm896_vm4, %v1564_v62 }
 0x700   : > { %v1561_v47 = vpop.f32.mrf.mxu0 }
 0x708   : > { %v1801_v8 = vpop.f32.mrf.mxu0 }
 0x709   : > { %v1810_v26 = vsel %vm927_vm5, %v1801_v8, -inf }
 0x70a   : > { %1811 = vmax.xlane.f32.xlu2 %v1810_v26 }
 0x70c   : > { %v4007_v48 = vpop.f32.mrf.mxu3 }
 0x70d   : > { %v2177_v18 = vsel %vm927_vm5, %v4007_v48, -inf }
 0x710   : > { %v1803_v49 = vpop.f32.mrf.mxu0 }
 0x711   : > { %v1813_v54 = vsel %vm927_vm5, %v1803_v49, -inf }
 0x712   : > { %1814 = vmax.xlane.f32.xlu0 %v1813_v54 }
 0x714   : > { %v4010_v56 = vpop.f32.mrf.mxu3 }
 0x715   : > { %v2180_v25 = vsel %vm927_vm5, %v4010_v56, -inf }
 0x718   : > { %v1806_v57 = vpop.f32.mrf.mxu0 }
 0x719   : > { %v1816_v63 = vsel %vm934_vm6, %v1806_v57, -inf }
 0x71a   : > { %1817 = vmax.xlane.f32.xlu1 %v1816_v63 }
 0x71c   : > { %v4013_v32 = vpop.f32.mrf.mxu3 }
 0x720   : > { %v1808_v12 = vpop.f32.mrf.mxu0 }
 0x722   : > { %2181 = vmax.xlane.f32.xlu1 %v2180_v25 }
 0x724   : > { %v2175_v61 = vpop.f32.mrf.mxu3 }
 0x728   : > { %v1995_v42 = vpop.f32.mrf.mxu0 }
 0x729   : > { %v2004_v55 = vsel %vm927_vm5, %v1995_v42, -inf }
 0x72a   : > { %2005 = vmax.xlane.f32.xlu2 %v2004_v55 }
 0x730   : > { %v1997_v59 = vpop.f32.mrf.mxu0 }
 0x731   : > { %v2007_v51 = vsel %vm927_vm5, %v1997_v59, -inf }
 0x732   : > { %2008 = vmax.xlane.f32.xlu0 %v2007_v51 }
 0x738   : > { %v4019_v0 = vpop.f32.mrf.mxu0 }
 0x739   : > { %v2010_v50 = vsel %vm934_vm6, %v4019_v0, -inf }
 0x73b   : > { %1886 = vrot.lane.b32.xlu1 %v3817_v1, %s3413_s0 }
 0x740   : > { %v2002_v35 = vpop.f32.mrf.mxu0 }
 0x74f   : > { %v1583_v10 = vpop.f32.mrf.mxu2 }
 0x750   : > { %v4026_v44 = vadd.f32 %v1583_v10, %v1416_v6 }
 0x757   : > { %v1585_v14 = vpop.f32.mrf.mxu2 }
 0x758   : > { %v4031_v21 = vadd.f32 %v1585_v14, %v1417_v40 }
 0x77d   : > { %v1812_v45 = vpop.xlane.xlu2 %1811 }
 0x77e   : > { %v1819_v16 = vsub.f32 %v1801_v8, %v1812_v45  ;;  %v1588_v34 = vpop.f32.mrf.mxu2 }
 0x77f   : > { %v4036_v20 = vadd.f32 %v1588_v34, %v1418_v4 }
 0x780   : > { %v1822_v7 = vmul.f32 1.442695, %v1819_v16 }
 0x782   : > { %3327 = vpow2.f32 %v1822_v7 }
 0x785   : > { %v1815_v53 = vpop.xlane.xlu0 %1814 }
 0x786   : > { %v1820_v11 = vsub.f32 %v1803_v49, %v1815_v53  ;;  %v1590_v17 = vpop.f32.mrf.mxu2 }
 0x788   : > { %v4038_v38 = vpop.eup %3327  ;;  %v1824_v22 = vmul.f32 1.442695, %v1820_v11 }
 0x789   : > { %v1828_v13 = vsel %vm927_vm5, %v4038_v38, 0.0 }
 0x78a   : > { %3329 = vpow2.f32 %v1824_v22  ;;  %1829 = vadd.xlane.f32.xlu0 %v1828_v13 }
 0x78d   : > { %v1818_v43 = vpop.xlane.xlu1 %1817 }
 0x78e   : > { %v1821_v39 = vsub.f32 %v1806_v57, %v1818_v43  ;;  %v2183_v57 = vsel %vm934_vm6, %v4013_v32, -inf }
 0x790   : > { %v4042_v23 = vpop.eup %3329  ;;  %v1826_v15 = vmul.f32 1.442695, %v1821_v39 }
 0x791   : > { %v1831_v37 = vsel %vm927_vm5, %v4042_v23, 0.0 }
 0x792   : > { %3331 = vpow2.f32 %v1826_v15  ;;  %1832 = vadd.xlane.f32.xlu2 %v1831_v37 }
 0x795   : > { %v2182_v31 = vpop.xlane.xlu1 %2181 }
 0x796   : > { %v2187_v63 = vsub.f32 %v4010_v56, %v2182_v31 }
 0x798   : > { %v4046_v58 = vpop.eup %3331  ;;  %v2191_v12 = vmul.f32 1.442695, %v2187_v63 }
 0x799   : > { %v1834_v19 = vsel %vm934_vm6, %v4046_v58, 0.0 }
 0x79a   : > { %2178 = vmax.xlane.f32.xlu2 %v2177_v18  ;;  %1835 = vadd.xlane.f32.xlu0 %v1834_v19 }
 0x79d   : > { %v2006_v60 = vpop.xlane.xlu2 %2005 }
 0x79e   : > { %v2013_v24 = vsub.f32 %v1995_v42, %v2006_v60 }
 0x7a0   : > { %v2016_v28 = vmul.f32 1.442695, %v2013_v24 }
 0x7a2   : > { %3333 = vpow2.f32 %v2016_v28  ;;  %2011 = vmax.xlane.f32.xlu0 %v2010_v50 }
 0x7a5   : > { %v2009_v33 = vpop.xlane.xlu0 %2008 }
 0x7a6   : > { %v2014_v36 = vsub.f32 %v1997_v59, %v2009_v33 }
 0x7a8   : > { %v4054_v41 = vpop.eup %3333  ;;  %v2018_v62 = vmul.f32 1.442695, %v2014_v36 }
 0x7a9   : > { %v2022_v47 = vsel %vm927_vm5, %v4054_v41, 0.0 }
 0x7aa   : > { %3335 = vpow2.f32 %v2018_v62  ;;  %2023 = vadd.xlane.f32.xlu1 %v2022_v47 }
 0x7ab   : > { %3337 = vpow2.f32 %v2191_v12 }
 0x7ad   : > { %v1887_v8 = vpop.permute.xlu1 %1886 }
 0x7ae   : > { %v1896_v26 = vand.u32 %v1887_v8, %v3730_v46 }
 0x7b0   : > { %v4059_v49 = vpop.eup %3335  ;;  %1904 = vmatpush.bf16.msrb.mxu2 %v1896_v26 }
 0x7b1   : > { %v2025_v54 = vsel %vm927_vm5, %v4059_v49, 0.0  ;;  %v4074_v25 = vpop.eup %3337 }
 0x7b2   : > { %1884 = vrot.lane.b32.xlu2 %v3683_v52, %s3413_s0  ;;  %2026 = vadd.xlane.f32.xlu0 %v2025_v54  ;;  %v2198_v42 = vsel %vm927_vm5, %v4074_v25, 0.0 }
 0x7ba   : > { %2184 = vmax.xlane.f32.xlu0 %v2183_v57 }
 0x7c3   : > { %2078 = vrot.lane.b32.xlu1 %v3683_v52, %s3415_s16 }
 0x7ce   : > { %2080 = vrot.lane.b32.xlu0 %v3817_v1, %s3415_s16 }
 0x7d6   : > { %2253 = vrot.lane.b32.xlu0 %v3817_v1, %s3419_s24 }
 0x7fd   : > { %v1830_v61 = vpop.xlane.xlu0 %1829 }
 0x7fe   : > { %3339 = vrcp.f32 %v1830_v61  ;;  %v1848_v40 = vand.u32 2147483648, %v1830_v61  ;;  %vm1842_vm1 = vweird.f32 %v1830_v61  ;;  %v1846_v2 = vand.u32 2147483647, %v1830_v61 }
 0x800   : > { %2199 = vadd.xlane.f32.xlu0 %v2198_v42  ;;  %v1849_v11 = vor.u32 1.1754944e-38, %v1848_v40  ;;  %vm1847_vm9 = vcmp.eq.f32.partialorder %v1846_v2, 8.507059e+37  ;;  %v3395_v42 = vld [vmem:[%s4425_s28] sm:$0xff] }
 0x804   : > { %v3340_v55 = vpop.eup %3339 }
 0x805   : > { %v1838_v59 = vmul.f32 %v3340_v55, %v1830_v61  ;;  %v1833_v51 = vpop.xlane.xlu2 %1832  ;;  %vm1843_vm10 = vweird.f32 %v3340_v55 }
 0x806   : > { %3341 = vrcp.f32 %v1833_v51  ;;  %vm1844_vm3 = vmor %vm1842_vm1, %vm1843_vm10  ;;  %v1863_v4 = vand.u32 2147483648, %v1833_v51  ;;  %v1861_v53 = vand.u32 2147483647, %v1833_v51  ;;  %vm1857_vm11 = vweird.f32 %v1833_v51 }
 0x807   : > { %v1839_v35 = vsub.f32 1.0, %v1838_v59 }
 0x808   : > { %vm1862_vm13 = vcmp.eq.f32.partialorder %v1861_v53, 8.507059e+37 }
 0x809   : > { %v1840_v5 = vmul.f32 %v3340_v55, %v1839_v35 }
 0x80b   : > { %v1841_v1 = vadd.f32 %v3340_v55, %v1840_v5 }
 0x80c   : > { %v3342_v6 = vpop.eup %3341 }
 0x80d   : > { %v1853_v56 = vmul.f32 %v3342_v6, %v1833_v51  ;;  %v2179_v10 = vpop.xlane.xlu2 %2178  ;;  %v1836_v9 = vpop.xlane.xlu0 %1835  ;;  %v1845_v34 = vsel %vm1844_vm3, %v3340_v55, %v1841_v1  ;;  %vm1858_vm8 = vweird.f32 %v3342_v6 }
 0x80e   : > { %v2186_v14 = vsub.f32 %v4007_v48, %v2179_v10  ;;  %3343 = vrcp.f32 %v1836_v9  ;;  %v1850_v13 = vsel %vm1847_vm9, %v1849_v11, %v1845_v34  ;;  %vm1859_vm12 = vmor %vm1857_vm11, %vm1858_vm8  ;;  %v1864_v48 = vor.u32 1.1754944e-38, %v1863_v4 }
 0x80f   : > { %v1854_v45 = vsub.f32 1.0, %v1853_v56  ;;  %v1851_v60 = vmul.f32 %v4038_v38, %v1850_v13  ;;  %v1878_v62 = vand.u32 2147483648, %v1836_v9  ;;  %v4094_v38 = vld [vmem:[%s4431_s27] ss:$0 sm:$0xff]  ;;  %vm1872_vm15 = vweird.f32 %v1836_v9  ;;  %v3396_v56 = vld [vmem:[%s4425_s28 + $0x8] sm:$0xff] }
 0x810   : > { %v2189_v16 = vmul.f32 1.442695, %v2186_v14  ;;  %v2328_v54 = vadd.f32 %v4094_v38, %v4026_v44  ;;  %v2329_v44 = vadd.f32 %v4094_v38, %v4031_v21 }
 0x811   : > { %v1855_v7 = vmul.f32 %v3342_v6, %v1854_v45  ;;  %v1879_v26 = vor.u32 1.1754944e-38, %v1878_v62 }
 0x812   : > { %3345 = vpow2.f32 %v2189_v16  ;;  %v4105_v55 = vadd.f32 %v3395_v42, %v2328_v54 }
 0x813   : > { %v1856_v17 = vadd.f32 %v3342_v6, %v1855_v7 }
 0x814   : > { %v3344_v22 = vpop.eup %3343  ;;  %2251 = vrot.lane.b32.xlu0 %v3683_v52, %s3419_s24  ;;  %v2338_v51 = vsel %vm846_vm2, %v4105_v55, 0.0  ;;  %s4437_s24 = sld [smem:[#allocation11_spill]] }
 0x815   : > { %v1860_v43 = vsel %vm1859_vm12, %v3342_v6, %v1856_v17  ;;  %v1868_v39 = vmul.f32 %v3344_v22, %v1836_v9  ;;  %v1885_v15 = vpop.permute.xlu2 %1884  ;;  %v2012_v37 = vpop.xlane.xlu0 %2011  ;;  %vm1873_vm14 = vweird.f32 %v3344_v22 }
 0x816   : > { %v1865_v18 = vsel %vm1862_vm13, %v1864_v48, %v1860_v43  ;;  %v2015_v19 = vsub.f32 %v4019_v0, %v2012_v37  ;;  %1905 = vmatpush.bf16.msrb.mxu2 %v1885_v15  ;;  %vm1874_vm0 = vmor %vm1872_vm15, %vm1873_vm14 }
 0x817   : > { %v1866_v24 = vmul.f32 %v4042_v23, %v1865_v18  ;;  %v1869_v28 = vsub.f32 1.0, %v1868_v39  ;;  %v1876_v23 = vand.u32 2147483647, %v1836_v9 }
 0x818   : > { %v4084_v50 = vpop.eup %3345  ;;  %v2020_v31 = vmul.f32 1.442695, %v2015_v19 }
 0x819   : > { %v1870_v33 = vmul.f32 %v3344_v22, %v1869_v28  ;;  %v2195_v52 = vsel %vm927_vm5, %v4084_v50, 0.0  ;;  %v1882_v36 = vpack.c.bf16 %v1866_v24, %v1851_v60  ;;  %vm1877_vm10 = vcmp.eq.f32.partialorder %v1876_v23, 8.507059e+37 }
 0x81a   : > { %3347 = vpow2.f32 %v2020_v31  ;;  %2196 = vadd.xlane.f32.xlu2 %v2195_v52 }
 0x81b   : > { %3129 = vmatmul.msk.bf16.vlgmr.msrb.gmra.mxu2 %vm927_vm5, %v1882_v36  ;;  %v1871_v0 = vadd.f32 %v3344_v22, %v1870_v33 }
 0x81d   : > { %v1875_v47 = vsel %vm1874_vm0, %v3344_v22, %v1871_v0  ;;  %v2024_v12 = vpop.xlane.xlu1 %2023 }
 0x81e   : > { %v1880_v63 = vsel %vm1877_vm10, %v1879_v26, %v1875_v47  ;;  %v2042_v17 = vand.u32 2147483648, %v2024_v12  ;;  %vm2036_vm11 = vweird.f32 %v2024_v12  ;;  %v2040_v13 = vand.u32 2147483647, %v2024_v12 }
 0x81f   : > { %v1881_v59 = vmul.f32 %v4046_v58, %v1880_v63  ;;  %v4116_v58 = vadd.f32 %v3396_v56, %v2329_v44 }
 0x820   : > { %v4096_v8 = vpop.eup %3347  ;;  %v2043_v37 = vor.u32 1.1754944e-38, %v2042_v17  ;;  %vm2041_vm14 = vcmp.eq.f32.partialorder %v2040_v13, 8.507059e+37 }
 0x821   : > { %v2028_v57 = vsel %vm934_vm6, %v4096_v8, 0.0  ;;  %v1883_v35 = vpack.c.bf16 %v1881_v59, %v1881_v59  ;;  %v2341_v14 = vsel %vm846_vm2, %v4116_v58, 0.0 }
 0x822   : > { %2029 = vadd.xlane.f32.xlu2 %v2028_v57 }
 0x825   : > { %v2027_v61 = vpop.xlane.xlu0 %2026 }
 0x826   : > { %3349 = vrcp.f32 %v2027_v61  ;;  %v2057_v53 = vand.u32 2147483648, %v2027_v61  ;;  %vm2051_vm8 = vweird.f32 %v2027_v61 }
 0x827   : > { %3351 = vrcp.f32 %v2024_v12 }
 0x828   : > { %v2058_v43 = vor.u32 1.1754944e-38, %v2057_v53 }
 0x82a   : > { %2339 = vadd.xlane.f32.xlu2 %v2338_v51 }
 0x82b   : > { %3130 = vmatmul.msk.bf16.gmra.mxu2 %vm927_vm5, %v1883_v35 }
 0x82c   : > { %v3350_v5 = vpop.eup %3349 }
 0x82d   : > { %v3352_v6 = vpop.eup %3351  ;;  %v2185_v1 = vpop.xlane.xlu0 %2184  ;;  %v2047_v10 = vmul.f32 %v3350_v5, %v2027_v61  ;;  %vm2052_vm1 = vweird.f32 %v3350_v5 }
 0x82e   : > { %v2188_v9 = vsub.f32 %v4013_v32, %v2185_v1  ;;  %v2032_v21 = vmul.f32 %v3352_v6, %v2024_v12  ;;  %vm2037_vm3 = vweird.f32 %v3352_v6  ;;  %v2055_v32 = vand.u32 2147483647, %v2027_v61  ;;  %vm2053_vm9 = vmor %vm2051_vm8, %vm2052_vm1 }
 0x82f   : > { %v2048_v2 = vsub.f32 1.0, %v2047_v10  ;;  %vm2038_vm12 = vmor %vm2036_vm11, %vm2037_vm3 }
 0x830   : > { %v2193_v40 = vmul.f32 1.442695, %v2188_v9  ;;  %v2033_v45 = vsub.f32 1.0, %v2032_v21  ;;  %vm2056_vm13 = vcmp.eq.f32.partialorder %v2055_v32, 8.507059e+37 }
 0x831   : > { %v2049_v4 = vmul.f32 %v3350_v5, %v2048_v2 }
 0x832   : > { %2342 = vadd.xlane.f32.xlu2 %v2341_v14  ;;  %3353 = vpow2.f32 %v2193_v40  ;;  %v2034_v16 = vmul.f32 %v3352_v6, %v2033_v45 }
 0x833   : > { %v2050_v7 = vadd.f32 %v3350_v5, %v2049_v4 }
 0x834   : > { %v2035_v11 = vadd.f32 %v3352_v6, %v2034_v16 }
 0x835   : > { %v2054_v48 = vsel %vm2053_vm9, %v3350_v5, %v2050_v7  ;;  %v2079_v31 = vpop.permute.xlu1 %2078 }
 0x836   : > { %v2039_v39 = vsel %vm2038_vm12, %v3352_v6, %v2035_v11  ;;  %v2059_v18 = vsel %vm2056_vm13, %v2058_v43, %v2054_v48 }
 0x837   : > { %v2044_v60 = vsel %vm2041_vm14, %v2043_v37, %v2039_v39  ;;  %v2060_v24 = vmul.f32 %v4059_v49, %v2059_v18 }
 0x838   : > { %v4121_v34 = vpop.eup %3353  ;;  %v2045_v28 = vmul.f32 %v4054_v41, %v2044_v60 }
 0x839   : > { %v2201_v22 = vsel %vm934_vm6, %v4121_v34, 0.0 }
 0x83a   : > { %v2076_v52 = vpack.c.bf16 %v2060_v24, %v2045_v28 }
 0x83e   : > { %2202 = vadd.xlane.f32.xlu0 %v2201_v22 }
 0x840   : > { %v2081_v15 = vpop.permute.xlu0 %2080 }
 0x841   : > { %v2090_v19 = vand.u32 %v2081_v15, %v3730_v46 }
 0x843   : > { %2098 = vmatpush.bf16.msra.mxu2 %v2090_v19 }
 0x847   : > { %2099 = vmatpush.bf16.msra.mxu2 %v2079_v31 }
 0x848   : > { %v2254_v33 = vpop.permute.xlu0 %2253 }
 0x849   : > { %v2263_v36 = vand.u32 %v2254_v33, %v3730_v46 }
 0x84a   : > { %3137 = vmatmul.msk.bf16.vlgmr.msra.gmra.mxu2 %vm927_vm5, %v2076_v52 }
 0x84b   : > { %2298 = vmatpush.bf16.msrb.mxu2 %v3993_v27  ;;  %2271 = vmatpush.bf16.msra.mxu0 %v2263_v36 }
 0x873   : > { %v2200_v0 = vpop.xlane.xlu0 %2199 }
 0x874   : > { %3355 = vrcp.f32 %v2200_v0  ;;  %v2230_v12 = vand.u32 2147483648, %v2200_v0  ;;  %vm2224_vm15 = vweird.f32 %v2200_v0  ;;  %v2228_v46 = vand.u32 2147483647, %v2200_v0 }
 0x876   : > { %v2231_v35 = vor.u32 1.1754944e-38, %v2230_v12  ;;  %vm2229_vm1 = vcmp.eq.f32.partialorder %v2228_v46, 8.507059e+37 }
 0x87a   : > { %v3356_v62 = vpop.eup %3355 }
 0x87b   : > { %v2220_v47 = vmul.f32 %v3356_v62, %v2200_v0  ;;  %vm2225_vm6 = vweird.f32 %v3356_v62 }
 0x87c   : > { %vm2226_vm0 = vmor %vm2224_vm15, %vm2225_vm6 }
 0x87d   : > { %v2221_v49 = vsub.f32 1.0, %v2220_v47 }
 0x87f   : > { %v2222_v41 = vmul.f32 %v3356_v62, %v2221_v49 }
 0x881   : > { %v2223_v57 = vadd.f32 %v3356_v62, %v2222_v41 }
 0x883   : > { %v2227_v59 = vsel %vm2226_vm0, %v3356_v62, %v2223_v57 }
 0x884   : > { %v2232_v1 = vsel %vm2229_vm1, %v2231_v35, %v2227_v59  ;;  %v3420_v35 = vmov 32.0  }
 0x885   : > { %v2233_v14 = vmul.f32 %v4074_v25, %v2232_v1 }
 0x886   : > { %v2252_v23 = vpop.permute.xlu0 %2251 }
 0x887   : > { %2272 = vmatpush.bf16.msra.mxu0 %v2252_v23 }
 0x88d   : > { %v2197_v26 = vpop.xlane.xlu2 %2196 }
 0x88e   : > { %3357 = vrcp.f32 %v2197_v26  ;;  %v2215_v42 = vand.u32 2147483648, %v2197_v26  ;;  %v2213_v51 = vand.u32 2147483647, %v2197_v26  ;;  %vm2209_vm3 = vweird.f32 %v2197_v26 }
 0x890   : > { %v2216_v56 = vor.u32 1.1754944e-38, %v2215_v42  ;;  %vm2214_vm9 = vcmp.eq.f32.partialorder %v2213_v51, 8.507059e+37 }
 0x894   : > { %v3358_v54 = vpop.eup %3357 }
 0x895   : > { %v2205_v63 = vmul.f32 %v3358_v54, %v2197_v26  ;;  %v2030_v27 = vpop.xlane.xlu2 %2029  ;;  %vm2210_vm10 = vweird.f32 %v3358_v54 }
 0x896   : > { %3359 = vrcp.f32 %v2030_v27  ;;  %vm2211_vm8 = vmor %vm2209_vm3, %vm2210_vm10  ;;  %v2072_v4 = vand.u32 2147483648, %v2030_v27  ;;  %v2070_v53 = vand.u32 2147483647, %v2030_v27  ;;  %vm2066_vm12 = vweird.f32 %v2030_v27 }
 0x897   : > { %v2206_v61 = vsub.f32 1.0, %v2205_v63 }
 0x898   : > { %v2073_v32 = vor.u32 1.1754944e-38, %v2072_v4  ;;  %vm2071_vm14 = vcmp.eq.f32.partialorder %v2070_v53, 8.507059e+37 }
 0x899   : > { %v2207_v44 = vmul.f32 %v3358_v54, %v2206_v61 }
 0x89b   : > { %v2208_v5 = vadd.f32 %v3358_v54, %v2207_v44 }
 0x89c   : > { %v3360_v6 = vpop.eup %3359 }
 0x89d   : > { %v2212_v10 = vsel %vm2211_vm8, %v3358_v54, %v2208_v5  ;;  %v2062_v9 = vmul.f32 %v3360_v6, %v2030_v27  ;;  %vm2067_vm11 = vweird.f32 %v3360_v6 }
 0x89e   : > { %v2217_v21 = vsel %vm2214_vm9, %v2216_v56, %v2212_v10  ;;  %v1907_v40 = vpop.f32.mrf.mxu2  ;;  %vm2068_vm13 = vmor %vm2066_vm12, %vm2067_vm11 }
 0x89f   : > { %v2218_v2 = vmul.f32 %v4084_v50, %v2217_v21  ;;  %v2063_v45 = vsub.f32 1.0, %v2062_v9 }
 0x8a1   : > { %v2064_v16 = vmul.f32 %v3360_v6, %v2063_v45  ;;  %v2249_v7 = vpack.c.bf16 %v2233_v14, %v2218_v2 }
 0x8a3   : > { %3143 = vmatmul.msk.bf16.vlgmr.msra.gmra.mxu0 %vm927_vm5, %v2249_v7  ;;  %v2065_v11 = vadd.f32 %v3360_v6, %v2064_v16 }
 0x8a5   : > { %v2069_v17 = vsel %vm2068_vm13, %v3360_v6, %v2065_v11 }
 0x8a6   : > { %v1909_v22 = vpop.f32.mrf.mxu2  ;;  %v2074_v13 = vsel %vm2071_vm14, %v2073_v32, %v2069_v17 }
 0x8a7   : > { %v1916_v48 = vpack.c.bf16 %v1909_v22, %v1907_v40  ;;  %v2075_v25 = vmul.f32 %v4096_v8, %v2074_v13 }
 0x8a9   : > { %3131 = vmatmul.msk.bf16.vlgmr.msrb.gmra.mxu1 %vm896_vm4, %v1916_v48  ;;  %v2077_v50 = vpack.c.bf16 %v2075_v25, %v2075_v25 }
 0x8ab   : > { %3138 = vmatmul.msk.bf16.gmra.mxu2 %vm927_vm5, %v2077_v50 }
 0x8ae   : > { %v1912_v43 = vpop.f32.mrf.mxu2 }
 0x8af   : > { %v1917_v37 = vpack.c.bf16 %v1912_v43, %v1912_v43 }
 0x8b1   : > { %v2203_v39 = vpop.xlane.xlu0 %2202 }
 0x8b2   : > { %3361 = vrcp.f32 %v2203_v39  ;;  %v2245_v24 = vand.u32 2147483648, %v2203_v39  ;;  %v2243_v31 = vand.u32 2147483647, %v2203_v39  ;;  %vm2239_vm15 = vweird.f32 %v2203_v39 }
 0x8b3   : > { %3363 = vrcp.f32 %v3420_v35 }
 0x8b4   : > { %v2246_v33 = vor.u32 1.1754944e-38, %v2245_v24  ;;  %vm2244_vm10 = vcmp.eq.f32.partialorder %v2243_v31, 8.507059e+37 }
 0x8b6   : > { %v1914_v15 = vpop.f32.mrf.mxu2 }
 0x8b7   : > { %v3398_v15 = vld [vmem:[%s4425_s28 + $0x18] sm:$0xff] }
 0x8b8   : > { %v3362_v18 = vpop.eup %3361 }
 0x8b9   : > { %v2235_v19 = vmul.f32 %v3362_v18, %v2203_v39  ;;  %3132 = vmatmul.msk.bf16.gmra.mxu1 %vm896_vm4, %v1917_v37  ;;  %vm2240_vm6 = vweird.f32 %v3362_v18  ;;  %v3364_v5 = vpop.eup %3363 }
 0x8ba   : > { %vm2241_vm0 = vmor %vm2239_vm15, %vm2240_vm6  ;;  %v2355_v1 = vmul.f32 32.0, %v3364_v5 }
 0x8bb   : > { %v2236_v60 = vsub.f32 1.0, %v2235_v19 }
 0x8bc   : > { %v2356_v10 = vsub.f32 1.0, %v2355_v1 }
 0x8bd   : > { %v2237_v28 = vmul.f32 %v3362_v18, %v2236_v60 }
 0x8be   : > { %v2357_v2 = vmul.f32 %v3364_v5, %v2356_v10 }
 0x8bf   : > { %v2238_v8 = vadd.f32 %v3362_v18, %v2237_v28 }
 0x8c0   : > { %v2358_v53 = vadd.f32 %v3364_v5, %v2357_v2 }
 0x8c1   : > { %v2242_v52 = vsel %vm2241_vm0, %v3362_v18, %v2238_v8 }
 0x8c2   : > { %v2247_v36 = vsel %vm2244_vm10, %v2246_v33, %v2242_v52 }
 0x8c3   : > { %v2248_v0 = vmul.f32 %v4121_v34, %v2247_v36 }
 0x8c5   : > { %v2250_v62 = vpack.c.bf16 %v2248_v0, %v2248_v0 }
 0x8c7   : > { %3144 = vmatmul.msk.bf16.gmra.mxu0 %vm927_vm5, %v2250_v62  ;;  %vm2350_vm5 = vcmask 254976  }
 0x8cd   : > { %v2101_v23 = vpop.f32.mrf.mxu2 }
 0x8d5   : > { %v2103_v47 = vpop.f32.mrf.mxu2 }
 0x8d6   : > { %v2110_v49 = vpack.c.bf16 %v2103_v47, %v2101_v23 }
 0x8d8   : > { %3139 = vmatmul.msk.bf16.vlgmr.msra.gmra.mxu1 %vm896_vm4, %v2110_v49 }
 0x920   : > { %v2274_v26 = vpop.f32.mrf.mxu0 }
 0x926   : > { %v1933_v41 = vpop.f32.mrf.mxu1 }
 0x927   : > { %v1958_v56 = vadd.f32 %v3997_v3, %v1933_v41  ;;  %v3397_v3 = vld [vmem:[%s4425_s28 + $0x10] sm:$0xff] }
 0x928   : > { %v2276_v54 = vpop.f32.mrf.mxu0 }
 0x929   : > { %v2283_v57 = vpack.c.bf16 %v2276_v54, %v2274_v26 }
 0x92b   : > { %3145 = vmatmul.msk.bf16.vlgmr.msrb.gmra.mxu2 %vm896_vm4, %v2283_v57 }
 0x92e   : > { %v1935_v63 = vpop.f32.mrf.mxu1  ;;  %v2106_v27 = vpop.f32.mrf.mxu2 }
 0x92f   : > { %v2111_v12 = vpack.c.bf16 %v2106_v27, %v2106_v27  ;;  %v1960_v4 = vadd.f32 %v4000_v29, %v1935_v63  ;;  %v2340_v29 = vpop.xlane.xlu2 %2339 }
 0x931   : > { %3140 = vmatmul.msk.bf16.gmra.mxu1 %vm896_vm4, %v2111_v12 }
 0x936   : > { %v1938_v34 = vpop.f32.mrf.mxu1  ;;  %v2108_v46 = vpop.f32.mrf.mxu2 }
 0x937   : > { %v1963_v24 = vadd.f32 %v4002_v30, %v1938_v34  ;;  %v2343_v52 = vpop.xlane.xlu2 %2342  ;;  %v3399_v30 = vld [vmem:[%s4425_s28 + $0x20] sm:$0x3] }
 0x93e   : > { %v1940_v61 = vpop.f32.mrf.mxu1 }
 0x944   : > { %v2279_v42 = vpop.f32.mrf.mxu0 }
 0x945   : > { %v2284_v59 = vpack.c.bf16 %v2279_v42, %v2279_v42 }
 0x947   : > { %3146 = vmatmul.msk.bf16.gmra.mxu2 %vm896_vm4, %v2284_v59  ;;  %vm2359_vm4 = vweird.f32 %v3364_v5 }
 0x948   : > { %v4153_v25 = vsel %vm2359_vm4, %v3364_v5, %v2358_v53  ;;  %v3223_v5 = vld [vmem:[%s3556_s3 + $0x8] sm:$0xff] }
 0x949   : > { %v2361_v43 = vmul.f32 %v4153_v25, %v2340_v29  ;;  %2583 = vmatpush.bf16.msrb.mxu0 %v3223_v5 }
 0x94b   : > { %v4162_v18 = vsub.f32 %v4105_v55, %v2361_v43  ;;  %v2362_v55 = vmul.f32 %v4153_v25, %v2343_v52  ;;  %v4213_v43 = vld [vmem:[%s4433_s12] ss:$0 sm:$0xff] }
 0x94c   : > { %v2281_v44 = vpop.f32.mrf.mxu0 }
 0x94d   : > { %v2371_v60 = vmul.f32 %v4162_v18, %v4162_v18  ;;  %v2367_v49 = vsub.f32 %v4116_v58, %v2362_v55 }
 0x94f   : > { %v2376_v28 = vsel %vm846_vm2, %v2371_v60, 0.0  ;;  %v2372_v41 = vmul.f32 %v2367_v49, %v2367_v49 }
 0x951   : > { %v2379_v54 = vsel %vm846_vm2, %v2372_v41, 0.0 }
 0x955   : > { %v2127_v51 = vpop.f32.mrf.mxu1 }
 0x956   : > { %v2136_v9 = vadd.f32 %v2127_v51, %v1958_v56 }
 0x95d   : > { %v2129_v6 = vpop.f32.mrf.mxu1 }
 0x95e   : > { %v2137_v11 = vadd.f32 %v2129_v6, %v1960_v4 }
 0x9ae   : > { %v2132_v21 = vpop.f32.mrf.mxu1  ;;  %v2300_v40 = vpop.f32.mrf.mxu2 }
 0x9af   : > { %v2309_v14 = vadd.f32 %v2300_v40, %v2136_v9  ;;  %v2138_v31 = vadd.f32 %v2132_v21, %v1963_v24  ;;  %v3222_v9 = vld [vmem:[%s3556_s3] sm:$0xff] }
 0x9b0   : > { %2584 = vmatpush.bf16.msrb.mxu0 %v3222_v9  ;;  %v3230_v9 = vld [vmem:[%s3566_s18 + $0x30] sm:$0xff] }
 0x9b1   : > { %v2315_v45 = vrot.slane %v2309_v14, 7 }
 0x9b3   : > { %v2323_v16 = vsel %vm1014_vm7, %v4036_v20, %v2315_v45 }
 0x9b4   : > { %v2330_v7 = vadd.f32 %v4094_v38, %v2323_v16 }
 0x9b6   : > { %v2134_v32 = vpop.f32.mrf.mxu1  ;;  %v2302_v17 = vpop.f32.mrf.mxu2  ;;  %v2335_v22 = vadd.f32 %v3397_v3, %v2330_v7 }
 0x9b7   : > { %v2310_v13 = vadd.f32 %v2302_v17, %v2137_v11 }
 0x9b8   : > { %v2344_v48 = vsel %vm846_vm2, %v2335_v22, 0.0 }
 0x9b9   : > { %v2316_v50 = vrot.slane %v2310_v13, 7  ;;  %2345 = vadd.xlane.f32.xlu1 %v2344_v48  ;;  %v4205_v48 = vld [vmem:[%s4432_s25] ss:$0 sm:$0xff]  ;;  %s4438_s25 = scalar_lea.vmem %s4437_s24, %s3524_s29 }
 0x9bb   : > { %v2317_v20 = vsel %vm1014_vm7, %v2315_v45, %v2316_v50 }
 0x9bc   : > { %v2331_v39 = vadd.f32 %v4094_v38, %v2317_v20 }
 0x9be   : > { %v2336_v37 = vadd.f32 %v3398_v15, %v2331_v39 }
 0x9c0   : > { %v2347_v19 = vsel %vm846_vm2, %v2336_v37, 0.0 }
 0x9c1   : > { %2348 = vadd.xlane.f32.xlu2 %v2347_v19 }
 0x9c9   : > { %2377 = vadd.xlane.f32.xlu2 %v2376_v28 }
 0x9ca   : > { %v2305_v8 = vpop.f32.mrf.mxu2 }
 0x9cb   : > { %v2311_v33 = vadd.f32 %v2305_v8, %v2138_v31 }
 0x9cd   : > { %v2318_v36 = vrot.slane %v2311_v33, 7 }
 0x9cf   : > { %v2319_v0 = vsel %vm1014_vm7, %v2316_v50, %v2318_v36 }
 0x9d0   : > { %v2332_v62 = vadd.f32 %v4094_v38, %v2319_v0 }
 0x9d2   : > { %v2307_v23 = vpop.f32.mrf.mxu2  ;;  %v2337_v47 = vadd.f32 %v3399_v30, %v2332_v62 }
 0x9d4   : > { %v2351_v26 = vsel %vm2350_vm5, %v2337_v47, 0.0 }
 0x9d5   : > { %2352 = vadd.xlane.f32.xlu2 %v2351_v26 }
 0x9dd   : > { %2380 = vadd.xlane.f32.xlu2 %v2379_v54 }
 0xa2c   : > { %v2346_v57 = vpop.xlane.xlu1 %2345 }
 0xa2d   : > { %v2363_v63 = vmul.f32 %v4153_v25, %v2346_v57 }
 0xa2f   : > { %v4179_v38 = vsub.f32 %v2335_v22, %v2363_v63 }
 0xa31   : > { %v2373_v27 = vmul.f32 %v4179_v38, %v4179_v38 }
 0xa33   : > { %v2382_v12 = vsel %vm846_vm2, %v2373_v27, 0.0 }
 0xa34   : > { %2383 = vadd.xlane.f32.xlu0 %v2382_v12  ;;  %v2349_v58 = vpop.xlane.xlu2 %2348 }
 0xa35   : > { %v2364_v34 = vmul.f32 %v4153_v25, %v2349_v58 }
 0xa37   : > { %v4185_v46 = vsub.f32 %v2336_v37, %v2364_v34 }
 0xa39   : > { %v2374_v61 = vmul.f32 %v4185_v46, %v4185_v46 }
 0xa3b   : > { %v2385_v42 = vsel %vm846_vm2, %v2374_v61, 0.0 }
 0xa3c   : > { %v2378_v59 = vpop.xlane.xlu2 %2377  ;;  %2386 = vadd.xlane.f32.xlu2 %v2385_v42 }
 0xa3d   : > { %v2391_v44 = vmul.f32 %v2378_v59, %v4153_v25 }
 0xa3f   : > { %v2396_v51 = vadd.f32 1e-05, %v2391_v44 }
 0xa41   : > { %3365 = vrsqrt.f32 %v2396_v51  ;;  %vm2407_vm3 = vweird.f32 %v2396_v51 }
 0xa47   : > { %v3366_v6 = vpop.eup %3365 }
 0xa48   : > { %v2353_v35 = vpop.xlane.xlu2 %2352  ;;  %v2402_v10 = vmul.f32 %v3366_v6, %v2396_v51  ;;  %vm2408_vm1 = vweird.f32 %v3366_v6 }
 0xa49   : > { %v2365_v1 = vmul.f32 %v4153_v25, %v2353_v35  ;;  %vm2409_vm8 = vmor %vm2407_vm3, %vm2408_vm1 }
 0xa4a   : > { %v2403_v14 = vmul.f32 %v3366_v6, %v2402_v10 }
 0xa4b   : > { %v4193_v56 = vsub.f32 %v2337_v47, %v2365_v1 }
 0xa4c   : > { %v2404_v16 = vmul.f32 0.5, %v2403_v14  ;;  %v3229_v14 = vld [vmem:[%s3566_s18 + $0x28] sm:$0xff] }
 0xa4d   : > { %v2375_v21 = vmul.f32 %v4193_v56, %v4193_v56 }
 0xa4e   : > { %v2405_v7 = vsub.f32 1.5, %v2404_v16 }
 0xa4f   : > { %v2388_v40 = vsel %vm2350_vm5, %v2375_v21, 0.0 }
 0xa50   : > { %2389 = vadd.xlane.f32.xlu0 %v2388_v40  ;;  %v2381_v2 = vpop.xlane.xlu2 %2380  ;;  %v2406_v11 = vmul.f32 %v3366_v6, %v2405_v7 }
 0xa51   : > { %v2392_v45 = vmul.f32 %v2381_v2, %v4153_v25 }
 0xa52   : > { %v2410_v3 = vsel %vm2409_vm8, %v3366_v6, %v2406_v11  ;;  %v3231_v6 = vld [vmem:[%s3566_s18 + $0x38] sm:$0xff] }
 0xa53   : > { %v2397_v4 = vadd.f32 1e-05, %v2392_v45  ;;  %v2451_v29 = vmul.f32 %v2410_v3, %v4162_v18  ;;  %2716 = vmatpush.bf16.msra.mxu2 %v3231_v6  ;;  %v3219_v3 = vld [vmem:[%s3575_s21 + $0x8] sm:$0xff] }
 0xa54   : > { %2505 = vmatpush.bf16.msrb.mxu1 %v3219_v3 }
 0xa55   : > { %3367 = vrsqrt.f32 %v2397_v4  ;;  %vm2417_vm11 = vweird.f32 %v2397_v4  ;;  %v2460_v39 = vmul.f32 %v4205_v48, %v2451_v29 }
 0xa57   : > { %v4218_v19 = vadd.f32 %v4213_v43, %v2460_v39  ;;  %2717 = vmatpush.bf16.msra.mxu2 %v3230_v9 }
 0xa5b   : > { %v3368_v53 = vpop.eup %3367  ;;  %2718 = vmatpush.bf16.msra.mxu2 %v3229_v14 }
 0xa5c   : > { %v2412_v32 = vmul.f32 %v3368_v53, %v2397_v4  ;;  %vm2418_vm9 = vweird.f32 %v3368_v53  ;;  %v3228_v4 = vld [vmem:[%s3566_s18 + $0x20] sm:$0xff] }
 0xa5d   : > { %vm2419_vm12 = vmor %vm2417_vm11, %vm2418_vm9 }
 0xa5e   : > { %v2413_v17 = vmul.f32 %v3368_v53, %v2412_v32  ;;  %v3226_v32 = vld [vmem:[%s3566_s18 + $0x10] sm:$0xff] }
 0xa5f   : > { %2719 = vmatpush.bf16.msra.mxu2 %v3228_v4 }
 0xa60   : > { %v2414_v22 = vmul.f32 0.5, %v2413_v17  ;;  %v3221_v17 = vld [vmem:[%s3584_s8 + $0x8] sm:$0xff] }
 0xa61   : > { %2538 = vmatpush.bf16.msrb.mxu3 %v3221_v17 }
 0xa62   : > { %v2415_v13 = vsub.f32 1.5, %v2414_v22  ;;  %v3261_v22 = vld [vmem:[%s4434_s19] ss:$0 sm:$0xff] }
 0xa64   : > { %v2416_v50 = vmul.f32 %v3368_v53, %v2415_v13  ;;  %v3224_v13 = vld [vmem:[%s3566_s18] sm:$0xff] }
 0xa66   : > { %v2420_v20 = vsel %vm2419_vm12, %v3368_v53, %v2416_v50  ;;  %v3227_v53 = vld [vmem:[%s3566_s18 + $0x18] sm:$0xff] }
 0xa67   : > { %v2452_v15 = vmul.f32 %v2420_v20, %v2367_v49  ;;  %2720 = vmatpush.bf16.msra.mxu2 %v3227_v53  ;;  %v3218_v20 = vld [vmem:[%s3575_s21] sm:$0xff]  ;;  %s4436_s21 = scalar_lea.vmem %s4389_s13, %s3524_s29 }
 0xa68   : > { %2506 = vmatpush.bf16.msrb.mxu1 %v3218_v20 }
 0xa69   : > { %v2461_v37 = vmul.f32 %v4205_v48, %v2452_v15 }
 0xa6b   : > { %v4221_v18 = vadd.f32 %v4213_v43, %v2461_v37  ;;  %2721 = vmatpush.bf16.msra.mxu2 %v3226_v32 }
 0xa6d   : > { %v2545_v60 = vpack.c.bf16 %v4221_v18, %v4218_v19 }
 0xa6f   : > { %3173 = vmatmul.msk.bf16.vlgmr.msrb.gmra.mxu0 %vm846_vm2, %v2545_v60 }
 0xaa7   : > { %v2384_v24 = vpop.xlane.xlu0 %2383 }
 0xaa8   : > { %v2393_v28 = vmul.f32 %v2384_v24, %v4153_v25 }
 0xaaa   : > { %v2398_v31 = vadd.f32 1e-05, %v2393_v28 }
 0xaac   : > { %3369 = vrsqrt.f32 %v2398_v31  ;;  %vm2427_vm14 = vweird.f32 %v2398_v31 }
 0xaaf   : > { %v2387_v8 = vpop.xlane.xlu2 %2386 }
 0xab0   : > { %v2394_v33 = vmul.f32 %v2387_v8, %v4153_v25 }
 0xab2   : > { %v3370_v52 = vpop.eup %3369  ;;  %v2399_v36 = vadd.f32 1e-05, %v2394_v33 }
 0xab3   : > { %v2422_v0 = vmul.f32 %v3370_v52, %v2398_v31  ;;  %vm2428_vm13 = vweird.f32 %v3370_v52 }
 0xab4   : > { %3371 = vrsqrt.f32 %v2399_v36  ;;  %vm2429_vm6 = vmor %vm2427_vm14, %vm2428_vm13  ;;  %vm2437_vm0 = vweird.f32 %v2399_v36 }
 0xab5   : > { %v2423_v55 = vmul.f32 %v3370_v52, %v2422_v0 }
 0xab7   : > { %v2424_v62 = vmul.f32 0.5, %v2423_v55 }
 0xab9   : > { %v2425_v23 = vsub.f32 1.5, %v2424_v62 }
 0xaba   : > { %v3372_v30 = vpop.eup %3371 }
 0xabb   : > { %v2426_v47 = vmul.f32 %v3370_v52, %v2425_v23  ;;  %v2432_v49 = vmul.f32 %v3372_v30, %v2399_v36  ;;  %vm2438_vm15 = vweird.f32 %v3372_v30 }
 0xabc   : > { %vm2439_vm10 = vmor %vm2437_vm0, %vm2438_vm15 }
 0xabd   : > { %v2433_v26 = vmul.f32 %v3372_v30, %v2432_v49  ;;  %v2430_v41 = vsel %vm2429_vm6, %v3370_v52, %v2426_v47 }
 0xabe   : > { %v2453_v63 = vmul.f32 %v2430_v41, %v4179_v38 }
 0xabf   : > { %v2434_v54 = vmul.f32 0.5, %v2433_v26 }
 0xac0   : > { %v2462_v59 = vmul.f32 %v4205_v48, %v2453_v63 }
 0xac1   : > { %v2435_v57 = vsub.f32 1.5, %v2434_v54 }
 0xac2   : > { %v4234_v51 = vadd.f32 %v4213_v43, %v2462_v59 }
 0xac3   : > { %v2436_v27 = vmul.f32 %v3372_v30, %v2435_v57  ;;  %v2390_v12 = vpop.xlane.xlu0 %2389 }
 0xac4   : > { %v2395_v58 = vmul.f32 %v2390_v12, %v4153_v25 }
 0xac5   : > { %v2440_v34 = vsel %vm2439_vm10, %v3372_v30, %v2436_v27 }
 0xac6   : > { %v2454_v61 = vmul.f32 %v2440_v34, %v4185_v46  ;;  %v2400_v42 = vadd.f32 1e-05, %v2395_v58 }
 0xac8   : > { %3373 = vrsqrt.f32 %v2400_v42  ;;  %v2463_v44 = vmul.f32 %v4205_v48, %v2454_v61  ;;  %vm2447_vm1 = vweird.f32 %v2400_v42 }
 0xaca   : > { %v4237_v38 = vadd.f32 %v4213_v43, %v2463_v44 }
 0xacc   : > { %v2546_v35 = vpack.c.bf16 %v4237_v38, %v4234_v51 }
 0xace   : > { %v3374_v5 = vpop.eup %3373  ;;  %3174 = vmatmul.msk.bf16.gmra.mxu0 %vm846_vm2, %v2546_v35 }
 0xacf   : > { %v2442_v46 = vmul.f32 %v3374_v5, %v2400_v42  ;;  %vm2448_vm4 = vweird.f32 %v3374_v5 }
 0xad0   : > { %vm2449_vm3 = vmor %vm2447_vm1, %vm2448_vm4 }
 0xad1   : > { %v2443_v1 = vmul.f32 %v3374_v5, %v2442_v46 }
 0xad3   : > { %v2444_v10 = vmul.f32 0.5, %v2443_v1 }
 0xad5   : > { %v2445_v21 = vsub.f32 1.5, %v2444_v10 }
 0xad7   : > { %v2446_v40 = vmul.f32 %v3374_v5, %v2445_v21 }
 0xad9   : > { %v2450_v2 = vsel %vm2449_vm3, %v3374_v5, %v2446_v40 }
 0xada   : > { %v2455_v45 = vmul.f32 %v2450_v2, %v4193_v56  ;;  %v3225_v56 = vld [vmem:[%s3566_s18 + $0x8] sm:$0xff] }
 0xadb   : > { %2722 = vmatpush.bf16.msra.mxu2 %v3225_v56 }
 0xadc   : > { %v2464_v16 = vmul.f32 %v4205_v48, %v2455_v45  ;;  %v3220_v48 = vld [vmem:[%s3584_s8] sm:$0xff] }
 0xadd   : > { %2539 = vmatpush.bf16.msrb.mxu3 %v3220_v48 }
 0xade   : > { %v4249_v7 = vadd.f32 %v4213_v43, %v2464_v16  ;;  %v2474_v43 = vld [vmem:[%s4435_s22] sm:$0x3] }
 0xadf   : > { %2723 = vmatpush.bf16.msra.mxu2 %v3224_v13  ;;  %v2475_v15 = vpack.c.bf16 %v2474_v43, %v2474_v43 }
 0xae0   : > { %v2547_v11 = vpack.c.bf16 %v4249_v7, %v4249_v7 }
 0xae1   : > { %3164 = vmatmul.msk.bf16.vlgmr.msrb.gmra.mxu3 %vm846_vm2, %v2475_v15  ;;  %3155 = vmatmul.msk.bf16.vlgmr.msrb.gmra.mxu1 %vm846_vm2, %v2475_v15 }
 0xae2   : > { %3175 = vmatmul.msk.bf16.gmra.mxu0 %vm846_vm2, %v2547_v11 }
 0xaec   : > { %v2586_v29 = vpop.f32.mrf.mxu0 }
 0xaed   : > { %v2587_v50 = vadd.f32 %v3261_v22, %v2586_v29 }
 0xaef   : > { %v2605_v39 = vmul.f32 0.044715, %v2587_v50  ;;  %v2600_v47 = vmul.f32 0.5, %v2587_v50 }
 0xaf1   : > { %v2610_v37 = vmul.f32 %v2605_v39, %v2587_v50 }
 0xaf3   : > { %v2615_v60 = vmul.f32 %v2610_v37, %v2587_v50 }
 0xaf4   : > { %v2588_v24 = vpop.f32.mrf.mxu0 }
 0xaf5   : > { %v2620_v28 = vadd.f32 %v2615_v60, %v2587_v50  ;;  %v2589_v31 = vadd.f32 %v3261_v22, %v2588_v24  ;;  %v3262_v24 = vld [vmem:[%s4436_s21] ss:$0 sm:$0xff] }
 0xaf7   : > { %v2606_v8 = vmul.f32 0.044715, %v2589_v31  ;;  %v2625_v33 = vmul.f32 0.7978846, %v2620_v28  ;;  %v2601_v49 = vmul.f32 0.5, %v2589_v31 }
 0xaf9   : > { %v2611_v52 = vmul.f32 %v2606_v8, %v2589_v31  ;;  %3375 = vtanh.f32 %v2625_v33  ;;  %v3263_v8 = vld [vmem:[%s4438_s25] ss:$0 sm:$0xff] }
 0xafb   : > { %v2616_v36 = vmul.f32 %v2611_v52, %v2589_v31 }
 0xafd   : > { %v2621_v0 = vadd.f32 %v2616_v36, %v2589_v31  ;;  %v3264_v31 = vld [vmem:[%s794_s26] ss:$0 sm:$0xff] }
 0xaff   : > { %v2626_v55 = vmul.f32 0.7978846, %v2621_v0  ;;  %v3376_v62 = vpop.eup %3375 }
 0xb00   : > { %v2635_v23 = vadd.f32 1.0, %v3376_v62 }
 0xb01   : > { %3377 = vtanh.f32 %v2626_v55 }
 0xb02   : > { %v2640_v41 = vmul.f32 %v2635_v23, %v2600_v47 }
 0xb07   : > { %v3378_v30 = vpop.eup %3377 }
 0xb08   : > { %v2636_v26 = vadd.f32 1.0, %v3378_v30 }
 0xb0a   : > { %v2641_v54 = vmul.f32 %v2636_v26, %v2601_v49 }
 0xb0c   : > { %v2645_v57 = vpack.c.bf16 %v2641_v54, %v2640_v41 }
 0xb0e   : > { %2724 = vmatmul.bf16.vlgmr.msra.gmra.mxu2 %v2645_v57 }
 0xb4b   : > { %v2591_v63 = vpop.f32.mrf.mxu0 }
 0xb4c   : > { %v2592_v27 = vadd.f32 %v3261_v22, %v2591_v63 }
 0xb4e   : > { %v2607_v12 = vmul.f32 0.044715, %v2592_v27  ;;  %v2602_v53 = vmul.f32 0.5, %v2592_v27 }
 0xb50   : > { %v2612_v58 = vmul.f32 %v2607_v12, %v2592_v27 }
 0xb52   : > { %v2617_v34 = vmul.f32 %v2612_v58, %v2592_v27 }
 0xb53   : > { %v2593_v61 = vpop.f32.mrf.mxu0 }
 0xb54   : > { %v2594_v42 = vadd.f32 %v3261_v22, %v2593_v61  ;;  %v2622_v59 = vadd.f32 %v2617_v34, %v2592_v27 }
 0xb56   : > { %v2608_v44 = vmul.f32 0.044715, %v2594_v42  ;;  %v2627_v5 = vmul.f32 0.7978846, %v2622_v59  ;;  %v2603_v11 = vmul.f32 0.5, %v2594_v42 }
 0xb58   : > { %v2613_v35 = vmul.f32 %v2608_v44, %v2594_v42  ;;  %3379 = vtanh.f32 %v2627_v5 }
 0xb5a   : > { %v2618_v46 = vmul.f32 %v2613_v35, %v2594_v42 }
 0xb5c   : > { %v2623_v6 = vadd.f32 %v2618_v46, %v2594_v42 }
 0xb5e   : > { %v2628_v1 = vmul.f32 0.7978846, %v2623_v6  ;;  %v3380_v21 = vpop.eup %3379 }
 0xb5f   : > { %v2596_v10 = vpop.f32.mrf.mxu0  ;;  %v2637_v2 = vadd.f32 1.0, %v3380_v21 }
 0xb60   : > { %v2597_v9 = vadd.f32 %v3261_v22, %v2596_v10  ;;  %3381 = vtanh.f32 %v2628_v1  ;;  %v2508_v22 = vpop.f32.mrf.mxu1 }
 0xb61   : > { %v2642_v17 = vmul.f32 %v2637_v2, %v2602_v53  ;;  %v2509_v28 = vadd.f32 %v3262_v24, %v2508_v22 }
 0xb62   : > { %v2609_v40 = vmul.f32 0.044715, %v2597_v9  ;;  %v2604_v43 = vmul.f32 0.5, %v2597_v9 }
 0xb63   : > { %v2739_v33 = vperm.slane %v2509_v28, 0  ;;  %v2740_v27 = vperm.slane %v2509_v28, 1 }
 0xb64   : > { %v2614_v14 = vmul.f32 %v2609_v40, %v2597_v9  ;;  %v2541_v20 = vpop.f32.mrf.mxu3 }
 0xb65   : > { %v2542_v52 = vadd.f32 %v3264_v31, %v2541_v20  ;;  %v2741_v12 = vsel %vm1014_vm7, %v2739_v33, %v2740_v27 }
 0xb66   : > { %v3382_v45 = vpop.eup %3381  ;;  %v2619_v4 = vmul.f32 %v2614_v14, %v2597_v9 }
 0xb67   : > { %v2598_v16 = vpop.f32.mrf.mxu0  ;;  %v2638_v32 = vadd.f32 1.0, %v3382_v45  ;;  %v2742_v62 = vperm.slane %v2542_v52, 0  ;;  %v2743_v58 = vperm.slane %v2542_v52, 1 }
 0xb68   : > { %v2624_v56 = vadd.f32 %v2619_v4, %v2597_v9  ;;  %v2510_v15 = vpop.f32.mrf.mxu1 }
 0xb69   : > { %v2643_v3 = vmul.f32 %v2638_v32, %v2603_v11  ;;  %v2744_v34 = vsel %vm1014_vm7, %v2742_v62, %v2743_v58 }
 0xb6a   : > { %v2629_v13 = vmul.f32 0.7978846, %v2624_v56 }
 0xb6b   : > { %v2646_v48 = vpack.c.bf16 %v2643_v3, %v2642_v17 }
 0xb6c   : > { %3383 = vtanh.f32 %v2629_v13  ;;  %v2543_v60 = vpop.f32.mrf.mxu3 }
 0xb6d   : > { %2729 = vmatmul.bf16.gmra.mxu2 %v2646_v48 }
 0xb72   : > { %v3384_v29 = vpop.eup %3383 }
 0xb73   : > { %v2639_v50 = vadd.f32 1.0, %v3384_v29 }
 0xb75   : > { %v2644_v39 = vmul.f32 %v2639_v50, %v2604_v43 }
 0xb77   : > { %v2647_v37 = vpack.c.bf16 %v2644_v39, %v2644_v39 }
 0xb7d   : > { %2734 = vmatmul.bf16.gmra.mxu2 %v2647_v37 }
 0xb91   : > { %v2725_v36 = vpop.f32.mrf.mxu2 }
 0xb92   : > { %v2726_v0 = vadd.f32 %v3263_v8, %v2725_v36 }
 0xb94   : > { %v2745_v55 = vmul.f32 %v2739_v33, %v2726_v0 }
 0xb96   : > { %v2750_v23 = vadd.f32 %v2745_v55, %v4218_v19 }
 0xb98   : > { %v2755_v30 = vadd.f32 %v2750_v23, %v2742_v62 }
 0xb99   : > { %v2727_v47 = vpop.f32.mrf.mxu2 }
 0xb9a   : > { %v2728_v49 = vadd.f32 %v3263_v8, %v2727_v47  ;;  %v2760_v26 = vsel %vm846_vm2, %v2755_v30, 0.0 }
 0xb9b   : > { %2761 = vadd.xlane.f32.xlu1 %v2760_v26 }
 0xb9c   : > { %v2746_v41 = vmul.f32 %v2739_v33, %v2728_v49 }
 0xb9e   : > { %v2751_v54 = vadd.f32 %v2746_v41, %v4221_v18 }
 0xba0   : > { %v2756_v57 = vadd.f32 %v2751_v54, %v2742_v62 }
 0xba2   : > { %v2763_v63 = vsel %vm846_vm2, %v2756_v57, 0.0 }
 0xba3   : > { %2764 = vadd.xlane.f32.xlu2 %v2763_v63  ;;  %v4328_v63 = vld [vmem:[%s797_s10] ss:$0 sm:$0xff] }
 0xbf0   : > { %v2730_v19 = vpop.f32.mrf.mxu2 }
 0xbf1   : > { %v2731_v61 = vadd.f32 %v3263_v8, %v2730_v19 }
 0xbf3   : > { %v2747_v42 = vmul.f32 %v2741_v12, %v2731_v61 }
 0xbf5   : > { %v2752_v59 = vadd.f32 %v2747_v42, %v4234_v51 }
 0xbf7   : > { %v2757_v44 = vadd.f32 %v2752_v59, %v2744_v34 }
 0xbf8   : > { %v2732_v35 = vpop.f32.mrf.mxu2 }
 0xbf9   : > { %v2733_v5 = vadd.f32 %v3263_v8, %v2732_v35  ;;  %v2766_v18 = vsel %vm846_vm2, %v2757_v44, 0.0 }
 0xbfa   : > { %2767 = vadd.xlane.f32.xlu0 %v2766_v18 }
 0xbfb   : > { %v2748_v46 = vmul.f32 %v2740_v27, %v2733_v5 }
 0xbfd   : > { %v2753_v6 = vadd.f32 %v2748_v46, %v4237_v38 }
 0xbff   : > { %v2758_v1 = vadd.f32 %v2753_v6, %v2743_v58 }
 0xc00   : > { %v2735_v10 = vpop.f32.mrf.mxu2 }
 0xc01   : > { %v2736_v9 = vadd.f32 %v3263_v8, %v2735_v10  ;;  %v2769_v21 = vsel %vm846_vm2, %v2758_v1, 0.0 }
 0xc02   : > { %2770 = vadd.xlane.f32.xlu1 %v2769_v21 }
 0xc03   : > { %v2749_v40 = vmul.f32 %v2740_v27, %v2736_v9 }
 0xc05   : > { %v2754_v14 = vadd.f32 %v2749_v40, %v4249_v7 }
 0xc07   : > { %v2759_v2 = vadd.f32 %v2754_v14, %v2743_v58  ;;  %v4335_v58 = vld [vmem:[%s800_s11] ss:$0 sm:$0xff] }
 0xc08   : > { %v2737_v51 = vpop.f32.mrf.mxu2 }
 0xc09   : > { %v2772_v45 = vsel %vm2350_vm5, %v2759_v2, 0.0 }
 0xc0a   : > { %2773 = vadd.xlane.f32.xlu2 %v2772_v45 }
 0xc0e   : > { %v2762_v4 = vpop.xlane.xlu1 %2761 }
 0xc0f   : > { %v2775_v16 = vmul.f32 %v2762_v4, %v4153_v25 }
 0xc11   : > { %v2780_v53 = vsub.f32 %v2755_v30, %v2775_v16 }
 0xc13   : > { %v2785_v11 = vmul.f32 %v2780_v53, %v2780_v53 }
 0xc15   : > { %v2790_v38 = vsel %vm846_vm2, %v2785_v11, 0.0 }
 0xc16   : > { %v2765_v32 = vpop.xlane.xlu2 %2764  ;;  %2791 = vadd.xlane.f32.xlu0 %v2790_v38 }
 0xc17   : > { %v2776_v56 = vmul.f32 %v2765_v32, %v4153_v25 }
 0xc19   : > { %v2781_v17 = vsub.f32 %v2756_v57, %v2776_v56 }
 0xc1b   : > { %v2786_v3 = vmul.f32 %v2781_v17, %v2781_v17 }
 0xc1d   : > { %v2793_v7 = vsel %vm846_vm2, %v2786_v3, 0.0 }
 0xc1e   : > { %2794 = vadd.xlane.f32.xlu1 %v2793_v7 }
 0xc6d   : > { %v2768_v13 = vpop.xlane.xlu0 %2767 }
 0xc6e   : > { %v2777_v48 = vmul.f32 %v2768_v13, %v4153_v25 }
 0xc70   : > { %v4304_v22 = vsub.f32 %v2757_v44, %v2777_v48 }
 0xc72   : > { %v2787_v29 = vmul.f32 %v4304_v22, %v4304_v22 }
 0xc74   : > { %v2796_v50 = vsel %vm846_vm2, %v2787_v29, 0.0 }
 0xc75   : > { %2797 = vadd.xlane.f32.xlu2 %v2796_v50  ;;  %v2771_v20 = vpop.xlane.xlu1 %2770 }
 0xc76   : > { %v2778_v43 = vmul.f32 %v2771_v20, %v4153_v25 }
 0xc78   : > { %v4310_v39 = vsub.f32 %v2758_v1, %v2778_v43 }
 0xc7a   : > { %v2788_v15 = vmul.f32 %v4310_v39, %v4310_v39 }
 0xc7c   : > { %v2799_v37 = vsel %vm846_vm2, %v2788_v15, 0.0 }
 0xc7d   : > { %v2774_v60 = vpop.xlane.xlu2 %2773  ;;  %2800 = vadd.xlane.f32.xlu0 %v2799_v37 }
 0xc7e   : > { %v2779_v24 = vmul.f32 %v2774_v60, %v4153_v25 }
 0xc80   : > { %v4316_v28 = vsub.f32 %v2759_v2, %v2779_v24 }
 0xc82   : > { %v2789_v31 = vmul.f32 %v4316_v28, %v4316_v28 }
 0xc84   : > { %v2802_v8 = vsel %vm2350_vm5, %v2789_v31, 0.0 }
 0xc85   : > { %2803 = vadd.xlane.f32.xlu1 %v2802_v8 }
 0xc89   : > { %v2792_v33 = vpop.xlane.xlu0 %2791 }
 0xc8a   : > { %v2805_v52 = vmul.f32 %v2792_v33, %v4153_v25 }
 0xc8c   : > { %v2810_v36 = vadd.f32 1e-05, %v2805_v52 }
 0xc8e   : > { %3385 = vrsqrt.f32 %v2810_v36  ;;  %vm2821_vm8 = vweird.f32 %v2810_v36 }
 0xc91   : > { %v2795_v0 = vpop.xlane.xlu1 %2794 }
 0xc92   : > { %v2806_v55 = vmul.f32 %v2795_v0, %v4153_v25 }
 0xc94   : > { %v3386_v62 = vpop.eup %3385  ;;  %v2811_v23 = vadd.f32 1e-05, %v2806_v55 }
 0xc95   : > { %v2816_v30 = vmul.f32 %v3386_v62, %v2810_v36  ;;  %vm2822_vm7 = vweird.f32 %v3386_v62 }
 0xc96   : > { %3387 = vrsqrt.f32 %v2811_v23  ;;  %vm2823_vm9 = vmor %vm2821_vm8, %vm2822_vm7  ;;  %vm2831_vm12 = vweird.f32 %v2811_v23 }
 0xc97   : > { %v2817_v47 = vmul.f32 %v3386_v62, %v2816_v30 }
 0xc99   : > { %v2818_v49 = vmul.f32 0.5, %v2817_v47 }
 0xc9b   : > { %v2819_v26 = vsub.f32 1.5, %v2818_v49 }
 0xc9c   : > { %v3388_v41 = vpop.eup %3387 }
 0xc9d   : > { %v2820_v54 = vmul.f32 %v3386_v62, %v2819_v26  ;;  %v2826_v57 = vmul.f32 %v3388_v41, %v2811_v23  ;;  %vm2832_vm11 = vweird.f32 %v3388_v41 }
 0xc9e   : > { %vm2833_vm13 = vmor %vm2831_vm12, %vm2832_vm11 }
 0xc9f   : > { %v2824_v27 = vsel %vm2823_vm9, %v3386_v62, %v2820_v54  ;;  %v2827_v12 = vmul.f32 %v3388_v41, %v2826_v57 }
 0xca0   : > { %v2865_v34 = vmul.f32 %v2824_v27, %v2780_v53 }
 0xca1   : > { %v2828_v19 = vmul.f32 0.5, %v2827_v12 }
 0xca2   : > { %v2874_v61 = vmul.f32 %v4328_v63, %v2865_v34 }
 0xca3   : > { %v2829_v42 = vsub.f32 1.5, %v2828_v19 }
 0xca4   : > { %v2883_v59 = vadd.f32 %v4335_v58, %v2874_v61 }
 0xca5   : > { %v2830_v44 = vmul.f32 %v3388_v41, %v2829_v42 }
 0xca6   : > { %2888 = vst.msk [vmem:[%s4425_s28] sm:$0xff] %vm846_vm2, %v2883_v59 }
 0xca7   : > { %v2834_v35 = vsel %vm2833_vm13, %v3388_v41, %v2830_v44 }
 0xca8   : > { %v2866_v5 = vmul.f32 %v2834_v35, %v2781_v17 }
 0xcaa   : > { %v2875_v18 = vmul.f32 %v4328_v63, %v2866_v5 }
 0xcac   : > { %v2884_v46 = vadd.f32 %v4335_v58, %v2875_v18 }
 0xcae   : > { %2889 = vst.msk [vmem:[%s4425_s28 + $0x8] sm:$0xff] %vm846_vm2, %v2884_v46 }
 0xce8   : > { %v2798_v6 = vpop.xlane.xlu2 %2797 }
 0xce9   : > { %v2807_v1 = vmul.f32 %v2798_v6, %v4153_v25 }
 0xceb   : > { %v2812_v10 = vadd.f32 1e-05, %v2807_v1 }
 0xced   : > { %3389 = vrsqrt.f32 %v2812_v10  ;;  %vm2841_vm6 = vweird.f32 %v2812_v10 }
 0xcf0   : > { %v2801_v9 = vpop.xlane.xlu0 %2800 }
 0xcf1   : > { %v2808_v21 = vmul.f32 %v2801_v9, %v4153_v25 }
 0xcf3   : > { %v3390_v40 = vpop.eup %3389  ;;  %v2813_v14 = vadd.f32 1e-05, %v2808_v21 }
 0xcf4   : > { %v2836_v2 = vmul.f32 %v3390_v40, %v2812_v10  ;;  %vm2842_vm14 = vweird.f32 %v3390_v40 }
 0xcf5   : > { %3391 = vrsqrt.f32 %v2813_v14  ;;  %vm2843_vm15 = vmor %vm2841_vm6, %vm2842_vm14  ;;  %vm2851_vm10 = vweird.f32 %v2813_v14 }
 0xcf6   : > { %v2837_v51 = vmul.f32 %v3390_v40, %v2836_v2 }
 0xcf8   : > { %v2838_v45 = vmul.f32 0.5, %v2837_v51  ;;  %v2804_v4 = vpop.xlane.xlu1 %2803 }
 0xcf9   : > { %v2809_v16 = vmul.f32 %v2804_v4, %v4153_v25 }
 0xcfa   : > { %v2839_v53 = vsub.f32 1.5, %v2838_v45 }
 0xcfb   : > { %v3392_v11 = vpop.eup %3391  ;;  %v2814_v38 = vadd.f32 1e-05, %v2809_v16 }
 0xcfc   : > { %v2840_v32 = vmul.f32 %v3390_v40, %v2839_v53  ;;  %v2846_v56 = vmul.f32 %v3392_v11, %v2813_v14  ;;  %vm2852_vm0 = vweird.f32 %v3392_v11 }
 0xcfd   : > { %3393 = vrsqrt.f32 %v2814_v38  ;;  %vm2853_vm4 = vmor %vm2851_vm10, %vm2852_vm0  ;;  %vm2861_vm3 = vweird.f32 %v2814_v38 }
 0xcfe   : > { %v2844_v17 = vsel %vm2843_vm15, %v3390_v40, %v2840_v32  ;;  %v2847_v3 = vmul.f32 %v3392_v11, %v2846_v56 }
 0xcff   : > { %v2867_v7 = vmul.f32 %v2844_v17, %v4304_v22 }
 0xd00   : > { %v2848_v13 = vmul.f32 0.5, %v2847_v3 }
 0xd01   : > { %v2876_v48 = vmul.f32 %v4328_v63, %v2867_v7 }
 0xd02   : > { %v2849_v29 = vsub.f32 1.5, %v2848_v13 }
 0xd03   : > { %v3394_v50 = vpop.eup %3393  ;;  %v2885_v25 = vadd.f32 %v4335_v58, %v2876_v48 }
 0xd04   : > { %v2850_v20 = vmul.f32 %v3392_v11, %v2849_v29  ;;  %v2856_v43 = vmul.f32 %v3394_v50, %v2814_v38  ;;  %vm2862_vm1 = vweird.f32 %v3394_v50 }
 0xd05   : > { %2890 = vst.msk [vmem:[%s4425_s28 + $0x10] sm:$0xff] %vm846_vm2, %v2885_v25  ;;  %vm2863_vm7 = vmor %vm2861_vm3, %vm2862_vm1 }
 0xd06   : > { %v2854_v15 = vsel %vm2853_vm4, %v3392_v11, %v2850_v20  ;;  %v2857_v37 = vmul.f32 %v3394_v50, %v2856_v43 }
 0xd07   : > { %v2868_v22 = vmul.f32 %v2854_v15, %v4310_v39 }
 0xd08   : > { %v2858_v60 = vmul.f32 0.5, %v2857_v37 }
 0xd09   : > { %v2877_v24 = vmul.f32 %v4328_v63, %v2868_v22 }
 0xd0a   : > { %v2859_v31 = vsub.f32 1.5, %v2858_v60 }
 0xd0b   : > { %v2886_v8 = vadd.f32 %v4335_v58, %v2877_v24 }
 0xd0c   : > { %v2860_v33 = vmul.f32 %v3394_v50, %v2859_v31 }
 0xd0d   : > { %2891 = vst.msk [vmem:[%s4425_s28 + $0x18] sm:$0xff] %vm846_vm2, %v2886_v8 }
 0xd0e   : > { %v2864_v52 = vsel %vm2863_vm7, %v3394_v50, %v2860_v33 }
 0xd0f   : > { %v2869_v36 = vmul.f32 %v2864_v52, %v4316_v28 }
 0xd11   : > { %v2878_v39 = vmul.f32 %v4328_v63, %v2869_v36 }
 0xd13   : > { %v2887_v0 = vadd.f32 %v4335_v58, %v2878_v39 }
 0xd15   : > { %2892 = vst.msk [vmem:[%s4425_s28 + $0x20] sm:$0x3] %vm2350_vm5, %v2887_v0 }
 0xd16 PF: > { %s4441_s2 = sld [smem:[#allocation2_spill]] }
 0xd1c   : > { %s28_s27 = sadd.s32 1, %s4441_s2  }
 0xd1d   : > { %p25_p5 = scmp.ge.s32.totalorder %s28_s27, 4  }
 0xd1f   :  { %27 = sbr.rel (!%p25_p5) target bundleno = 13 (0xd), region = 167 }

</bundles_post_ra>
